<compile_context>
chip_gen: v6e
topology: v6e:2x2x1
jax: 0.10.0
libtpu: 0.0.40
codegen_flags: <defaults>
</compile_context>

<pallas_src>
import jax
import jax.numpy as jnp
from jax.experimental import pallas as pl
from jax.experimental.pallas import tpu as pltpu

D_MODEL = 128          # multiple of 128 -> lane-dense activations
N_HEAD = 4
HEAD_DIM = D_MODEL // N_HEAD
DIM_FF = 256
LN_EPS = 1e-5          # torch.nn.LayerNorm default


# ---------------------------------------------------------------------------
# In-kernel helpers
# ---------------------------------------------------------------------------
def _layer_norm(x, gamma, beta):
    mu = jnp.mean(x, axis=-1, keepdims=True)
    var = jnp.mean(jnp.square(x - mu), axis=-1, keepdims=True)   # biased, like torch
    return (x - mu) * jax.lax.rsqrt(var + LN_EPS) * gamma + beta


def _gelu_exact(x):
    # F.gelu default is the exact (erf) formulation.
    return 0.5 * x * (1.0 + jax.lax.erf(x * (1.0 / jnp.sqrt(2.0)).astype(x.dtype)))


# ---------------------------------------------------------------------------
# Kernel: one grid step == BB batch elements, flattened to R = BB*N rows.
# ---------------------------------------------------------------------------
def _make_kernel(n_head, head_dim):
    scale = float(head_dim) ** -0.5

    def kernel(x_ref, bias_ref, wqkv_ref, wp_ref, w1_ref, w2_ref,
               vecs_ref, b1_ref, out_ref):
        x = x_ref[...]                               # (R, C) f32
        C = x.shape[-1]

        vecs = vecs_ref[...]                         # (6, C) packed vectors
        g0, be0 = vecs[0:1], vecs[1:2]               # pre_norm gamma/beta
        g1, be1 = vecs[2:3], vecs[3:4]               # norm1 gamma/beta
        bp, b2 = vecs[4:5], vecs[5:6]                # proj bias, linear2 bias

        # --- pre_norm --------------------------------------------------------
        y = _layer_norm(x, g0, be0)

        # --- self attention (attn_drop / proj_drop identity in eval) ---------
        # fused QKV projection: single (R,C) @ (C,3C) MXU matmul
        qkv = jnp.dot(y, wqkv_ref[...], preferred_element_type=jnp.float32)
        q, k, v = qkv[:, :C], qkv[:, C:2 * C], qkv[:, 2 * C:]   # 128-lane-aligned slices

        # head split: stack static lane-slices on a NEW LEADING axis -> (H, R, D)
        # (avoids minor-dim reshapes; all contractions below are head-batched)
        def split_heads(t):
            return jnp.stack(
                [t[:, h * head_dim:(h + 1) * head_dim] for h in range(n_head)],
                axis=0)

        qh = split_heads(q) * scale                  # (H, R, D)
        kh = split_heads(k)
        vh = split_heads(v)

        # block-local attention over all R rows; bias masks cross-batch pairs.
        s = jnp.einsum('hrd,hsd->hrs', qh, kh,
                       preferred_element_type=jnp.float32)       # (H, R, R)
        s = s + bias_ref[...]                                     # (1, R, R) block-diag mask
        m = jnp.max(s, axis=-1, keepdims=True)
        e = jnp.exp(s - m)
        # EUP approximate reciprocal for the softmax denominator.
        p = e * pl.reciprocal(jnp.sum(e, axis=-1, keepdims=True), approx=True)
        o = jnp.einsum('hrs,hsd->hrd', p, vh,
                       preferred_element_type=jnp.float32)        # (H, R, D)

        # output projection: head-batched (D,C) matmuls, summed over heads
        # (equivalent to concat(heads) @ Wp, without the lane concat).
        proj = jnp.einsum('hrd,hdc->hrc', o, wp_ref[...],
                          preferred_element_type=jnp.float32)     # (H, R, C)
        attn = jnp.sum(proj, axis=0) + bp                          # (R, C)

        # --- residual (drop_path identity) + norm1 ----------------------------
        x1 = x + attn
        xn = _layer_norm(x1, g1, be1)

        # --- feed-forward (dropout1 / dropout2 identity) ----------------------
        hid = _gelu_exact(jnp.dot(xn, w1_ref[...],
                                  preferred_element_type=jnp.float32) + b1_ref[...])
        ff = jnp.dot(hid, w2_ref[...],
                     preferred_element_type=jnp.float32) + b2

        # final residual uses the post-norm1 tensor, exactly like the module.
        out_ref[...] = (xn + ff).astype(out_ref.dtype)

    return kernel


# ---------------------------------------------------------------------------
# Wrapper
# ---------------------------------------------------------------------------
def transformer_encoder_layer(src, torch_params, *, n_head=N_HEAD, block_rows=128):
    B, N, C = src.shape
    assert C % 128 == 0, "d_model must be a multiple of 128 (lane-dense layout)"
    assert N % 8 == 0, "sequence length must be a multiple of 8 (f32 sublane tile)"
    assert C % n_head == 0
    D = C // n_head
    F = torch_params['lin1_w'].shape[0]

    # BB batch elements per grid step (R = BB*N rows).  Keep R ~128-256: the
    # block-local score tensor is (H, R, R), so re-derive this cap for v7x's
    # smaller (64 MiB) VMEM if N / C are scaled up.
    bb = max(1, min(B, block_rows // N))
    while B % bb:
        bb -= 1
    R = bb * N
    grid = (B // bb,)

    # ---- pack parameters: 7 kernel inputs instead of 13 ----------------------
    tp = torch_params
    wqkv = tp['qkv_w'].T                                     # (C, 3C)  x @ W
    wp_h = tp['proj_w'].T.reshape(n_head, D, C)              # (H, D, C)
    w1 = tp['lin1_w'].T                                      # (C, F)
    w2 = tp['lin2_w'].T                                      # (F, C)
    vecs = jnp.stack([tp['pre_norm_w'], tp['pre_norm_b'],
                      tp['norm1_w'], tp['norm1_b'],
                      tp['proj_b'], tp['lin2_b']], axis=0)   # (6, C)
    b1 = tp['lin1_b'].reshape(1, F)

    # block-diagonal additive mask: rows of different batch elements inside the
    # same R-row block must not attend to each other.
    blk = jnp.arange(R, dtype=jnp.int32) // N
    bias = jnp.where(blk[:, None] == blk[None, :], 0.0, -1e9)
    bias = bias.astype(jnp.float32).reshape(1, R, R)

    x2 = src.reshape(B * N, C)                               # lane-dense 2-D slab
    kernel = _make_kernel(n_head, D)

    out2 = pl.pallas_call(
        kernel,
        out_shape=jax.ShapeDtypeStruct((B * N, C), src.dtype),
        grid=grid,
        in_specs=[
            pl.BlockSpec((R, C), lambda i: (i, 0)),              # activations
            pl.BlockSpec((1, R, R), lambda i: (0, 0, 0)),        # attn bias (fetched once)
            pl.BlockSpec((C, 3 * C), lambda i: (0, 0)),          # fused qkv weight
            pl.BlockSpec((n_head, D, C), lambda i: (0, 0, 0)),   # head-split proj weight
            pl.BlockSpec((C, F), lambda i: (0, 0)),              # linear1 weight
            pl.BlockSpec((F, C), lambda i: (0, 0)),              # linear2 weight
            pl.BlockSpec((6, C), lambda i: (0, 0)),              # packed LN/bias vectors
            pl.BlockSpec((1, F), lambda i: (0, 0)),              # linear1 bias
        ],
        out_specs=pl.BlockSpec((R, C), lambda i: (i, 0)),
        compiler_params=pltpu.CompilerParams(
            dimension_semantics=("parallel",),            # independent batch blocks
            vmem_limit_bytes=32 * 1024 * 1024),
    )(x2, bias, wqkv, wp_h, w1, w2, vecs, b1)

    return out2.reshape(B, N, C)


# ---------------------------------------------------------------------------
# Pure-JAX reference (mirrors the PyTorch forward, eval mode)
# ---------------------------------------------------------------------------
def reference(src, tp):
    def ln(x, g, b):
        mu = x.mean(-1, keepdims=True)
        var = ((x - mu) ** 2).mean(-1, keepdims=True)
        return (x - mu) / jnp.sqrt(var + LN_EPS) * g + b

    B, N, C = src.shape
    H, D = N_HEAD, C // N_HEAD
    y = ln(src, tp['pre_norm_w'], tp['pre_norm_b'])
    qkv = y @ tp['qkv_w'].T
    qkv = qkv.reshape(B, N, 3, H, D).transpose(2, 0, 3, 1, 4)
    q, k, v = qkv[0], qkv[1], qkv[2]
    s = jnp.einsum('bhnd,bhmd->bhnm', q, k) * (D ** -0.5)
    p = jax.nn.softmax(s, axis=-1)
    o = jnp.einsum('bhnm,bhmd->bhnd', p, v).transpose(0, 2, 1, 3).reshape(B, N, C)
    attn = o @ tp['proj_w'].T + tp['proj_b']
    x1 = src + attn
    xn = ln(x1, tp['norm1_w'], tp['norm1_b'])
    hid = jax.nn.gelu(xn @ tp['lin1_w'].T + tp['lin1_b'], approximate=False)
    ff = hid @ tp['lin2_w'].T + tp['lin2_b']
    return xn + ff


def init_torch_params(key, C, F):
    ks = jax.random.split(key, 11)
    s = 0.05
    return {
        'pre_norm_w': 1.0 + 0.1 * jax.random.normal(ks[0], (C,), jnp.float32),
        'pre_norm_b': 0.1 * jax.random.normal(ks[1], (C,), jnp.float32),
        'qkv_w': s * jax.random.normal(ks[2], (3 * C, C), jnp.float32),
        'proj_w': s * jax.random.normal(ks[3], (C, C), jnp.float32),
        'proj_b': 0.1 * jax.random.normal(ks[4], (C,), jnp.float32),
        'norm1_w': 1.0 + 0.1 * jax.random.normal(ks[5], (C,), jnp.float32),
        'norm1_b': 0.1 * jax.random.normal(ks[6], (C,), jnp.float32),
        'lin1_w': s * jax.random.normal(ks[7], (F, C), jnp.float32),
        'lin1_b': 0.1 * jax.random.normal(ks[8], (F,), jnp.float32),
        'lin2_w': s * jax.random.normal(ks[9], (C, F), jnp.float32),
        'lin2_b': 0.1 * jax.random.normal(ks[10], (C,), jnp.float32),
    }


if __name__ == "__main__":
    # TODO(synk): Dropout / DropPath are identity in eval mode; stochastic
    # training-mode masks are intentionally not implemented in the kernel.
    key = jax.random.PRNGKey(0)
    pkey, xkey = jax.random.split(key)

    B, N = 8, 32
    params = init_torch_params(pkey, D_MODEL, DIM_FF)
    src = jax.random.normal(xkey, (B, N, D_MODEL), jnp.float32)

    out = transformer_encoder_layer(src, params)
    out = jax.block_until_ready(out)

    ref = reference(src, params)
    err = float(jnp.max(jnp.abs(out - ref)))
    assert out.shape == (B, N, D_MODEL)
    # approx reciprocal in softmax + MXU f32 accumulation => slightly looser tol
    assert jnp.allclose(out, ref, rtol=5e-3, atol=5e-3), f"max abs err {err}"
    print("KERNEL_OK")
</pallas_src>

<mosaic_0001>
module attributes {stable_mosaic.version = 11 : i64} {
  func.func @kernel(%arg0: i32, %arg1: memref<128x128xf32, #tpu.memory_space<vmem>>, %arg2: memref<1x128x128xf32, #tpu.memory_space<vmem>>, %arg3: memref<128x384xf32, #tpu.memory_space<vmem>>, %arg4: memref<4x32x128xf32, #tpu.memory_space<vmem>>, %arg5: memref<128x256xf32, #tpu.memory_space<vmem>>, %arg6: memref<256x128xf32, #tpu.memory_space<vmem>>, %arg7: memref<6x128xf32, #tpu.memory_space<vmem>>, %arg8: memref<1x256xf32, #tpu.memory_space<vmem>>, %arg9: memref<128x128xf32, #tpu.memory_space<vmem>>) attributes {dimension_semantics = [#tpu.dimension_semantics<parallel>], iteration_bounds = array<i64: 2>, scalar_prefetch = 0 : i64, scratch_operands = 0 : i64, tpu.core_type = #tpu.core_type<tc>, window_params = [{transform_indices = @transform_0, window_bounds = array<i64: 128, 128>}, {pipeline_mode = #tpu.pipeline_mode<synchronous>, transform_indices = @transform_1, window_bounds = array<i64: 1, 128, 128>}, {pipeline_mode = #tpu.pipeline_mode<synchronous>, transform_indices = @transform_2, window_bounds = array<i64: 128, 384>}, {pipeline_mode = #tpu.pipeline_mode<synchronous>, transform_indices = @transform_3, window_bounds = array<i64: 4, 32, 128>}, {pipeline_mode = #tpu.pipeline_mode<synchronous>, transform_indices = @transform_4, window_bounds = array<i64: 128, 256>}, {pipeline_mode = #tpu.pipeline_mode<synchronous>, transform_indices = @transform_5, window_bounds = array<i64: 256, 128>}, {pipeline_mode = #tpu.pipeline_mode<synchronous>, transform_indices = @transform_6, window_bounds = array<i64: 6, 128>}, {pipeline_mode = #tpu.pipeline_mode<synchronous>, transform_indices = @transform_7, window_bounds = array<i64: 1, 256>}, {transform_indices = @transform_8, window_bounds = array<i64: 128, 128>}]} {
    %c0 = arith.constant 0 : index
    %c0_0 = arith.constant 0 : index
    %0 = vector.load %arg1[%c0, %c0_0] : memref<128x128xf32, #tpu.memory_space<vmem>>, vector<128x128xf32>
    %c0_1 = arith.constant 0 : index
    %c0_2 = arith.constant 0 : index
    %1 = vector.load %arg7[%c0_1, %c0_2] : memref<6x128xf32, #tpu.memory_space<vmem>>, vector<6x128xf32>
    %2 = vector.extract_strided_slice %1 {offsets = [0, 0], sizes = [1, 128], strides = [1, 1]} : vector<6x128xf32> to vector<1x128xf32>
    %3 = vector.extract_strided_slice %1 {offsets = [1, 0], sizes = [1, 128], strides = [1, 1]} : vector<6x128xf32> to vector<1x128xf32>
    %4 = vector.extract_strided_slice %1 {offsets = [2, 0], sizes = [1, 128], strides = [1, 1]} : vector<6x128xf32> to vector<1x128xf32>
    %5 = vector.extract_strided_slice %1 {offsets = [3, 0], sizes = [1, 128], strides = [1, 1]} : vector<6x128xf32> to vector<1x128xf32>
    %6 = vector.extract_strided_slice %1 {offsets = [4, 0], sizes = [1, 128], strides = [1, 1]} : vector<6x128xf32> to vector<1x128xf32>
    %7 = vector.extract_strided_slice %1 {offsets = [5, 0], sizes = [1, 128], strides = [1, 1]} : vector<6x128xf32> to vector<1x128xf32>
    %cst = arith.constant dense<0.000000e+00> : vector<128xf32>
    %8 = vector.multi_reduction <add>, %0, %cst [1] : vector<128x128xf32> to vector<128xf32>
    %9 = vector.shape_cast %8 : vector<128xf32> to vector<128x1xf32>
    %cst_3 = arith.constant 1.280000e+02 : f32
    %10 = vector.broadcast %cst_3 : f32 to vector<128x1xf32>
    %11 = arith.divf %9, %10 : vector<128x1xf32>
    %12 = vector.broadcast %11 : vector<128x1xf32> to vector<128x128xf32>
    %13 = arith.subf %0, %12 : vector<128x128xf32>
    %14 = arith.mulf %13, %13 : vector<128x128xf32>
    %cst_4 = arith.constant dense<0.000000e+00> : vector<128xf32>
    %15 = vector.multi_reduction <add>, %14, %cst_4 [1] : vector<128x128xf32> to vector<128xf32>
    %16 = vector.shape_cast %15 : vector<128xf32> to vector<128x1xf32>
    %cst_5 = arith.constant 1.280000e+02 : f32
    %17 = vector.broadcast %cst_5 : f32 to vector<128x1xf32>
    %18 = arith.divf %16, %17 : vector<128x1xf32>
    %19 = vector.broadcast %11 : vector<128x1xf32> to vector<128x128xf32>
    %20 = arith.subf %0, %19 : vector<128x128xf32>
    %cst_6 = arith.constant 9.99999974E-6 : f32
    %21 = vector.broadcast %cst_6 : f32 to vector<128x1xf32>
    %22 = arith.addf %18, %21 : vector<128x1xf32>
    %23 = math.rsqrt %22 : vector<128x1xf32>
    %24 = vector.broadcast %23 : vector<128x1xf32> to vector<128x128xf32>
    %25 = arith.mulf %20, %24 : vector<128x128xf32>
    %26 = vector.broadcast %2 : vector<1x128xf32> to vector<128x128xf32>
    %27 = arith.mulf %25, %26 : vector<128x128xf32>
    %28 = vector.broadcast %3 : vector<1x128xf32> to vector<128x128xf32>
    %29 = arith.addf %27, %28 : vector<128x128xf32>
    %c0_7 = arith.constant 0 : index
    %c0_8 = arith.constant 0 : index
    %30 = vector.load %arg3[%c0_7, %c0_8] : memref<128x384xf32, #tpu.memory_space<vmem>>, vector<128x384xf32>
    %cst_9 = arith.constant dense<0.000000e+00> : vector<128x384xf32>
    %31 = tpu.matmul %29, %30, %cst_9 {dimension_numbers = #tpu.dot_dimension_numbers<[1], [0], [0], [1], [0, 0, 1, 1], [], []>} : vector<128x128xf32>, vector<128x384xf32>, vector<128x384xf32> -> vector<128x384xf32>
    %32 = vector.extract_strided_slice %31 {offsets = [0, 0], sizes = [128, 128], strides = [1, 1]} : vector<128x384xf32> to vector<128x128xf32>
    %33 = vector.extract_strided_slice %31 {offsets = [0, 128], sizes = [128, 128], strides = [1, 1]} : vector<128x384xf32> to vector<128x128xf32>
    %34 = vector.extract_strided_slice %31 {offsets = [0, 256], sizes = [128, 128], strides = [1, 1]} : vector<128x384xf32> to vector<128x128xf32>
    %35 = vector.extract_strided_slice %32 {offsets = [0, 0], sizes = [128, 32], strides = [1, 1]} : vector<128x128xf32> to vector<128x32xf32>
    %36 = vector.extract_strided_slice %32 {offsets = [0, 32], sizes = [128, 32], strides = [1, 1]} : vector<128x128xf32> to vector<128x32xf32>
    %37 = vector.extract_strided_slice %32 {offsets = [0, 64], sizes = [128, 32], strides = [1, 1]} : vector<128x128xf32> to vector<128x32xf32>
    %38 = vector.extract_strided_slice %32 {offsets = [0, 96], sizes = [128, 32], strides = [1, 1]} : vector<128x128xf32> to vector<128x32xf32>
    %39 = vector.shape_cast %35 : vector<128x32xf32> to vector<1x128x32xf32>
    %40 = vector.shape_cast %36 : vector<128x32xf32> to vector<1x128x32xf32>
    %41 = vector.shape_cast %37 : vector<128x32xf32> to vector<1x128x32xf32>
    %42 = vector.shape_cast %38 : vector<128x32xf32> to vector<1x128x32xf32>
    %43 = tpu.concatenate %39, %40, %41, %42 in 0 : vector<1x128x32xf32>, vector<1x128x32xf32>, vector<1x128x32xf32>, vector<1x128x32xf32> -> vector<4x128x32xf32>
    %cst_10 = arith.constant 0.176776692 : f32
    %44 = vector.broadcast %cst_10 : f32 to vector<4x128x32xf32>
    %45 = arith.mulf %43, %44 : vector<4x128x32xf32>
    %46 = vector.extract_strided_slice %33 {offsets = [0, 0], sizes = [128, 32], strides = [1, 1]} : vector<128x128xf32> to vector<128x32xf32>
    %47 = vector.extract_strided_slice %33 {offsets = [0, 32], sizes = [128, 32], strides = [1, 1]} : vector<128x128xf32> to vector<128x32xf32>
    %48 = vector.extract_strided_slice %33 {offsets = [0, 64], sizes = [128, 32], strides = [1, 1]} : vector<128x128xf32> to vector<128x32xf32>
    %49 = vector.extract_strided_slice %33 {offsets = [0, 96], sizes = [128, 32], strides = [1, 1]} : vector<128x128xf32> to vector<128x32xf32>
    %50 = vector.shape_cast %46 : vector<128x32xf32> to vector<1x128x32xf32>
    %51 = vector.shape_cast %47 : vector<128x32xf32> to vector<1x128x32xf32>
    %52 = vector.shape_cast %48 : vector<128x32xf32> to vector<1x128x32xf32>
    %53 = vector.shape_cast %49 : vector<128x32xf32> to vector<1x128x32xf32>
    %54 = tpu.concatenate %50, %51, %52, %53 in 0 : vector<1x128x32xf32>, vector<1x128x32xf32>, vector<1x128x32xf32>, vector<1x128x32xf32> -> vector<4x128x32xf32>
    %55 = vector.extract_strided_slice %34 {offsets = [0, 0], sizes = [128, 32], strides = [1, 1]} : vector<128x128xf32> to vector<128x32xf32>
    %56 = vector.extract_strided_slice %34 {offsets = [0, 32], sizes = [128, 32], strides = [1, 1]} : vector<128x128xf32> to vector<128x32xf32>
    %57 = vector.extract_strided_slice %34 {offsets = [0, 64], sizes = [128, 32], strides = [1, 1]} : vector<128x128xf32> to vector<128x32xf32>
    %58 = vector.extract_strided_slice %34 {offsets = [0, 96], sizes = [128, 32], strides = [1, 1]} : vector<128x128xf32> to vector<128x32xf32>
    %59 = vector.shape_cast %55 : vector<128x32xf32> to vector<1x128x32xf32>
    %60 = vector.shape_cast %56 : vector<128x32xf32> to vector<1x128x32xf32>
    %61 = vector.shape_cast %57 : vector<128x32xf32> to vector<1x128x32xf32>
    %62 = vector.shape_cast %58 : vector<128x32xf32> to vector<1x128x32xf32>
    %63 = tpu.concatenate %59, %60, %61, %62 in 0 : vector<1x128x32xf32>, vector<1x128x32xf32>, vector<1x128x32xf32>, vector<1x128x32xf32> -> vector<4x128x32xf32>
    "tpu.trace_start"() <{level = 10 : i32, message = "hrd,hsd->hrs"}> : () -> ()
    %cst_11 = arith.constant dense<0.000000e+00> : vector<4x128x128xf32>
    %64 = tpu.matmul %45, %54, %cst_11 {dimension_numbers = #tpu.dot_dimension_numbers<[2], [2], [1], [1], [0, 0, 0, 1, 1, 1], [0], [0]>} : vector<4x128x32xf32>, vector<4x128x32xf32>, vector<4x128x128xf32> -> vector<4x128x128xf32>
    "tpu.trace_stop"() : () -> ()
    %c0_12 = arith.constant 0 : index
    %c0_13 = arith.constant 0 : index
    %c0_14 = arith.constant 0 : index
    %65 = vector.load %arg2[%c0_12, %c0_13, %c0_14] : memref<1x128x128xf32, #tpu.memory_space<vmem>>, vector<1x128x128xf32>
    %66 = vector.broadcast %65 : vector<1x128x128xf32> to vector<4x128x128xf32>
    %67 = arith.addf %64, %66 : vector<4x128x128xf32>
    %cst_15 = arith.constant dense<0xFF800000> : vector<4x128xf32>
    %68 = vector.multi_reduction <maximumf>, %67, %cst_15 [2] : vector<4x128x128xf32> to vector<4x128xf32>
    %69 = vector.shape_cast %68 : vector<4x128xf32> to vector<4x128x1xf32>
    %70 = vector.broadcast %69 : vector<4x128x1xf32> to vector<4x128x128xf32>
    %71 = arith.subf %67, %70 : vector<4x128x128xf32>
    %72 = math.exp %71 : vector<4x128x128xf32>
    %cst_16 = arith.constant dense<0.000000e+00> : vector<4x128xf32>
    %73 = vector.multi_reduction <add>, %72, %cst_16 [2] : vector<4x128x128xf32> to vector<4x128xf32>
    %74 = vector.shape_cast %73 : vector<4x128xf32> to vector<4x128x1xf32>
    %75 = tpu.reciprocal %74 {approx = true} : vector<4x128x1xf32> -> vector<4x128x1xf32>
    %76 = vector.broadcast %75 : vector<4x128x1xf32> to vector<4x128x128xf32>
    %77 = arith.mulf %72, %76 : vector<4x128x128xf32>
    "tpu.trace_start"() <{level = 10 : i32, message = "hrs,hsd->hrd"}> : () -> ()
    %cst_17 = arith.constant dense<0.000000e+00> : vector<4x128x32xf32>
    %78 = tpu.matmul %77, %63, %cst_17 {dimension_numbers = #tpu.dot_dimension_numbers<[2], [1], [1], [2], [0, 0, 0, 1, 1, 2], [0], [0]>} : vector<4x128x128xf32>, vector<4x128x32xf32>, vector<4x128x32xf32> -> vector<4x128x32xf32>
    "tpu.trace_stop"() : () -> ()
    %c0_18 = arith.constant 0 : index
    %c0_19 = arith.constant 0 : index
    %c0_20 = arith.constant 0 : index
    %79 = vector.load %arg4[%c0_18, %c0_19, %c0_20] : memref<4x32x128xf32, #tpu.memory_space<vmem>>, vector<4x32x128xf32>
    "tpu.trace_start"() <{level = 10 : i32, message = "hrd,hdc->hrc"}> : () -> ()
    %cst_21 = arith.constant dense<0.000000e+00> : vector<4x128x128xf32>
    %80 = tpu.matmul %78, %79, %cst_21 {dimension_numbers = #tpu.dot_dimension_numbers<[2], [1], [1], [2], [0, 0, 0, 1, 1, 2], [0], [0]>} : vector<4x128x32xf32>, vector<4x32x128xf32>, vector<4x128x128xf32> -> vector<4x128x128xf32>
    "tpu.trace_stop"() : () -> ()
    %cst_22 = arith.constant dense<0.000000e+00> : vector<128x128xf32>
    %81 = vector.multi_reduction <add>, %80, %cst_22 [0] : vector<4x128x128xf32> to vector<128x128xf32>
    %82 = vector.broadcast %6 : vector<1x128xf32> to vector<128x128xf32>
    %83 = arith.addf %81, %82 : vector<128x128xf32>
    %84 = arith.addf %0, %83 : vector<128x128xf32>
    %cst_23 = arith.constant dense<0.000000e+00> : vector<128xf32>
    %85 = vector.multi_reduction <add>, %84, %cst_23 [1] : vector<128x128xf32> to vector<128xf32>
    %86 = vector.shape_cast %85 : vector<128xf32> to vector<128x1xf32>
    %cst_24 = arith.constant 1.280000e+02 : f32
    %87 = vector.broadcast %cst_24 : f32 to vector<128x1xf32>
    %88 = arith.divf %86, %87 : vector<128x1xf32>
    %89 = vector.broadcast %88 : vector<128x1xf32> to vector<128x128xf32>
    %90 = arith.subf %84, %89 : vector<128x128xf32>
    %91 = arith.mulf %90, %90 : vector<128x128xf32>
    %cst_25 = arith.constant dense<0.000000e+00> : vector<128xf32>
    %92 = vector.multi_reduction <add>, %91, %cst_25 [1] : vector<128x128xf32> to vector<128xf32>
    %93 = vector.shape_cast %92 : vector<128xf32> to vector<128x1xf32>
    %cst_26 = arith.constant 1.280000e+02 : f32
    %94 = vector.broadcast %cst_26 : f32 to vector<128x1xf32>
    %95 = arith.divf %93, %94 : vector<128x1xf32>
    %96 = vector.broadcast %88 : vector<128x1xf32> to vector<128x128xf32>
    %97 = arith.subf %84, %96 : vector<128x128xf32>
    %cst_27 = arith.constant 9.99999974E-6 : f32
    %98 = vector.broadcast %cst_27 : f32 to vector<128x1xf32>
    %99 = arith.addf %95, %98 : vector<128x1xf32>
    %100 = math.rsqrt %99 : vector<128x1xf32>
    %101 = vector.broadcast %100 : vector<128x1xf32> to vector<128x128xf32>
    %102 = arith.mulf %97, %101 : vector<128x128xf32>
    %103 = vector.broadcast %4 : vector<1x128xf32> to vector<128x128xf32>
    %104 = arith.mulf %102, %103 : vector<128x128xf32>
    %105 = vector.broadcast %5 : vector<1x128xf32> to vector<128x128xf32>
    %106 = arith.addf %104, %105 : vector<128x128xf32>
    %c0_28 = arith.constant 0 : index
    %c0_29 = arith.constant 0 : index
    %107 = vector.load %arg5[%c0_28, %c0_29] : memref<128x256xf32, #tpu.memory_space<vmem>>, vector<128x256xf32>
    %cst_30 = arith.constant dense<0.000000e+00> : vector<128x256xf32>
    %108 = tpu.matmul %106, %107, %cst_30 {dimension_numbers = #tpu.dot_dimension_numbers<[1], [0], [0], [1], [0, 0, 1, 1], [], []>} : vector<128x128xf32>, vector<128x256xf32>, vector<128x256xf32> -> vector<128x256xf32>
    %c0_31 = arith.constant 0 : index
    %c0_32 = arith.constant 0 : index
    %109 = vector.load %arg8[%c0_31, %c0_32] : memref<1x256xf32, #tpu.memory_space<vmem>>, vector<1x256xf32>
    %110 = vector.broadcast %109 : vector<1x256xf32> to vector<128x256xf32>
    %111 = arith.addf %108, %110 : vector<128x256xf32>
    %cst_33 = arith.constant 5.000000e-01 : f32
    %112 = vector.broadcast %cst_33 : f32 to vector<128x256xf32>
    %113 = arith.mulf %112, %111 : vector<128x256xf32>
    %cst_34 = arith.constant 2.000000e+00 : f32
    %114 = math.sqrt %cst_34 : f32
    %cst_35 = arith.constant 1.000000e+00 : f32
    %115 = arith.divf %cst_35, %114 : f32
    %116 = vector.broadcast %115 : f32 to vector<128x256xf32>
    %117 = arith.mulf %111, %116 : vector<128x256xf32>
    %118 = math.erf %117 : vector<128x256xf32>
    %cst_36 = arith.constant 1.000000e+00 : f32
    %119 = vector.broadcast %cst_36 : f32 to vector<128x256xf32>
    %120 = arith.addf %119, %118 : vector<128x256xf32>
    %121 = arith.mulf %113, %120 : vector<128x256xf32>
    %c0_37 = arith.constant 0 : index
    %c0_38 = arith.constant 0 : index
    %122 = vector.load %arg6[%c0_37, %c0_38] : memref<256x128xf32, #tpu.memory_space<vmem>>, vector<256x128xf32>
    %cst_39 = arith.constant dense<0.000000e+00> : vector<128x128xf32>
    %123 = tpu.matmul %121, %122, %cst_39 {dimension_numbers = #tpu.dot_dimension_numbers<[1], [0], [0], [1], [0, 0, 1, 1], [], []>} : vector<128x256xf32>, vector<256x128xf32>, vector<128x128xf32> -> vector<128x128xf32>
    %124 = vector.broadcast %7 : vector<1x128xf32> to vector<128x128xf32>
    %125 = arith.addf %123, %124 : vector<128x128xf32>
    %126 = arith.addf %106, %125 : vector<128x128xf32>
    %c0_40 = arith.constant 0 : index
    %c0_41 = arith.constant 0 : index
    %127 = vector.load %arg9[%c0_40, %c0_41] : memref<128x128xf32, #tpu.memory_space<vmem>>, vector<128x128xf32>
    tpu.vector_store %arg9[%c0_40, %c0_41], %126 {strides = array<i32>} : memref<128x128xf32, #tpu.memory_space<vmem>>, vector<128x128xf32>,
    return
  }
  func.func @transform_0(%arg0: i32) -> (i32, i32) {
    %c0_i32 = arith.constant 0 : i32
    %c0_i32_0 = arith.constant 0 : i32
    return %arg0, %c0_i32 : i32, i32
  }
  func.func @transform_1(%arg0: i32) -> (i32, i32, i32) {
    %c0_i32 = arith.constant 0 : i32
    %c0_i32_0 = arith.constant 0 : i32
    %c0_i32_1 = arith.constant 0 : i32
    %c0_i32_2 = arith.constant 0 : i32
    return %c0_i32, %c0_i32_0, %c0_i32_1 : i32, i32, i32
  }
  func.func @transform_2(%arg0: i32) -> (i32, i32) {
    %c0_i32 = arith.constant 0 : i32
    %c0_i32_0 = arith.constant 0 : i32
    %c0_i32_1 = arith.constant 0 : i32
    return %c0_i32, %c0_i32_0 : i32, i32
  }
  func.func @transform_3(%arg0: i32) -> (i32, i32, i32) {
    %c0_i32 = arith.constant 0 : i32
    %c0_i32_0 = arith.constant 0 : i32
    %c0_i32_1 = arith.constant 0 : i32
    %c0_i32_2 = arith.constant 0 : i32
    return %c0_i32, %c0_i32_0, %c0_i32_1 : i32, i32, i32
  }
  func.func @transform_4(%arg0: i32) -> (i32, i32) {
    %c0_i32 = arith.constant 0 : i32
    %c0_i32_0 = arith.constant 0 : i32
    %c0_i32_1 = arith.constant 0 : i32
    return %c0_i32, %c0_i32_0 : i32, i32
  }
  func.func @transform_5(%arg0: i32) -> (i32, i32) {
    %c0_i32 = arith.constant 0 : i32
    %c0_i32_0 = arith.constant 0 : i32
    %c0_i32_1 = arith.constant 0 : i32
    return %c0_i32, %c0_i32_0 : i32, i32
  }
  func.func @transform_6(%arg0: i32) -> (i32, i32) {
    %c0_i32 = arith.constant 0 : i32
    %c0_i32_0 = arith.constant 0 : i32
    %c0_i32_1 = arith.constant 0 : i32
    return %c0_i32, %c0_i32_0 : i32, i32
  }
  func.func @transform_7(%arg0: i32) -> (i32, i32) {
    %c0_i32 = arith.constant 0 : i32
    %c0_i32_0 = arith.constant 0 : i32
    %c0_i32_1 = arith.constant 0 : i32
    return %c0_i32, %c0_i32_0 : i32, i32
  }
  func.func @transform_8(%arg0: i32) -> (i32, i32) {
    %c0_i32 = arith.constant 0 : i32
    %c0_i32_0 = arith.constant 0 : i32
    return %arg0, %c0_i32 : i32, i32
  }
}

</mosaic_0001>

<bundles_post_ra>
// kernel: tpu_custom_call.1
= control target key start
LH: loop header
LB: loop body
LE: loop exit
PB: predicated region body
PF: predicated region fallthrough
CT: control target
= control target key end

     0   :  { %s10186_s0 = inlined_call_operand.hbm [shape: f32[256,128], index: 0, kind: input, shape index: {}]   ;;  %s10187_s1 = inlined_call_operand.hbm [shape: f32[1,128,128], index: 1, kind: input, shape index: {}]   ;;  %s10188_s2 = inlined_call_operand.hbm [shape: f32[128,384], index: 2, kind: input, shape index: {}]   ;;  %s10189_s3 = inlined_call_operand.hbm [shape: f32[4,32,128], index: 3, kind: input, shape index: {}]   ;;  %s10190_s4 = inlined_call_operand.hbm [shape: f32[128,256], index: 4, kind: input, shape index: {}]   ;;  %s10191_s5 = inlined_call_operand.hbm [shape: f32[256,128], index: 5, kind: input, shape index: {}]   ;;  %s10192_s6 = inlined_call_operand.vmem [shape: f32[6,128], index: 6, kind: input, shape index: {}]   ;;  %s10193_s7 = inlined_call_operand.vmem [shape: f32[1,256], index: 7, kind: input, shape index: {}]   ;;  %s10194_s8 = inlined_call_operand.hbm [shape: f32[256,128], index: 8, kind: output, shape index: {}]  }
   0x1   :  { %10287 = sst [smem:[#allocation73_spill]] %s10187_s1 }
   0x2   :  { %10288 = sst [smem:[#allocation74_spill]] %s10188_s2 }
   0x3   :  { %13 = vsyncpa [#allocation3], 0 }
   0x4   :  { %15 = vsyncpa [#allocation3 + $0x1], 0 }
   0x5   :  { %16 = vsyncpa [#allocation6], 0 }
   0x6   :  { %17 = vsyncpa [#allocation9], 0 }
   0x7   :  { %18 = vsyncpa [#allocation12], 0 }
   0x8   :  { %19 = vsyncpa [#allocation4], 0 }
   0x9   :  { %21 = vsyncpa [#allocation4 + $0x1], 0  ;;  %s7466_s27 = smov 0   ;;  %s7468_s28 = smov 0  }
   0xa   :  { %s7470_s29 = smov 0   ;;  %s7472_s30 = smov 0  }
   0xb LB: > { %s7402_s9 = smov [#allocation5]   ;;  %s7487_s11 = sadd.s32 4294967295, %s7400_s30   ;;  %s7400_s30 = sphi %s7472_s30, %s10465_s30   ;;  %s7396_s29 = sphi %s7470_s29, %s10464_s29   ;;  %s7392_s28 = sphi %s7468_s28, %s10463_s28   ;;  %s7388_s27 = sphi %s7466_s27, %s10462_s27  }
   0xc   : > { %s243_s10 = sshll.u32 %s7402_s9, 4  ;;  %p5358_p0 = scmp.ge.s32.totalorder %s7400_s30, 1  ;;  %s244_s10 = int_to_ptr.vmem [resolvable:$true] %s243_s10 }
   0xd   : > { %p10197_p1 = scmp.eq.s32.totalorder %s7487_s11, 0  ;;  %p231_p2 = scmp.lt.s32.totalorder %s7400_s30, 3 }
   0xe   : > { %s7403_s13 = smov [#allocation8]   ;;  %s7404_s16 = smov [#allocation7]  }
   0xf   : > { %p7492_p3 = pnand %p5358_p0, %p231_p2  ;;  %s269_s14 = sshll.u32 %s7403_s13, 4  ;;  %s7505_s14 = int_to_ptr.vmem [resolvable:$true] %s269_s14 }
  0x10   : > { %s256_s17 = sshll.u32 %s7404_s16, 4  ;;  %s7177_s19 = scalar_lea.vmem %s244_s10, 2048  ;;  %s7507_s17 = int_to_ptr.vmem [resolvable:$true] %s256_s17 }
  0x11   : > { %s10289_s12 = scalar_select %p7492_p3, 1, 0 }
  0x12   : > { %p6679_p5 = pneg %p7492_p3  ;;  %p7178_p8 = scmp.ne.s32.totalorder %s244_s10, %s7177_s19 }
  0x13   : > { %p7185_p11 = scmp.lt.s32.totalorder %s244_s10, %s244_s10  ;;  %p7186_p12 = scmp.lt.s32.totalorder %s7177_s19, %s7177_s19 }
  0x14   : > { %p7501_p6 = pnand %p6679_p5, %p10197_p1 }
  0x15   : > { %p7187_p13 = por %p7186_p12, %p7185_p11 }
  0x16   : > { %p7511_p7 = pneg %p7501_p6 }
  0x18   : > { %p7180_p9 = pnand %p7178_p8, %p7511_p7 }
  0x1a   : > { %p7181_p10 = pneg %p7180_p9 }
  0x1c   : > { %p7188_p0 = pnand %p7187_p13, %p7181_p10 }
  0x1e   : > { %7191 = shalt.err (!%p7188_p0)
}
  0x1f   : > { %s10195_s20 = smov 128   ;;  %s10196_s21 = smov 8  }
  0x20   : > { %s10292_s1 = sld [smem:[#allocation73_spill]]  ;;  %s7203_s24 = scalar_lea.vmem %s7505_s14, 2048 }
  0x21   : > { %p7204_p2 = scmp.ne.s32.totalorder %s7505_s14, %s7203_s24  ;;  %p7211_p9 = scmp.lt.s32.totalorder %s7505_s14, %s7505_s14 }
  0x22   : > { %p7212_p10 = scmp.lt.s32.totalorder %s7203_s24, %s7203_s24 }
  0x23   : > { %p7206_p5 = pnand %p7204_p2, %p7511_p7 }
  0x24   : > { %p7213_p11 = por %p7212_p10, %p7211_p9 }
  0x25   : > { %p7207_p8 = pneg %p7206_p5 }
  0x26   : > { %6682 = dma.hbm_to_vmem [thread:$0]  (!%p7501_p6), %s10292_s1, 2048, %s244_s10, [#allocation6], %s10195_s20, %s10195_s20, %s10196_s21  }
  0x27   : > { %p7214_p12 = pnand %p7213_p11, %p7207_p8 }
  0x29   : > { %7217 = shalt.err (!%p7214_p12)
}
  0x2a   : > { %6688 = dma.hbm_to_vmem [thread:$0]  (!%p7501_p6), %s10189_s3, 2048, %s7505_s14, [#allocation9], %s10195_s20, %s10195_s20, %s10196_s21  }
  0x2b   : > { %s7229_s9 = scalar_lea.vmem %s7507_s17, 6144  ;;  %p7237_p5 = scmp.lt.s32.totalorder %s7507_s17, %s7507_s17 }
  0x2c   : > { %p7230_p13 = scmp.ne.s32.totalorder %s7507_s17, %s7229_s9  ;;  %p7238_p8 = scmp.lt.s32.totalorder %s7229_s9, %s7229_s9 }
  0x2e   : > { %p7232_p0 = pnand %p7230_p13, %p7511_p7  ;;  %p7239_p9 = por %p7238_p8, %p7237_p5 }
  0x30   : > { %p7233_p2 = pneg %p7232_p0 }
  0x32   : > { %p7240_p10 = pnand %p7239_p9, %p7233_p2 }
  0x34   : > { %7243 = shalt.err (!%p7240_p10)
}
  0x35   : > { %s7407_s10 = smov 384   ;;  %s7408_s13 = smov 24  }
  0x36   : > { %s10293_s2 = sld [smem:[#allocation74_spill]]  ;;  %s7409_s14 = smov [#allocation10]  }
  0x37   : > { %s282_s22 = sshll.u32 %s7409_s14, 4  ;;  %s283_s22 = int_to_ptr.vmem [resolvable:$true] %s282_s22 }
  0x38   : > { %s7255_s23 = scalar_lea.vmem %s283_s22, 4096  ;;  %p7263_p0 = scmp.lt.s32.totalorder %s283_s22, %s283_s22 }
  0x39   : > { %p7256_p11 = scmp.ne.s32.totalorder %s283_s22, %s7255_s23  ;;  %p7264_p2 = scmp.lt.s32.totalorder %s7255_s23, %s7255_s23 }
  0x3b   : > { %p7258_p12 = pnand %p7256_p11, %p7511_p7  ;;  %p7265_p5 = por %p7264_p2, %p7263_p0 }
  0x3c   : > { %6685 = dma.hbm_to_vmem [thread:$0]  (!%p7501_p6), %s10293_s2, 6144, %s7507_s17, [#allocation6], %s7407_s10, %s7407_s10, %s7408_s13  }
  0x3d   : > { %p7259_p13 = pneg %p7258_p12 }
  0x3f   : > { %p7266_p8 = pnand %p7265_p5, %p7259_p13 }
  0x41   : > { %7269 = shalt.err (!%p7266_p8)
}
  0x42   : > { %s7410_s24 = smov 256   ;;  %s7411_s25 = smov 16  }
  0x43   : > { %6691 = dma.hbm_to_vmem [thread:$0]  (!%p7501_p6), %s10190_s4, 4096, %s283_s22, [#allocation9], %s7410_s24, %s7410_s24, %s7411_s25  }
  0x44   : > { %s7412_s9 = smov [#allocation11]  }
  0x45   : > { %s295_s10 = sshll.u32 %s7412_s9, 4  ;;  %s296_s10 = int_to_ptr.vmem [resolvable:$true] %s295_s10 }
  0x46   : > { %s7281_s13 = scalar_lea.vmem %s296_s10, 4096  ;;  %p7289_p12 = scmp.lt.s32.totalorder %s296_s10, %s296_s10 }
  0x47   : > { %p7282_p9 = scmp.ne.s32.totalorder %s296_s10, %s7281_s13  ;;  %p7290_p13 = scmp.lt.s32.totalorder %s7281_s13, %s7281_s13 }
  0x49   : > { %p7284_p10 = pnand %p7282_p9, %p7511_p7  ;;  %p7291_p0 = por %p7290_p13, %p7289_p12 }
  0x4b   : > { %p7285_p11 = pneg %p7284_p10 }
  0x4d   : > { %p7292_p2 = pnand %p7291_p0, %p7285_p11 }
  0x4f   : > { %7295 = shalt.err (!%p7292_p2)
}
  0x50   : > { %6694 = dma.hbm_to_vmem [thread:$0]  (!%p7501_p6), %s10191_s5, 4096, %s296_s10, [#allocation12], %s10195_s20, %s10195_s20, %s10196_s21  }
  0x51   : > { %s5357_s15 = sadd.s32 4294967294, %s7400_s30   ;;  %s7571_s18 = sadd.s32 1, %s7400_s30  }
  0x52   : > { %s34_s14 = sadd.s32 1, %s7396_s29  ;;  %s31_s22 = ssub.s32 %s7400_s30, %s7571_s18 }
  0x53   : > { %p41_p7 = scmp.ne.s32.totalorder %s7396_s29, %s7392_s28  ;;  %p32_p5 = scmp.eq.s32.totalorder %s31_s22, 0 }
  0x54   : > { %p42_p8 = scmp.eq.s32.totalorder %s7400_s30, 0  ;;  %p47_p9 = scmp.ne.s32.totalorder %s7392_s28, %s7388_s27 }
  0x55   : > { %p218_p10 = scmp.eq.s32.totalorder %s7487_s11, 1  ;;  %p224_p13 = scmp.eq.s32.totalorder %s5357_s15, 1 }
  0x56   : > { %s7583_s23 = scalar_select %p32_p5, %s7396_s29, %s34_s14  }
  0x57   : > { %p43_p11 = por %p42_p8, %p41_p7  ;;  %p7587_p12 = por %p10197_p1, %p47_p9 }
  0x58   : > { %p7591_p6 = por %p218_p10, %p41_p7  ;;  %p6708_p0 = scmp.lt.s32.totalorder %s7400_s30, 2 }
  0x59   : > { %s10294_s24 = scalar_select %p7587_p12, 1, 0 }
  0x5a   : > { %s10295_s25 = scalar_select %p7591_p6, 1, 0 }
  0x5b   : > { %s315_s26 = sand.u32 1, %s7396_s29   ;;  %p7597_p2 = por %p224_p13, %p47_p9 }
  0x5c   : > { %s5365_s9 = sshll.u32 %s315_s26, 7  ;;  %s5573_s10 = sshll.u32 %s7400_s30, 11 }
  0x5d   : > { %s10296_s17 = scalar_select %p7597_p2, 1, 0 }
  0x5e   : > { %s7605_s19 = scalar_lea.hbm %s10186_s0, %s5573_s10  ;;  %s319_s14 = scalar_lea.vmem [#allocation2], %s5365_s9 }
  0x5f   : > { %s326_s22 = sshll.u32 %s319_s14, 4  ;;  %p7607_p7 = pnand %p6708_p0, %p43_p11  ;;  %s7611_s22 = int_to_ptr.vmem [resolvable:$true] %s326_s22 }
  0x60   : > { %s7613_s20 = scalar_lea.sflag [#allocation3], %s315_s26  ;;  %s7296_s21 = scalar_lea.hbm %s7605_s19, 2048 }
  0x61   : > { %p7297_p5 = scmp.ne.s32.totalorder %s7605_s19, %s7296_s21  ;;  %p7298_p8 = pneg %p7607_p7 }
  0x62   : > { %s7301_s9 = scalar_lea.hbm %s10186_s0, 4096  ;;  %p7302_p11 = scmp.lt.s32.totalorder %s7605_s19, %s10186_s0 }
  0x63   : > { %p7299_p9 = pnand %p7298_p8, %p7297_p5  ;;  %p7303_p13 = scmp.lt.s32.totalorder %s7301_s9, %s7296_s21 }
  0x65   : > { %p7300_p10 = pneg %p7299_p9  ;;  %p7304_p0 = por %p7303_p13, %p7302_p11 }
  0x67   : > { %p7305_p4 = pnand %p7304_p0, %p7300_p10 }
  0x69   : > { %7308 = shalt.err (!%p7305_p4)
}
  0x6a   : > { %s7309_s26 = scalar_lea.vmem %s7611_s22, 2048  ;;  %s7413_s1 = smov [#allocation2]  }
  0x6b   : > { %p7310_p1 = scmp.ne.s32.totalorder %s7611_s22, %s7309_s26  ;;  %s7314_s2 = sshll.u32 %s7413_s1, 4  ;;  %s7315_s2 = int_to_ptr.vmem [resolvable:$false] %s7314_s2 }
  0x6c   : > { %s7316_s10 = scalar_lea.vmem %s7315_s2, 4096  ;;  %p7317_p9 = scmp.lt.s32.totalorder %s7611_s22, %s7315_s2 }
  0x6d   : > { %p7312_p2 = pnand %p7310_p1, %p7298_p8  ;;  %p7318_p6 = scmp.lt.s32.totalorder %s7316_s10, %s7309_s26 }
  0x6f   : > { %p7313_p5 = pneg %p7312_p2  ;;  %p7319_p12 = por %p7318_p6, %p7317_p9 }
  0x71   : > { %p7320_p3 = pnand %p7319_p12, %p7313_p5 }
  0x73   : > { %7323 = shalt.err (!%p7320_p3)
}
  0x74   : > { %s10298_s21 = smov 8   ;;  %s10299_s13 = smov 128  }
  0x75   : > { %6698 = dma.hbm_to_vmem [thread:$0]  (!%p7607_p7), %s7605_s19, 2048, %s7611_s22, %s7613_s20, %s10299_s13, %s10299_s13, %s10298_s21  }
  0x76   : > { %p10300_p1 = scmp.ne.s32.totalorder %s10289_s12, 0 }
  0x78   : > { %338 = sbr.rel (%p10300_p1) target bundleno = 2828 (0xb0c), region = 52 }
  0x7d   : > { %s7640_s1 = sand.u32 1, %s7392_s28   ;;  %p10301_p3 = scmp.ne.s32.totalorder %s10294_s24, 0 }
  0x7e   : > { %s5369_s2 = sshll.u32 %s7640_s1, 7  ;;  %s341_s9 = scalar_lea.sflag [#allocation3], %s7640_s1 }
  0x7f   : > { %s7646_s15 = scalar_lea.vmem [#allocation2], %s5369_s2 }
  0x80   : > { %7367 = dma.done.wait (%p10301_p3), %s341_s9, 2048  }
  0x81   : > { %7369 = vsyncadd (%p10301_p3), %s341_s9, 4294965248  ;;  %p10302_p4 = scmp.eq.s32.totalorder %s7487_s11, 0 }
  0x83   : > { %7371 = dma.done.wait (%p10302_p4), [#allocation6], 8192   ;;  %p10303_p12 = pmov %p10302_p4 }
  0x84   : > { %p10304_p6 = pmov %p10302_p4 }
  0x85   : > { %7373 = vsyncadd (%p10303_p12), [#allocation6], 4294959104 }
  0x86   : > { %7375 = dma.done.wait (%p10304_p6), [#allocation9], 6144   ;;  %p10305_p2 = pmov %p10302_p4 }
  0x88   : > { %7377 = vsyncadd (%p10305_p2), [#allocation9], 4294961152  ;;  %p10306_p7 = pmov %p10305_p2 }
  0x89   : > { %p10307_p8 = pmov %p10305_p2 }
  0x8a   : > { %7379 = dma.done.wait (%p10306_p7), [#allocation12], 4096  }
  0x8b   : > { %7381 = vsyncadd (%p10307_p8), [#allocation12], 4294963200  ;;  %v399_v0 = vld [vmem:[%s7646_s15] sm:$0xff]  ;;  %v401_v1 = vld [vmem:[%s7646_s15 + $0x10] sm:$0xff]  ;;  %vm1499_vm0 = vcmask 261120   ;;  %s7415_s24 = smov 96  }
  0x8c   : > { %416 = vadd.xlane.f32.xlu0 %v399_v0  ;;  %420 = vadd.xlane.f32.xlu1 %v401_v1  ;;  %v7667_v2 = vld [vmem:[%s7646_s15 + $0x8] sm:$0xff]  ;;  %v7670_v3 = vld [vmem:[%s7646_s15 + $0x18] sm:$0xff]  ;;  %v7675_v4 = vld [vmem:[%s7646_s15 + $0x20] sm:$0xff]  ;;  %s7416_s19 = smov 32   ;;  %s7417_s22 = smov 64  }
  0x8d   : > { %v7678_v5 = vld [vmem:[%s7646_s15 + $0x28] sm:$0xff]  ;;  %v7683_v6 = vld [vmem:[%s7646_s15 + $0x30] sm:$0xff]  ;;  %v7686_v7 = vld [vmem:[%s7646_s15 + $0x38] sm:$0xff]  ;;  %s10088_s9 = scalar_lea.vmem [#allocation13], %s5369_s2  ;;  %s5574_s2 = sshll.u32 %s7487_s11, 11 }
  0x8e   : > { %v7691_v8 = vld [vmem:[%s7646_s15 + $0x40] sm:$0xff]  ;;  %v7694_v9 = vld [vmem:[%s7646_s15 + $0x48] sm:$0xff]  ;;  %v7699_v10 = vld [vmem:[%s7646_s15 + $0x50] sm:$0xff]  ;;  %p10459_p11 = scmp.ne.s32.totalorder %s10295_s25, 0  ;;  %s7418_s11 = smov [#allocation13]  }
  0x8f   : > { %v7702_v11 = vld [vmem:[%s7646_s15 + $0x58] sm:$0xff]  ;;  %v7707_v12 = vld [vmem:[%s7646_s15 + $0x60] sm:$0xff]  ;;  %v7710_v13 = vld [vmem:[%s7646_s15 + $0x68] sm:$0xff]  ;;  %s7328_s16 = sshll.u32 %s7418_s11, 4  ;;  %s7329_s16 = int_to_ptr.vmem [resolvable:$false] %s7328_s16 }
  0x90   : > { %418 = vadd.xlane.f32.xlu0 %v7667_v2  ;;  %422 = vadd.xlane.f32.xlu1 %v7670_v3  ;;  %v7715_v14 = vld [vmem:[%s7646_s15 + $0x70] sm:$0xff]  ;;  %v7718_v15 = vld [vmem:[%s7646_s15 + $0x78] sm:$0xff]  ;;  %v678_v17 = vld [vmem:[#allocation7 + $0x168] sm:$0xff]  ;;  %s7330_s14 = scalar_lea.vmem %s7329_s16, 4096 }
  0x91   : > { %v679_v16 = vld [vmem:[#allocation7 + $0x170] sm:$0xff]  ;;  %v676_v18 = vld [vmem:[#allocation7 + $0x158] sm:$0xff]  ;;  %v673_v21 = vld [vmem:[#allocation7 + $0x140] sm:$0xff] }
  0x92   : > { %681 = vmatprep.subr.mxu0 %v679_v16  ;;  %v675_v19 = vld [vmem:[#allocation7 + $0x150] sm:$0xff]  ;;  %v680_v20 = vld [vmem:[#allocation7 + $0x178] sm:$0xff]  ;;  %v677_v22 = vld [vmem:[#allocation7 + $0x160] sm:$0xff] }
  0x93   : > { %682 = vmatpush1.msra.mxu0 %v678_v17  ;;  %6023 = vmatprep.subr.mxu1 %v680_v20  ;;  %v672_v23 = vld [vmem:[#allocation7 + $0x138] sm:$0xff]  ;;  %v670_v24 = vld [vmem:[#allocation7 + $0x128] sm:$0xff]  ;;  %v669_v25 = vld [vmem:[#allocation7 + $0x120] sm:$0xff] }
  0x94   : > { %424 = vadd.xlane.f32.xlu0 %v7675_v4  ;;  %426 = vadd.xlane.f32.xlu1 %v7678_v5  ;;  %v667_v58 = vld [vmem:[#allocation7 + $0x110] sm:$0xff]  ;;  %v674_v59 = vld [vmem:[#allocation7 + $0x148] sm:$0xff] }
  0x95   : > { %683 = vmatprep.subr.mxu0 %v676_v18  ;;  %6024 = vmatpush3.msra.mxu1 %v680_v20  ;;  %v666_v63 = vld [vmem:[#allocation7 + $0x108] sm:$0xff]  ;;  %v668_v20 = vld [vmem:[#allocation7 + $0x118] sm:$0xff] }
  0x96   : > { %684 = vmatpush1.msra.mxu0 %v675_v19  ;;  %6025 = vmatprep.subr.mxu1 %v677_v22  ;;  %v661_v19 = vld [vmem:[#allocation7 + $0xe0] sm:$0xff] }
  0x97   : > { %685 = vmatprep.subr.mxu0 %v673_v21  ;;  %6026 = vmatpush3.msra.mxu1 %v677_v22 }
  0x98   : > { %428 = vadd.xlane.f32.xlu0 %v7683_v6  ;;  %430 = vadd.xlane.f32.xlu1 %v7686_v7 }
  0x99   : > { %686 = vmatpush1.msra.mxu0 %v672_v23  ;;  %6027 = vmatprep.subr.mxu1 %v674_v59  ;;  %v658_v23 = vld [vmem:[#allocation7 + $0xc8] sm:$0xff] }
  0x9a   : > { %687 = vmatprep.subr.mxu0 %v670_v24  ;;  %6028 = vmatpush3.msra.mxu1 %v674_v59  ;;  %v665_v24 = vld [vmem:[#allocation7 + $0x100] sm:$0xff]  ;;  %v650_v59 = vld [vmem:[#allocation7 + $0x88] sm:$0xff] }
  0x9b   : > { %688 = vmatpush1.msra.mxu0 %v669_v25 }
  0x9c   : > { %432 = vadd.xlane.f32.xlu0 %v7691_v8  ;;  %434 = vadd.xlane.f32.xlu1 %v7694_v9 }
  0x9d   : > { %689 = vmatprep.subr.mxu0 %v667_v58  ;;  %v645_v58 = vld [vmem:[#allocation7 + $0x60] sm:$0xff] }
  0x9e   : > { %690 = vmatpush1.msra.mxu0 %v666_v63  ;;  %v639_v63 = vld [vmem:[#allocation7 + $0x30] sm:$0xff] }
  0xa0   : > { %436 = vadd.xlane.f32.xlu0 %v7699_v10  ;;  %438 = vadd.xlane.f32.xlu1 %v7702_v11 }
  0xa4   : > { %440 = vadd.xlane.f32.xlu0 %v7707_v12  ;;  %442 = vadd.xlane.f32.xlu1 %v7710_v13 }
  0xa8   : > { %444 = vadd.xlane.f32.xlu0 %v7715_v14  ;;  %446 = vadd.xlane.f32.xlu1 %v7718_v15 }
 0x115   : > { %v417_v26 = vpop.xlane.xlu0 %416  ;;  %v421_v27 = vpop.xlane.xlu1 %420 }
 0x116   : > { %v449_v28 = vmul.f32 0.0078125, %v417_v26  ;;  %v451_v29 = vmul.f32 0.0078125, %v421_v27  ;;  %v657_v27 = vld [vmem:[#allocation7 + $0xc0] sm:$0xff] }
 0x118   : > { %v7722_v30 = vsub.f32 %v399_v0, %v449_v28  ;;  %v7724_v31 = vsub.f32 %v401_v1, %v451_v29  ;;  %v664_v0 = vld [vmem:[#allocation7 + $0xf8] sm:$0xff]  ;;  %v671_v1 = vld [vmem:[#allocation7 + $0x130] sm:$0xff] }
 0x119   : > { %v419_v32 = vpop.xlane.xlu0 %418  ;;  %v423_v33 = vpop.xlane.xlu1 %422  ;;  %691 = vmatprep.subr.mxu0 %v664_v0  ;;  %6029 = vmatprep.subr.mxu1 %v671_v1  ;;  %v637_v0 = vld [vmem:[#allocation7 + $0x20] sm:$0xff] }
 0x11a   : > { %v450_v34 = vmul.f32 0.0078125, %v419_v32  ;;  %v481_v35 = vmul.f32 %v7722_v30, %v7722_v30  ;;  %v452_v36 = vmul.f32 0.0078125, %v423_v33  ;;  %v483_v37 = vmul.f32 %v7724_v31, %v7724_v31  ;;  %6030 = vmatpush3.msra.mxu1 %v671_v1  ;;  %v655_v33 = vld [vmem:[#allocation7 + $0xb0] sm:$0xff]  ;;  %v644_v1 = vld [vmem:[#allocation7 + $0x58] sm:$0xff] }
 0x11b   : > { %6031 = vmatprep.subr.mxu1 %v668_v20 }
 0x11c   : > { %497 = vadd.xlane.f32.xlu0 %v481_v35  ;;  %v7731_v38 = vsub.f32 %v7667_v2, %v450_v34  ;;  %v7734_v39 = vsub.f32 %v7670_v3, %v452_v36  ;;  %6032 = vmatpush3.msra.mxu1 %v668_v20 }
 0x11d   : > { %v425_v40 = vpop.xlane.xlu0 %424  ;;  %v427_v41 = vpop.xlane.xlu1 %426  ;;  %6033 = vmatprep.subr.mxu1 %v665_v24 }
 0x11e   : > { %v453_v42 = vmul.f32 0.0078125, %v425_v40  ;;  %v482_v43 = vmul.f32 %v7731_v38, %v7731_v38  ;;  %v454_v44 = vmul.f32 0.0078125, %v427_v41  ;;  %v484_v45 = vmul.f32 %v7734_v39, %v7734_v39  ;;  %6034 = vmatpush3.msra.mxu1 %v665_v24  ;;  %v659_v40 = vld [vmem:[#allocation7 + $0xd0] sm:$0xff] }
 0x120   : > { %501 = vadd.xlane.f32.xlu0 %v483_v37  ;;  %499 = vadd.xlane.f32.xlu1 %v482_v43  ;;  %v7741_v46 = vsub.f32 %v7675_v4, %v453_v42  ;;  %v7744_v47 = vsub.f32 %v7678_v5, %v454_v44  ;;  %v663_v5 = vld [vmem:[#allocation7 + $0xf0] sm:$0xff]  ;;  %v652_v37 = vld [vmem:[#allocation7 + $0x98] sm:$0xff] }
 0x121   : > { %v429_v48 = vpop.xlane.xlu0 %428  ;;  %v431_v49 = vpop.xlane.xlu1 %430  ;;  %692 = vmatpush1.msra.mxu0 %v663_v5  ;;  %v634_v5 = vld [vmem:[#allocation7 + $0x8] sm:$0xff] }
 0x122   : > { %v455_v50 = vmul.f32 0.0078125, %v429_v48  ;;  %v485_v51 = vmul.f32 %v7741_v46, %v7741_v46  ;;  %v456_v52 = vmul.f32 0.0078125, %v431_v49  ;;  %v486_v53 = vmul.f32 %v7744_v47, %v7744_v47  ;;  %693 = vmatprep.subr.mxu0 %v661_v19  ;;  %v651_v48 = vld [vmem:[#allocation7 + $0x90] sm:$0xff]  ;;  %v656_v49 = vld [vmem:[#allocation7 + $0xb8] sm:$0xff] }
 0x124   : > { %503 = vadd.xlane.f32.xlu1 %v484_v45  ;;  %505 = vadd.xlane.f32.xlu0 %v485_v51  ;;  %v7751_v54 = vsub.f32 %v7683_v6, %v455_v50  ;;  %v7754_v55 = vsub.f32 %v7686_v7, %v456_v52  ;;  %v648_v52 = vld [vmem:[#allocation7 + $0x78] sm:$0xff] }
 0x125   : > { %v433_v56 = vpop.xlane.xlu0 %432  ;;  %v435_v57 = vpop.xlane.xlu1 %434 }
 0x126   : > { %v457_v60 = vmul.f32 0.0078125, %v433_v56  ;;  %v487_v61 = vmul.f32 %v7751_v54, %v7751_v54  ;;  %v458_v62 = vmul.f32 0.0078125, %v435_v57  ;;  %v488_v2 = vmul.f32 %v7754_v55, %v7754_v55  ;;  %v646_v56 = vld [vmem:[#allocation7 + $0x68] sm:$0xff]  ;;  %v653_v57 = vld [vmem:[#allocation7 + $0xa0] sm:$0xff] }
 0x128   : > { %507 = vadd.xlane.f32.xlu1 %v486_v53  ;;  %509 = vadd.xlane.f32.xlu0 %v487_v61  ;;  %v7761_v3 = vsub.f32 %v7691_v8, %v457_v60  ;;  %v7764_v4 = vsub.f32 %v7694_v9, %v458_v62  ;;  %v660_v8 = vld [vmem:[#allocation7 + $0xd8] sm:$0xff]  ;;  %v642_v60 = vld [vmem:[#allocation7 + $0x48] sm:$0xff]  ;;  %v647_v62 = vld [vmem:[#allocation7 + $0x70] sm:$0xff] }
 0x129   : > { %v437_v6 = vpop.xlane.xlu0 %436  ;;  %v439_v7 = vpop.xlane.xlu1 %438  ;;  %694 = vmatpush1.msra.mxu0 %v660_v8  ;;  %v640_v61 = vld [vmem:[#allocation7 + $0x38] sm:$0xff] }
 0x12a   : > { %v459_v16 = vmul.f32 0.0078125, %v437_v6  ;;  %v489_v17 = vmul.f32 %v7761_v3, %v7761_v3  ;;  %v460_v18 = vmul.f32 0.0078125, %v439_v7  ;;  %v490_v9 = vmul.f32 %v7764_v4, %v7764_v4  ;;  %695 = vmatprep.subr.mxu0 %v658_v23  ;;  %v641_v6 = vld [vmem:[#allocation7 + $0x40] sm:$0xff] }
 0x12b   : > { %696 = vmatpush1.msra.mxu0 %v657_v27  ;;  %v633_v7 = vld [vmem:[#allocation7] sm:$0xff] }
 0x12c   : > { %511 = vadd.xlane.f32.xlu1 %v488_v2  ;;  %513 = vadd.xlane.f32.xlu0 %v489_v17  ;;  %v7771_v21 = vsub.f32 %v7699_v10, %v459_v16  ;;  %v7774_v22 = vsub.f32 %v7702_v11, %v460_v18  ;;  %v662_v10 = vld [vmem:[#allocation7 + $0xe8] sm:$0xff]  ;;  %v636_v2 = vld [vmem:[#allocation7 + $0x18] sm:$0xff]  ;;  %v10203_v17 = vmov 0.0   ;;  %v635_v18 = vld [vmem:[#allocation7 + $0x10] sm:$0xff] }
 0x12d   : > { %v441_v25 = vpop.xlane.xlu0 %440  ;;  %v443_v26 = vpop.xlane.xlu1 %442  ;;  %v654_v11 = vld [vmem:[#allocation7 + $0xa8] sm:$0xff]  ;;  %697 = vmatprep.subr.mxu0 %v655_v33  ;;  %6035 = vmatprep.subr.mxu1 %v662_v10 }
 0x12e   : > { %v461_v28 = vmul.f32 0.0078125, %v441_v25  ;;  %v491_v29 = vmul.f32 %v7771_v21, %v7771_v21  ;;  %v462_v32 = vmul.f32 0.0078125, %v443_v26  ;;  %v492_v34 = vmul.f32 %v7774_v22, %v7774_v22  ;;  %698 = vmatpush1.msra.mxu0 %v654_v11  ;;  %6036 = vmatpush3.msra.mxu1 %v662_v10  ;;  %v638_v16 = vld [vmem:[#allocation7 + $0x28] sm:$0xff] }
 0x12f   : > { %699 = vmatprep.subr.mxu0 %v652_v37  ;;  %6037 = vmatprep.subr.mxu1 %v659_v40  ;;  %v593_v26 = vlaneseq }
 0x130   : > { %515 = vadd.xlane.f32.xlu1 %v490_v9  ;;  %517 = vadd.xlane.f32.xlu0 %v491_v29  ;;  %v7781_v35 = vsub.f32 %v7707_v12, %v461_v28  ;;  %v7784_v36 = vsub.f32 %v7710_v13, %v462_v32  ;;  %v649_v12 = vld [vmem:[#allocation7 + $0x80] sm:$0xff] }
 0x131   : > { %v445_v41 = vpop.xlane.xlu0 %444  ;;  %v447_v42 = vpop.xlane.xlu1 %446  ;;  %700 = vmatpush1.msra.mxu0 %v651_v48  ;;  %6038 = vmatpush3.msra.mxu1 %v659_v40  ;;  %v7801_v11 = vshrl.u32 %v593_v26, 7 }
 0x132   : > { %v463_v43 = vmul.f32 0.0078125, %v445_v41  ;;  %v493_v44 = vmul.f32 %v7781_v35, %v7781_v35  ;;  %v464_v45 = vmul.f32 0.0078125, %v447_v42  ;;  %v494_v13 = vmul.f32 %v7784_v36, %v7784_v36  ;;  %701 = vmatprep.subr.mxu0 %v649_v12  ;;  %6039 = vmatprep.subr.mxu1 %v656_v49 }
 0x133   : > { %702 = vmatpush1.msra.mxu0 %v648_v52  ;;  %6040 = vmatpush3.msra.mxu1 %v656_v49  ;;  %10308 = vst [vmem:[#allocation19_spill] sm:$0xff] %v7801_v11  ;;  %v10201_v49 = vsub.s32 1, %v7801_v11 }
 0x134   : > { %519 = vadd.xlane.f32.xlu1 %v492_v34  ;;  %521 = vadd.xlane.f32.xlu0 %v493_v44  ;;  %v7791_v50 = vsub.f32 %v7715_v14, %v463_v43  ;;  %v7794_v51 = vsub.f32 %v7718_v15, %v464_v45  ;;  %v643_v15 = vld [vmem:[#allocation7 + $0x50] sm:$0xff]  ;;  %v10202_v44 = vsub.s32 0, %v7801_v11  ;;  %v415_v45 = vld [vmem:[%s10192_s6] sm:$0x3f] }
 0x135   : > { %703 = vmatprep.subr.mxu0 %v646_v56  ;;  %6041 = vmatprep.subr.mxu1 %v653_v57 }
 0x136   : > { %v495_v53 = vmul.f32 %v7791_v50, %v7791_v50  ;;  %v496_v14 = vmul.f32 %v7794_v51, %v7794_v51  ;;  %704 = vmatpush1.msra.mxu0 %v645_v58  ;;  %6042 = vmatpush3.msra.mxu1 %v653_v57  ;;  %v7810_v57 = vrot.slane %v415_v45, %v10202_v44 }
 0x137   : > { %705 = vmatprep.subr.mxu0 %v643_v15  ;;  %6043 = vmatprep.subr.mxu1 %v650_v59 }
 0x138   : > { %523 = vadd.xlane.f32.xlu1 %v494_v13  ;;  %525 = vadd.xlane.f32.xlu0 %v495_v53 }
 0x139   : > { %706 = vmatpush1.msra.mxu0 %v642_v60  ;;  %6044 = vmatpush3.msra.mxu1 %v650_v59  ;;  %v7815_v60 = vrot.slane %v415_v45, %v10201_v49 }
 0x13a   : > { %707 = vmatprep.subr.mxu0 %v640_v61  ;;  %6045 = vmatprep.subr.mxu1 %v647_v62 }
 0x13b   : > { %708 = vmatpush1.msra.mxu0 %v639_v63  ;;  %6046 = vmatpush3.msra.mxu1 %v647_v62 }
 0x13c   : > { %527 = vadd.xlane.f32.xlu1 %v496_v14  ;;  %709 = vmatprep.subr.mxu0 %v637_v0 }
 0x13d   : > { %6047 = vmatprep.subr.mxu1 %v644_v1  ;;  %710 = vmatpush1.msra.mxu0 %v636_v2 }
 0x13e   : > { %6048 = vmatpush3.msra.mxu1 %v644_v1  ;;  %711 = vmatprep.subr.mxu0 %v634_v5 }
 0x13f   : > { %6049 = vmatprep.subr.mxu1 %v641_v6  ;;  %712 = vmatpush1.msra.mxu0 %v633_v7 }
 0x140   : > { %745 = vmatprep.mubr.f32.mxu0 %v10203_v17  ;;  %6050 = vmatpush3.msra.mxu1 %v641_v6 }
 0x141   : > { %6051 = vmatprep.subr.mxu1 %v638_v16 }
 0x142   : > { %6052 = vmatpush3.msra.mxu1 %v638_v16 }
 0x143   : > { %6053 = vmatprep.subr.mxu1 %v635_v18 }
 0x144   : > { %6054 = vmatpush3.msra.mxu1 %v635_v18 }
 0x1a5   : > { %v498_v19 = vpop.xlane.xlu0 %497 }
 0x1a6   : > { %v529_v20 = vmul.f32 0.0078125, %v498_v19 }
 0x1a8   : > { %v545_v8 = vadd.f32 1e-05, %v529_v20 }
 0x1a9   : > { %v500_v9 = vpop.xlane.xlu1 %499  ;;  %v502_v23 = vpop.xlane.xlu0 %501 }
 0x1aa   : > { %6764 = vrsqrt.f32 %v545_v8  ;;  %v530_v24 = vmul.f32 0.0078125, %v500_v9  ;;  %v531_v25 = vmul.f32 0.0078125, %v502_v23 }
 0x1ac   : > { %v546_v27 = vadd.f32 1e-05, %v530_v24  ;;  %v547_v28 = vadd.f32 1e-05, %v531_v25 }
 0x1ad   : > { %v504_v29 = vpop.xlane.xlu1 %503  ;;  %v506_v32 = vpop.xlane.xlu0 %505 }
 0x1ae   : > { %6766 = vrsqrt.f32 %v546_v27  ;;  %v532_v33 = vmul.f32 0.0078125, %v504_v29  ;;  %v533_v10 = vmul.f32 0.0078125, %v506_v32 }
 0x1af   : > { %6768 = vrsqrt.f32 %v547_v28 }
 0x1b0   : > { %v548_v34 = vadd.f32 1e-05, %v532_v33  ;;  %v549_v37 = vadd.f32 1e-05, %v533_v10 }
 0x1b1   : > { %v508_v40 = vpop.xlane.xlu1 %507  ;;  %v510_v41 = vpop.xlane.xlu0 %509 }
 0x1b2   : > { %6770 = vrsqrt.f32 %v548_v34  ;;  %v534_v42 = vmul.f32 0.0078125, %v508_v40  ;;  %v535_v43 = vmul.f32 0.0078125, %v510_v41 }
 0x1b3   : > { %6772 = vrsqrt.f32 %v549_v37 }
 0x1b4   : > { %v550_v48 = vadd.f32 1e-05, %v534_v42  ;;  %v551_v12 = vadd.f32 1e-05, %v535_v43 }
 0x1b5   : > { %v512_v13 = vpop.xlane.xlu1 %511  ;;  %v514_v52 = vpop.xlane.xlu0 %513 }
 0x1b6   : > { %6774 = vrsqrt.f32 %v550_v48  ;;  %v536_v53 = vmul.f32 0.0078125, %v512_v13  ;;  %v537_v56 = vmul.f32 0.0078125, %v514_v52 }
 0x1b7   : > { %v6765_v58 = vpop.eup %6764  ;;  %6776 = vrsqrt.f32 %v551_v12 }
 0x1b8   : > { %v552_v14 = vadd.f32 1e-05, %v536_v53  ;;  %v553_v15 = vadd.f32 1e-05, %v537_v56  ;;  %v577_v59 = vmul.f32 %v6765_v58, %v7722_v30 }
 0x1b9   : > { %v516_v61 = vpop.xlane.xlu1 %515  ;;  %v518_v62 = vpop.xlane.xlu0 %517 }
 0x1ba   : > { %6778 = vrsqrt.f32 %v552_v14  ;;  %v538_v63 = vmul.f32 0.0078125, %v516_v61  ;;  %v539_v0 = vmul.f32 0.0078125, %v518_v62  ;;  %v597_v1 = vmul.f32 %v7810_v57, %v577_v59 }
 0x1bb   : > { %v6767_v2 = vpop.eup %6766  ;;  %6780 = vrsqrt.f32 %v553_v15 }
 0x1bc   : > { %v6769_v5 = vpop.eup %6768  ;;  %v554_v6 = vadd.f32 1e-05, %v538_v63  ;;  %v555_v7 = vadd.f32 1e-05, %v539_v0  ;;  %v617_v16 = vadd.f32 %v7815_v60, %v597_v1  ;;  %v578_v30 = vmul.f32 %v6767_v2, %v7731_v38 }
 0x1bd   : > { %v520_v18 = vpop.xlane.xlu1 %519  ;;  %v522_v19 = vpop.xlane.xlu0 %521  ;;  %v579_v20 = vmul.f32 %v6769_v5, %v7724_v31 }
 0x1be   : > { %6782 = vrsqrt.f32 %v554_v6  ;;  %v540_v8 = vmul.f32 0.0078125, %v520_v18  ;;  %v541_v9 = vmul.f32 0.0078125, %v522_v19  ;;  %746 = vmatmul.mubr.f32.vlgmr.msra.gmra.mxu0 %v617_v16  ;;  %6055 = vmatprep.mubr.f32.mxu1 %v617_v16  ;;  %v598_v23 = vmul.f32 %v7810_v57, %v578_v30 }
 0x1bf   : > { %v6771_v24 = vpop.eup %6770  ;;  %6784 = vrsqrt.f32 %v555_v7  ;;  %751 = vmatprep.mubr.f32.mxu0 %v10203_v17  ;;  %v599_v25 = vmul.f32 %v7810_v57, %v579_v20 }
 0x1c0   : > { %v6773_v26 = vpop.eup %6772  ;;  %v556_v27 = vadd.f32 1e-05, %v540_v8  ;;  %v557_v38 = vadd.f32 1e-05, %v541_v9  ;;  %v618_v28 = vadd.f32 %v7815_v60, %v598_v23  ;;  %v580_v31 = vmul.f32 %v6771_v24, %v7734_v39 }
 0x1c1   : > { %v524_v29 = vpop.xlane.xlu1 %523  ;;  %v526_v32 = vpop.xlane.xlu0 %525  ;;  %v619_v33 = vadd.f32 %v7815_v60, %v599_v25  ;;  %v581_v10 = vmul.f32 %v6773_v26, %v7741_v46 }
 0x1c2   : > { %6786 = vrsqrt.f32 %v556_v27  ;;  %v542_v34 = vmul.f32 0.0078125, %v524_v29  ;;  %v543_v37 = vmul.f32 0.0078125, %v526_v32  ;;  %752 = vmatmul.mubr.f32.gmra.mxu0 %v618_v28  ;;  %6056 = vmatmul.mubr.f32.vlgmr.msra.gmra.mxu1 %v618_v28  ;;  %v600_v40 = vmul.f32 %v7810_v57, %v580_v31 }
 0x1c3   : > { %v6775_v41 = vpop.eup %6774  ;;  %6788 = vrsqrt.f32 %v557_v38  ;;  %6058 = vmatprep.mubr.f32.mxu1 %v619_v33  ;;  %757 = vmatprep.mubr.f32.mxu0 %v10203_v17  ;;  %v601_v39 = vmul.f32 %v7810_v57, %v581_v10 }
 0x1c4   : > { %v6777_v42 = vpop.eup %6776  ;;  %v558_v43 = vadd.f32 1e-05, %v542_v34  ;;  %v559_v45 = vadd.f32 1e-05, %v543_v37  ;;  %v620_v48 = vadd.f32 %v7815_v60, %v600_v40  ;;  %v582_v46 = vmul.f32 %v6775_v41, %v7744_v47 }
 0x1c5   : > { %v528_v12 = vpop.xlane.xlu1 %527  ;;  %v621_v13 = vadd.f32 %v7815_v60, %v601_v39  ;;  %v583_v52 = vmul.f32 %v6777_v42, %v7751_v54 }
 0x1c6   : > { %6790 = vrsqrt.f32 %v558_v43  ;;  %v544_v53 = vmul.f32 0.0078125, %v528_v12  ;;  %758 = vmatmul.mubr.f32.gmra.mxu0 %v619_v33  ;;  %6059 = vmatmul.mubr.f32.gmra.mxu1 %v620_v48  ;;  %v602_v56 = vmul.f32 %v7810_v57, %v582_v46 }
 0x1c7   : > { %v6779_v58 = vpop.eup %6778  ;;  %6792 = vrsqrt.f32 %v559_v45  ;;  %6061 = vmatprep.mubr.f32.mxu1 %v621_v13  ;;  %763 = vmatprep.mubr.f32.mxu0 %v10203_v17  ;;  %v603_v14 = vmul.f32 %v7810_v57, %v583_v52 }
 0x1c8   : > { %v6781_v15 = vpop.eup %6780  ;;  %v560_v47 = vadd.f32 1e-05, %v544_v53  ;;  %v622_v59 = vadd.f32 %v7815_v60, %v602_v56  ;;  %v584_v61 = vmul.f32 %v6779_v58, %v7754_v55 }
 0x1c9   : > { %v623_v54 = vadd.f32 %v7815_v60, %v603_v14  ;;  %v585_v62 = vmul.f32 %v6781_v15, %v7761_v3 }
 0x1ca   : > { %6794 = vrsqrt.f32 %v560_v47  ;;  %764 = vmatmul.mubr.f32.gmra.mxu0 %v620_v48  ;;  %6062 = vmatmul.mubr.f32.gmra.mxu1 %v622_v59  ;;  %v604_v63 = vmul.f32 %v7810_v57, %v584_v61 }
 0x1cb   : > { %v6783_v0 = vpop.eup %6782  ;;  %6064 = vmatprep.mubr.f32.mxu1 %v623_v54  ;;  %769 = vmatprep.mubr.f32.mxu0 %v10203_v17  ;;  %v605_v1 = vmul.f32 %v7810_v57, %v585_v62 }
 0x1cc   : > { %v6785_v2 = vpop.eup %6784  ;;  %v624_v5 = vadd.f32 %v7815_v60, %v604_v63  ;;  %v586_v55 = vmul.f32 %v6783_v0, %v7764_v4 }
 0x1cd   : > { %v625_v6 = vadd.f32 %v7815_v60, %v605_v1  ;;  %v587_v3 = vmul.f32 %v6785_v2, %v7771_v21 }
 0x1ce   : > { %770 = vmatmul.mubr.f32.gmra.mxu0 %v621_v13  ;;  %6065 = vmatmul.mubr.f32.gmra.mxu1 %v624_v5  ;;  %v606_v7 = vmul.f32 %v7810_v57, %v586_v55 }
 0x1cf   : > { %v6787_v16 = vpop.eup %6786  ;;  %6067 = vmatprep.mubr.f32.mxu1 %v625_v6  ;;  %775 = vmatprep.mubr.f32.mxu0 %v10203_v17  ;;  %v607_v30 = vmul.f32 %v7810_v57, %v587_v3 }
 0x1d0   : > { %v6789_v18 = vpop.eup %6788  ;;  %v626_v19 = vadd.f32 %v7815_v60, %v606_v7  ;;  %v588_v20 = vmul.f32 %v6787_v16, %v7774_v22 }
 0x1d1   : > { %v627_v4 = vadd.f32 %v7815_v60, %v607_v30  ;;  %v589_v8 = vmul.f32 %v6789_v18, %v7781_v35 }
 0x1d2   : > { %776 = vmatmul.mubr.f32.gmra.mxu0 %v622_v59  ;;  %6068 = vmatmul.mubr.f32.gmra.mxu1 %v626_v19  ;;  %v608_v21 = vmul.f32 %v7810_v57, %v588_v20 }
 0x1d3   : > { %v6791_v9 = vpop.eup %6790  ;;  %6070 = vmatprep.mubr.f32.mxu1 %v627_v4  ;;  %781 = vmatprep.mubr.f32.mxu0 %v10203_v17  ;;  %v609_v23 = vmul.f32 %v7810_v57, %v589_v8 }
 0x1d4   : > { %v6793_v24 = vpop.eup %6792  ;;  %v628_v25 = vadd.f32 %v7815_v60, %v608_v21  ;;  %v590_v26 = vmul.f32 %v6791_v9, %v7784_v36 }
 0x1d5   : > { %v629_v22 = vadd.f32 %v7815_v60, %v609_v23  ;;  %v591_v27 = vmul.f32 %v6793_v24, %v7791_v50 }
 0x1d6   : > { %782 = vmatmul.mubr.f32.gmra.mxu0 %v623_v54  ;;  %6071 = vmatmul.mubr.f32.gmra.mxu1 %v628_v25  ;;  %v610_v35 = vmul.f32 %v7810_v57, %v590_v26 }
 0x1d7   : > { %v6795_v38 = vpop.eup %6794  ;;  %6073 = vmatprep.mubr.f32.mxu1 %v629_v22  ;;  %787 = vmatprep.mubr.f32.mxu0 %v10203_v17  ;;  %v611_v28 = vmul.f32 %v7810_v57, %v591_v27 }
 0x1d8   : > { %v630_v31 = vadd.f32 %v7815_v60, %v610_v35  ;;  %v592_v29 = vmul.f32 %v6795_v38, %v7794_v51 }
 0x1d9   : > { %v631_v36 = vadd.f32 %v7815_v60, %v611_v28 }
 0x1da   : > { %788 = vmatmul.mubr.f32.gmra.mxu0 %v624_v5  ;;  %6074 = vmatmul.mubr.f32.gmra.mxu1 %v630_v31  ;;  %v612_v50 = vmul.f32 %v7810_v57, %v592_v29 }
 0x1db   : > { %6076 = vmatprep.mubr.f32.mxu1 %v631_v36  ;;  %793 = vmatprep.mubr.f32.mxu0 %v10203_v17 }
 0x1dc   : > { %v632_v32 = vadd.f32 %v7815_v60, %v612_v50 }
 0x1de   : > { %794 = vmatmul.mubr.f32.gmra.mxu0 %v625_v6  ;;  %6077 = vmatmul.mubr.f32.gmra.mxu1 %v632_v32 }
 0x1df   : > { %799 = vmatprep.mubr.f32.mxu0 %v10203_v17 }
 0x1e2   : > { %800 = vmatmul.mubr.f32.gmra.mxu0 %v626_v19 }
 0x1e3   : > { %805 = vmatprep.mubr.f32.mxu0 %v10203_v17 }
 0x1e6   : > { %806 = vmatmul.mubr.f32.gmra.mxu0 %v627_v4 }
 0x1e7   : > { %811 = vmatprep.mubr.f32.mxu0 %v10203_v17 }
 0x1ea   : > { %812 = vmatmul.mubr.f32.gmra.mxu0 %v628_v25 }
 0x1eb   : > { %817 = vmatprep.mubr.f32.mxu0 %v10203_v17 }
 0x1ee   : > { %818 = vmatmul.mubr.f32.gmra.mxu0 %v629_v22 }
 0x1ef   : > { %823 = vmatprep.mubr.f32.mxu0 %v10203_v17 }
 0x1f2   : > { %824 = vmatmul.mubr.f32.gmra.mxu0 %v630_v31 }
 0x1f3   : > { %829 = vmatprep.mubr.f32.mxu0 %v10203_v17 }
 0x1f6   : > { %830 = vmatmul.mubr.f32.gmra.mxu0 %v631_v36 }
 0x1f7   : > { %835 = vmatprep.mubr.f32.mxu0 %v10203_v17 }
 0x1fa   : > { %836 = vmatmul.mubr.f32.gmra.mxu0 %v632_v32 }
 0x27e   : > { %v7879_v51 = vpop.f32.mrf.mxu0 }
 0x27f   : > { %v1147_v57 = vmul.f32 0.17677669, %v7879_v51  ;;  %1003 = vrot.lane.b32.xlu0 %v7879_v51, %s7415_s24 }
 0x280   : > { %v7884_v60 = vpop.f32.mrf.mxu0 }
 0x281   : > { %1227 = vrot.lane.b32.xlu1 %v7884_v60, %s7415_s24  ;;  %6111 = vmatprep.mubr.msk.f32.mxu0 %vm1499_vm0, %v1147_v57 }
 0x282   : > { %v7889_v33 = vpop.f32.mrf.mxu0  ;;  %v8112_v23 = vpop.f32.mrf.mxu1 }
 0x283   : > { %1005 = vrot.lane.b32.xlu0 %v7889_v33, %s7415_s24  ;;  %v1148_v30 = vmul.f32 0.17677669, %v7889_v33  ;;  %10309 = vst [vmem:[#allocation20_spill] sm:$0xff] %v8112_v23 }
 0x284   : > { %v7893_v10 = vpop.f32.mrf.mxu0  ;;  %v8126_v27 = vpop.f32.mrf.mxu1 }
 0x285   : > { %10312 = vst [vmem:[#allocation23_spill] sm:$0xff] %v8126_v27 }
 0x286   : > { %v7895_v34 = vpop.f32.mrf.mxu0  ;;  %v8140_v29 = vpop.f32.mrf.mxu1 }
 0x287   : > { %1229 = vrot.lane.b32.xlu0 %v7893_v10, %s7415_s24  ;;  %v1149_v19 = vmul.f32 0.17677669, %v7895_v34 }
 0x288   : > { %v7899_v37 = vpop.f32.mrf.mxu0  ;;  %v8154_v57 = vpop.f32.mrf.mxu1 }
 0x289   : > { %1231 = vrot.lane.b32.xlu1 %v7899_v37, %s7415_s24  ;;  %10314 = vst [vmem:[#allocation25_spill] sm:$0xff] %v8154_v57 }
 0x28a   : > { %v7903_v40 = vpop.f32.mrf.mxu0 }
 0x28b   : > { %1007 = vrot.lane.b32.xlu0 %v7895_v34, %s7415_s24  ;;  %v1150_v4 = vmul.f32 0.17677669, %v7903_v40 }
 0x28c   : > { %v7907_v41 = vpop.f32.mrf.mxu0 }
 0x28d   : > { %1009 = vrot.lane.b32.xlu1 %v7903_v40, %s7415_s24 }
 0x28e   : > { %v7911_v39 = vpop.f32.mrf.mxu0 }
 0x28f   : > { %1233 = vrot.lane.b32.xlu0 %v7907_v41, %s7415_s24  ;;  %v1151_v21 = vmul.f32 0.17677669, %v7911_v39 }
 0x290   : > { %v7915_v42 = vpop.f32.mrf.mxu0 }
 0x291   : > { %1297 = vrot.lane.b32.xlu1 %v7907_v41, %s7416_s19 }
 0x292   : > { %v7919_v43 = vpop.f32.mrf.mxu0 }
 0x293   : > { %1265 = vrot.lane.b32.xlu0 %v7907_v41, %s7417_s22  ;;  %v1152_v24 = vmul.f32 0.17677669, %v7919_v43 }
 0x294   : > { %v7923_v45 = vpop.f32.mrf.mxu0 }
 0x295   : > { %1235 = vrot.lane.b32.xlu1 %v7915_v42, %s7415_s24 }
 0x296   : > { %v7927_v48 = vpop.f32.mrf.mxu0 }
 0x297   : > { %1011 = vrot.lane.b32.xlu0 %v7911_v39, %s7415_s24  ;;  %v1153_v26 = vmul.f32 0.17677669, %v7927_v48 }
 0x298   : > { %v7931_v46 = vpop.f32.mrf.mxu0 }
 0x299   : > { %1299 = vrot.lane.b32.xlu1 %v7915_v42, %s7416_s19 }
 0x29a   : > { %v7935_v12 = vpop.f32.mrf.mxu0 }
 0x29b   : > { %1267 = vrot.lane.b32.xlu0 %v7915_v42, %s7417_s22  ;;  %v1154_v35 = vmul.f32 0.17677669, %v7935_v12 }
 0x29c   : > { %v7939_v13 = vpop.f32.mrf.mxu0 }
 0x29d   : > { %1013 = vrot.lane.b32.xlu1 %v7919_v43, %s7415_s24 }
 0x29e   : > { %v7943_v52 = vpop.f32.mrf.mxu0 }
 0x29f   : > { %1237 = vrot.lane.b32.xlu0 %v7923_v45, %s7415_s24  ;;  %v1155_v28 = vmul.f32 0.17677669, %v7943_v52 }
 0x2a0   : > { %v797_v53 = vpop.f32.mrf.mxu0 }
 0x2a1   : > { %1301 = vrot.lane.b32.xlu1 %v7923_v45, %s7416_s19 }
 0x2a2   : > { %v7949_v56 = vpop.f32.mrf.mxu0 }
 0x2a3   : > { %1269 = vrot.lane.b32.xlu0 %v7923_v45, %s7417_s22  ;;  %v1156_v36 = vmul.f32 0.17677669, %v7949_v56 }
 0x2a4   : > { %v803_v58 = vpop.f32.mrf.mxu0 }
 0x2a5   : > { %1239 = vrot.lane.b32.xlu1 %v7931_v46, %s7415_s24 }
 0x2a6   : > { %v7955_v14 = vpop.f32.mrf.mxu0 }
 0x2a7   : > { %1015 = vrot.lane.b32.xlu0 %v7927_v48, %s7415_s24  ;;  %v1157_v32 = vmul.f32 0.17677669, %v7955_v14 }
 0x2a8   : > { %v809_v15 = vpop.f32.mrf.mxu0 }
 0x2a9   : > { %1303 = vrot.lane.b32.xlu1 %v7931_v46, %s7416_s19 }
 0x2aa   : > { %v7961_v47 = vpop.f32.mrf.mxu0 }
 0x2ab   : > { %1271 = vrot.lane.b32.xlu0 %v7931_v46, %s7417_s22 }
 0x2ac   : > { %v815_v59 = vpop.f32.mrf.mxu0 }
 0x2ad   : > { %1017 = vrot.lane.b32.xlu1 %v7935_v12, %s7415_s24 }
 0x2ae   : > { %v7967_v61 = vpop.f32.mrf.mxu0 }
 0x2af   : > { %1241 = vrot.lane.b32.xlu0 %v7939_v13, %s7415_s24 }
 0x2b0   : > { %v821_v54 = vpop.f32.mrf.mxu0 }
 0x2b1   : > { %1305 = vrot.lane.b32.xlu1 %v7939_v13, %s7416_s19 }
 0x2b2   : > { %v7973_v62 = vpop.f32.mrf.mxu0 }
 0x2b3   : > { %1273 = vrot.lane.b32.xlu0 %v7939_v13, %s7417_s22 }
 0x2b4   : > { %v827_v63 = vpop.f32.mrf.mxu0 }
 0x2b5   : > { %1243 = vrot.lane.b32.xlu1 %v797_v53, %s7415_s24 }
 0x2b6   : > { %v7978_v0 = vpop.f32.mrf.mxu0 }
 0x2b7   : > { %1019 = vrot.lane.b32.xlu0 %v7943_v52, %s7415_s24 }
 0x2b8   : > { %v833_v1 = vpop.f32.mrf.mxu0 }
 0x2b9   : > { %1307 = vrot.lane.b32.xlu1 %v797_v53, %s7416_s19 }
 0x2ba   : > { %v7983_v2 = vpop.f32.mrf.mxu0 }
 0x2bb   : > { %1275 = vrot.lane.b32.xlu0 %v797_v53, %s7417_s22 }
 0x2bc   : > { %v7986_v5 = vpop.f32.mrf.mxu0 }
 0x2bd   : > { %1021 = vrot.lane.b32.xlu1 %v7949_v56, %s7415_s24  ;;  %6079 = vmatprep.subr.msk.mxu0 %vm1499_vm0, %v7986_v5 }
 0x2be   : > { %6080 = vmatpush3.xpose.msk.msra.mxu0 %vm1499_vm0, %v7986_v5 }
 0x2bf   : > { %1245 = vrot.lane.b32.xlu0 %v803_v58, %s7415_s24  ;;  %6081 = vmatprep.subr.msk.mxu0 %vm1499_vm0, %v833_v1 }
 0x2c1   : > { %1309 = vrot.lane.b32.xlu1 %v803_v58, %s7416_s19 }
 0x2c2   : > { %6082 = vmatpush3.xpose.msk.msra.mxu0 %vm1499_vm0, %v833_v1 }
 0x2c3   : > { %1277 = vrot.lane.b32.xlu0 %v803_v58, %s7417_s22  ;;  %6083 = vmatprep.subr.msk.mxu0 %vm1499_vm0, %v827_v63 }
 0x2c5   : > { %1247 = vrot.lane.b32.xlu1 %v809_v15, %s7415_s24 }
 0x2c6   : > { %6084 = vmatpush3.xpose.msk.msra.mxu0 %vm1499_vm0, %v827_v63 }
 0x2c7   : > { %1023 = vrot.lane.b32.xlu0 %v7955_v14, %s7415_s24  ;;  %6085 = vmatprep.subr.msk.mxu0 %vm1499_vm0, %v821_v54 }
 0x2c9   : > { %1311 = vrot.lane.b32.xlu1 %v809_v15, %s7416_s19 }
 0x2ca   : > { %6086 = vmatpush3.xpose.msk.msra.mxu0 %vm1499_vm0, %v821_v54 }
 0x2cb   : > { %1279 = vrot.lane.b32.xlu0 %v809_v15, %s7417_s22  ;;  %6087 = vmatprep.subr.msk.mxu0 %vm1499_vm0, %v815_v59 }
 0x2cd   : > { %1025 = vrot.lane.b32.xlu1 %v7961_v47, %s7415_s24 }
 0x2ce   : > { %6088 = vmatpush3.xpose.msk.msra.mxu0 %vm1499_vm0, %v815_v59 }
 0x2cf   : > { %1249 = vrot.lane.b32.xlu0 %v815_v59, %s7415_s24  ;;  %6089 = vmatprep.subr.msk.mxu0 %vm1499_vm0, %v809_v15 }
 0x2d1   : > { %1313 = vrot.lane.b32.xlu1 %v815_v59, %s7416_s19 }
 0x2d2   : > { %6090 = vmatpush3.xpose.msk.msra.mxu0 %vm1499_vm0, %v809_v15 }
 0x2d3   : > { %1281 = vrot.lane.b32.xlu0 %v815_v59, %s7417_s22  ;;  %6091 = vmatprep.subr.msk.mxu0 %vm1499_vm0, %v803_v58 }
 0x2d5   : > { %1251 = vrot.lane.b32.xlu1 %v821_v54, %s7415_s24 }
 0x2d6   : > { %6092 = vmatpush3.xpose.msk.msra.mxu0 %vm1499_vm0, %v803_v58 }
 0x2d7   : > { %1283 = vrot.lane.b32.xlu0 %v821_v54, %s7417_s22  ;;  %6093 = vmatprep.subr.msk.mxu0 %vm1499_vm0, %v797_v53 }
 0x2d9   : > { %1315 = vrot.lane.b32.xlu1 %v821_v54, %s7416_s19 }
 0x2da   : > { %6094 = vmatpush3.xpose.msk.msra.mxu0 %vm1499_vm0, %v797_v53 }
 0x2db   : > { %1285 = vrot.lane.b32.xlu0 %v827_v63, %s7417_s22  ;;  %6095 = vmatprep.subr.msk.mxu0 %vm1499_vm0, %v7939_v13 }
 0x2dd   : > { %1253 = vrot.lane.b32.xlu1 %v827_v63, %s7415_s24 }
 0x2de   : > { %6096 = vmatpush3.xpose.msk.msra.mxu0 %vm1499_vm0, %v7939_v13 }
 0x2df   : > { %1287 = vrot.lane.b32.xlu0 %v833_v1, %s7417_s22  ;;  %6097 = vmatprep.subr.msk.mxu0 %vm1499_vm0, %v7931_v46 }
 0x2e1   : > { %1317 = vrot.lane.b32.xlu1 %v827_v63, %s7416_s19 }
 0x2e2   : > { %6098 = vmatpush3.xpose.msk.msra.mxu0 %vm1499_vm0, %v7931_v46  ;;  %v1162_v46 = vmul.f32 0.17677669, %v7983_v2 }
 0x2e3   : > { %1257 = vrot.lane.b32.xlu0 %v7986_v5, %s7415_s24  ;;  %6099 = vmatprep.subr.msk.mxu0 %vm1499_vm0, %v7923_v45 }
 0x2e5   : > { %1255 = vrot.lane.b32.xlu1 %v833_v1, %s7415_s24 }
 0x2e6   : > { %6100 = vmatpush3.xpose.msk.msra.mxu0 %vm1499_vm0, %v7923_v45 }
 0x2e7   : > { %1263 = vrot.lane.b32.xlu0 %v7899_v37, %s7417_s22  ;;  %6101 = vmatprep.subr.msk.mxu0 %vm1499_vm0, %v7915_v42 }
 0x2e9   : > { %1319 = vrot.lane.b32.xlu1 %v833_v1, %s7416_s19 }
 0x2ea   : > { %6102 = vmatpush3.xpose.msk.msra.mxu0 %vm1499_vm0, %v7915_v42 }
 0x2eb   : > { %1027 = vrot.lane.b32.xlu0 %v7967_v61, %s7415_s24  ;;  %6103 = vmatprep.subr.msk.mxu0 %vm1499_vm0, %v7907_v41 }
 0x2ed   : > { %1295 = vrot.lane.b32.xlu1 %v7899_v37, %s7416_s19 }
 0x2ee   : > { %6104 = vmatpush3.xpose.msk.msra.mxu0 %vm1499_vm0, %v7907_v41 }
 0x2ef   : > { %1261 = vrot.lane.b32.xlu0 %v7893_v10, %s7417_s22  ;;  %6105 = vmatprep.subr.msk.mxu0 %vm1499_vm0, %v7899_v37 }
 0x2f1   : > { %1029 = vrot.lane.b32.xlu1 %v7973_v62, %s7415_s24  ;;  %v1004_v55 = vpop.permute.xlu0 %1003 }
 0x2f2   : > { %v1163_v6 = vmul.f32 0.17677669, %v1004_v55  ;;  %6106 = vmatpush3.xpose.msk.msra.mxu0 %vm1499_vm0, %v7899_v37  ;;  %v8168_v37 = vpop.f32.mrf.mxu1 }
 0x2f3   : > { %1031 = vrot.lane.b32.xlu0 %v7978_v0, %s7415_s24  ;;  %6107 = vmatprep.subr.msk.mxu0 %vm1499_vm0, %v7893_v10  ;;  %v8077_v7 = vpop.permute.xlu1 %1227 }
 0x2f4   : > { %6167 = vmatprep.mubr.msk.f32.mxu1 %vm1499_vm0, %v1163_v6  ;;  %v8182_v45 = vpop.f32.mrf.mxu1 }
 0x2f5   : > { %1293 = vrot.lane.b32.xlu1 %v7893_v10, %s7416_s19  ;;  %v8073_v3 = vpop.permute.xlu0 %1005 }
 0x2f6   : > { %6108 = vmatpush3.xpose.msk.msra.mxu0 %vm1499_vm0, %v7893_v10  ;;  %v1159_v10 = vmul.f32 0.17677669, %v7967_v61  ;;  %v8195_v53 = vpop.f32.mrf.mxu1 }
 0x2f7   : > { %1259 = vrot.lane.b32.xlu0 %v7884_v60, %s7417_s22  ;;  %6109 = vmatprep.subr.msk.mxu0 %vm1499_vm0, %v7884_v60 }
 0x2f9   : > { %1033 = vrot.lane.b32.xlu1 %v7983_v2, %s7415_s24  ;;  %v8085_v16 = vpop.permute.xlu0 %1229 }
 0x2fa   : > { %6110 = vmatpush3.xpose.msk.msra.mxu0 %vm1499_vm0, %v7884_v60 }
 0x2fb   : > { %v8090_v18 = vpop.permute.xlu1 %1231  ;;  %1053 = vrot.lane.b32.xlu0 %v7889_v33, %s7417_s22 }
 0x2fd   : > { %1051 = vrot.lane.b32.xlu1 %v7879_v51, %s7417_s22  ;;  %6112 = vmatmul.mubr.msk.f32.vlgmr.msra.gmra.mxu0 %vm1499_vm0, %v1148_v30  ;;  %v8098_v20 = vpop.permute.xlu0 %1007 }
 0x2fe   : > { %6114 = vmatprep.mubr.msk.f32.mxu0 %vm1499_vm0, %v1149_v19 }
 0x2ff   : > { %v8102_v8 = vpop.permute.xlu1 %1009  ;;  %1099 = vrot.lane.b32.xlu0 %v7879_v51, %s7416_s19 }
 0x301   : > { %1291 = vrot.lane.b32.xlu1 %v7884_v60, %s7416_s19  ;;  %6115 = vmatmul.mubr.msk.f32.gmra.mxu0 %vm1499_vm0, %v1150_v4  ;;  %v8110_v9 = vpop.permute.xlu0 %1233  ;;  %v1158_v60 = vmul.f32 0.17677669, %v7961_v47 }
 0x302   : > { %6117 = vmatprep.mubr.msk.f32.mxu0 %vm1499_vm0, %v1151_v21 }
 0x303   : > { %v8116_v25 = vpop.permute.xlu1 %1297  ;;  %1055 = vrot.lane.b32.xlu0 %v7895_v34, %s7417_s22 }
 0x304   : > { %10310 = vst [vmem:[#allocation21_spill] sm:$0xff] %v8116_v25 }
 0x305   : > { %1101 = vrot.lane.b32.xlu1 %v7889_v33, %s7416_s19  ;;  %6118 = vmatmul.mubr.msk.f32.gmra.mxu0 %vm1499_vm0, %v1152_v24  ;;  %v8124_v22 = vpop.permute.xlu0 %1265 }
 0x306   : > { %10311 = vst [vmem:[#allocation22_spill] sm:$0xff] %v8124_v22  ;;  %6120 = vmatprep.mubr.msk.f32.mxu0 %vm1499_vm0, %v1153_v26 }
 0x307   : > { %v8130_v38 = vpop.permute.xlu1 %1235  ;;  %1103 = vrot.lane.b32.xlu0 %v7895_v34, %s7416_s19 }
 0x309   : > { %1057 = vrot.lane.b32.xlu1 %v7903_v40, %s7417_s22  ;;  %6121 = vmatmul.mubr.msk.f32.gmra.mxu0 %vm1499_vm0, %v1154_v35  ;;  %v8138_v31 = vpop.permute.xlu0 %1011 }
 0x30a   : > { %6123 = vmatprep.mubr.msk.f32.mxu0 %vm1499_vm0, %v1155_v28 }
 0x30b   : > { %v8144_v50 = vpop.permute.xlu1 %1299  ;;  %1059 = vrot.lane.b32.xlu0 %v7911_v39, %s7417_s22 }
 0x30c   : > { %10313 = vst [vmem:[#allocation24_spill] sm:$0xff] %v8144_v50 }
 0x30d   : > { %1105 = vrot.lane.b32.xlu1 %v7903_v40, %s7416_s19  ;;  %6124 = vmatmul.mubr.msk.f32.gmra.mxu0 %vm1499_vm0, %v1156_v36  ;;  %v8152_v51 = vpop.permute.xlu0 %1267  ;;  %v1160_v40 = vmul.f32 0.17677669, %v7973_v62 }
 0x30e   : > { %6126 = vmatprep.mubr.msk.f32.mxu0 %vm1499_vm0, %v1157_v32 }
 0x30f   : > { %v8158_v33 = vpop.permute.xlu1 %1013  ;;  %1107 = vrot.lane.b32.xlu0 %v7911_v39, %s7416_s19  ;;  %v1161_v39 = vmul.f32 0.17677669, %v7978_v0 }
 0x311   : > { %1061 = vrot.lane.b32.xlu1 %v7919_v43, %s7417_s22  ;;  %6127 = vmatmul.mubr.msk.f32.gmra.mxu0 %vm1499_vm0, %v1158_v60  ;;  %v8166_v34 = vpop.permute.xlu0 %1237 }
 0x312   : > { %6129 = vmatprep.mubr.msk.f32.mxu0 %vm1499_vm0, %v1159_v10 }
 0x313   : > { %v8172_v41 = vpop.permute.xlu1 %1301  ;;  %1063 = vrot.lane.b32.xlu0 %v7927_v48, %s7417_s22 }
 0x314   : > { %10315 = vst [vmem:[#allocation26_spill] sm:$0xff] %v8172_v41 }
 0x315   : > { %1109 = vrot.lane.b32.xlu1 %v7919_v43, %s7416_s19  ;;  %6130 = vmatmul.mubr.msk.f32.gmra.mxu0 %vm1499_vm0, %v1160_v40  ;;  %v8180_v42 = vpop.permute.xlu0 %1269 }
 0x316   : > { %6132 = vmatprep.mubr.msk.f32.mxu0 %vm1499_vm0, %v1161_v39 }
 0x317   : > { %v8186_v13 = vpop.permute.xlu1 %1239  ;;  %1111 = vrot.lane.b32.xlu0 %v7927_v48, %s7416_s19  ;;  %v8205_v48 = vpop.f32.mrf.mxu1 }
 0x318   : > { %10316 = vst [vmem:[#allocation27_spill] sm:$0xff] %v8205_v48 }
 0x319   : > { %1065 = vrot.lane.b32.xlu1 %v7935_v12, %s7417_s22  ;;  %6133 = vmatmul.mubr.msk.f32.gmra.mxu0 %vm1499_vm0, %v1162_v46  ;;  %v8193_v43 = vpop.permute.xlu0 %1015  ;;  %v8215_v63 = vpop.f32.mrf.mxu1 }
 0x31a   : > { %10317 = vst [vmem:[#allocation28_spill] sm:$0xff] %v8215_v63 }
 0x31b   : > { %v8197_v58 = vpop.permute.xlu1 %1303  ;;  %1067 = vrot.lane.b32.xlu0 %v7943_v52, %s7417_s22  ;;  %v8225_v6 = vpop.f32.mrf.mxu1 }
 0x31c   : > { %10318 = vst [vmem:[#allocation29_spill] sm:$0xff] %v8225_v6 }
 0x31d   : > { %1289 = vrot.lane.b32.xlu1 %v7986_v5, %s7417_s22  ;;  %v8203_v15 = vpop.permute.xlu0 %1271  ;;  %v8235_v30 = vpop.f32.mrf.mxu1 }
 0x31e   : > { %10319 = vst [vmem:[#allocation30_spill] sm:$0xff] %v8235_v30 }
 0x31f   : > { %v8207_v59 = vpop.permute.xlu1 %1017  ;;  %1115 = vrot.lane.b32.xlu0 %v7943_v52, %s7416_s19  ;;  %v8245_v4 = vpop.f32.mrf.mxu1 }
 0x321   : > { %1321 = vrot.lane.b32.xlu1 %v7986_v5, %s7416_s19  ;;  %v8213_v54 = vpop.permute.xlu0 %1241  ;;  %v8255_v24 = vpop.f32.mrf.mxu1 }
 0x323   : > { %v8217_v1 = vpop.permute.xlu1 %1305  ;;  %1071 = vrot.lane.b32.xlu0 %v7955_v14, %s7417_s22  ;;  %v8265_v35 = vpop.f32.mrf.mxu1 }
 0x325   : > { %1113 = vrot.lane.b32.xlu1 %v7935_v12, %s7416_s19  ;;  %v8223_v55 = vpop.permute.xlu0 %1273  ;;  %v8275_v36 = vpop.f32.mrf.mxu1 }
 0x326   : > { %10320 = vst [vmem:[#allocation31_spill] sm:$0xff] %v8275_v36 }
 0x327   : > { %v8227_v52 = vpop.permute.xlu1 %1243  ;;  %1119 = vrot.lane.b32.xlu0 %v7955_v14, %s7416_s19  ;;  %v8301_v39 = vpop.f32.mrf.mxu1 }
 0x329   : > { %1069 = vrot.lane.b32.xlu1 %v7949_v56, %s7417_s22  ;;  %v8233_v5 = vpop.permute.xlu0 %1019 }
 0x32b   : > { %v8237_v19 = vpop.permute.xlu1 %1307  ;;  %1075 = vrot.lane.b32.xlu0 %v7967_v61, %s7417_s22 }
 0x32d   : > { %1117 = vrot.lane.b32.xlu1 %v7949_v56, %s7416_s19  ;;  %v8243_v12 = vpop.permute.xlu0 %1275 }
 0x32f   : > { %v8247_v14 = vpop.permute.xlu1 %1021  ;;  %1123 = vrot.lane.b32.xlu0 %v7967_v61, %s7416_s19 }
 0x331   : > { %1073 = vrot.lane.b32.xlu1 %v7961_v47, %s7417_s22  ;;  %v8253_v21 = vpop.permute.xlu0 %1245 }
 0x333   : > { %v8257_v26 = vpop.permute.xlu1 %1309  ;;  %1079 = vrot.lane.b32.xlu0 %v7978_v0, %s7417_s22 }
 0x335   : > { %1121 = vrot.lane.b32.xlu1 %v7961_v47, %s7416_s19  ;;  %v8263_v56 = vpop.permute.xlu0 %1277 }
 0x337   : > { %v8267_v61 = vpop.permute.xlu1 %1247  ;;  %1127 = vrot.lane.b32.xlu0 %v7978_v0, %s7416_s19 }
 0x339   : > { %1077 = vrot.lane.b32.xlu1 %v7973_v62, %s7417_s22  ;;  %v8273_v28 = vpop.permute.xlu0 %1023 }
 0x33b   : > { %v8277_v32 = vpop.permute.xlu1 %1311  ;;  %1369 = vrot.lane.b32.xlu0 %v8275_v36, %s7415_s24 }
 0x33d   : > { %1125 = vrot.lane.b32.xlu1 %v7973_v62, %s7416_s19  ;;  %v8283_v47 = vpop.permute.xlu0 %1279 }
 0x33f   : > { %v8285_v60 = vpop.permute.xlu1 %1025  ;;  %1365 = vrot.lane.b32.xlu0 %v8255_v24, %s7415_s24 }
 0x341   : > { %1081 = vrot.lane.b32.xlu1 %v7983_v2, %s7417_s22  ;;  %v1250_v0 = vpop.permute.xlu0 %1249 }
 0x343   : > { %v8291_v10 = vpop.permute.xlu1 %1313  ;;  %1361 = vrot.lane.b32.xlu0 %v8235_v30, %s7415_s24 }
 0x345   : > { %1129 = vrot.lane.b32.xlu1 %v7983_v2, %s7416_s19  ;;  %v8297_v62 = vpop.permute.xlu0 %1281 }
 0x347   : > { %v1252_v40 = vpop.permute.xlu1 %1251  ;;  %1357 = vrot.lane.b32.xlu0 %v8215_v63, %s7415_s24 }
 0x349   : > { %1367 = vrot.lane.b32.xlu1 %v8301_v39, %s7415_s24  ;;  %v8305_v46 = vpop.permute.xlu0 %1283 }
 0x34b   : > { %v8307_v49 = vpop.permute.xlu1 %1315  ;;  %1353 = vrot.lane.b32.xlu0 %v8195_v53, %s7415_s24 }
 0x34d   : > { %1363 = vrot.lane.b32.xlu1 %v8265_v35, %s7415_s24  ;;  %v8313_v2 = vpop.permute.xlu0 %1285 }
 0x34f   : > { %v1254_v44 = vpop.permute.xlu1 %1253  ;;  %1349 = vrot.lane.b32.xlu0 %v8168_v37, %s7415_s24 }
 0x351   : > { %1359 = vrot.lane.b32.xlu1 %v8245_v4, %s7415_s24  ;;  %v8319_v17 = vpop.permute.xlu0 %1287 }
 0x353   : > { %v8321_v11 = vpop.permute.xlu1 %1317  ;;  %1345 = vrot.lane.b32.xlu0 %v8140_v29, %s7415_s24 }
 0x355   : > { %1355 = vrot.lane.b32.xlu1 %v8225_v6, %s7415_s24  ;;  %v1258_v25 = vpop.permute.xlu0 %1257 }
 0x356   : > { %6135 = vmatprep.subr.msk.mxu1 %vm1499_vm0, %v1258_v25 }
 0x357   : > { %v1256_v50 = vpop.permute.xlu1 %1255  ;;  %1341 = vrot.lane.b32.xlu0 %v8112_v23, %s7415_s24  ;;  %6136 = vmatpush3.xpose.msk.msra.mxu1 %vm1499_vm0, %v1258_v25 }
 0x358   : > { %6137 = vmatprep.subr.msk.mxu1 %vm1499_vm0, %v1256_v50 }
 0x359   : > { %1351 = vrot.lane.b32.xlu1 %v8205_v48, %s7415_s24  ;;  %v8334_v22 = vpop.permute.xlu0 %1263 }
 0x35a   : > { %10321 = vst [vmem:[#allocation32_spill] sm:$0xff] %v8334_v22 }
 0x35b   : > { %v8336_v41 = vpop.permute.xlu1 %1319  ;;  %1415 = vrot.lane.b32.xlu0 %v8301_v39, %s7417_s22  ;;  %6138 = vmatpush3.xpose.msk.msra.mxu1 %vm1499_vm0, %v1256_v50 }
 0x35c   : > { %6139 = vmatprep.subr.msk.mxu1 %vm1499_vm0, %v1254_v44 }
 0x35d   : > { %1347 = vrot.lane.b32.xlu1 %v8182_v45, %s7415_s24  ;;  %v8344_v25 = vpop.permute.xlu0 %1027 }
 0x35f   : > { %v8346_v23 = vpop.permute.xlu1 %1295  ;;  %1465 = vrot.lane.b32.xlu0 %v8275_v36, %s7416_s19  ;;  %6140 = vmatpush3.xpose.msk.msra.mxu1 %vm1499_vm0, %v1254_v44 }
 0x360   : > { %10322 = vst [vmem:[#allocation33_spill] sm:$0xff] %v8346_v23  ;;  %6141 = vmatprep.subr.msk.mxu1 %vm1499_vm0, %v1252_v40 }
 0x361   : > { %1343 = vrot.lane.b32.xlu1 %v8154_v57, %s7415_s24  ;;  %v8354_v50 = vpop.permute.xlu0 %1261 }
 0x362   : > { %10323 = vst [vmem:[#allocation34_spill] sm:$0xff] %v8354_v50 }
 0x363   : > { %v8356_v22 = vpop.permute.xlu1 %1029  ;;  %1411 = vrot.lane.b32.xlu0 %v8265_v35, %s7417_s22  ;;  %6142 = vmatpush3.xpose.msk.msra.mxu1 %vm1499_vm0, %v1252_v40 }
 0x364   : > { %6143 = vmatprep.subr.msk.mxu1 %vm1499_vm0, %v1250_v0 }
 0x365   : > { %1339 = vrot.lane.b32.xlu1 %v8126_v27, %s7415_s24  ;;  %v8364_v44 = vpop.permute.xlu0 %1031  ;;  %s10139_s24 = scalar_lea.hbm %s10194_s8, %s5574_s2 }
 0x367   : > { %v8366_v23 = vpop.permute.xlu1 %1293  ;;  %1461 = vrot.lane.b32.xlu0 %v8255_v24, %s7416_s19  ;;  %6144 = vmatpush3.xpose.msk.msra.mxu1 %vm1499_vm0, %v1250_v0 }
 0x368   : > { %6145 = vmatprep.subr.msk.mxu1 %vm1499_vm0, %v8267_v61 }
 0x369   : > { %1417 = vrot.lane.b32.xlu1 %v8275_v36, %s7417_s22  ;;  %v8375_v40 = vpop.permute.xlu0 %1259 }
 0x36b   : > { %v8377_v50 = vpop.permute.xlu1 %1033  ;;  %1409 = vrot.lane.b32.xlu0 %v8235_v30, %s7417_s22  ;;  %6146 = vmatpush3.xpose.msk.msra.mxu1 %vm1499_vm0, %v8267_v61 }
 0x36c   : > { %6147 = vmatprep.subr.msk.mxu1 %vm1499_vm0, %v8253_v21 }
 0x36d   : > { %1413 = vrot.lane.b32.xlu1 %v8255_v24, %s7417_s22  ;;  %v8391_v27 = vpop.permute.xlu0 %1053 }
 0x36f   : > { %v1052_v0 = vpop.permute.xlu1 %1051  ;;  %1407 = vrot.lane.b32.xlu0 %v8245_v4, %s7417_s22  ;;  %6148 = vmatpush3.xpose.msk.msra.mxu1 %vm1499_vm0, %v8253_v21 }
 0x370   : > { %v1179_v36 = vmul.f32 0.17677669, %v1052_v0  ;;  %6149 = vmatprep.subr.msk.mxu1 %vm1499_vm0, %v8227_v52 }
 0x371   : > { %1463 = vrot.lane.b32.xlu1 %v8301_v39, %s7416_s19  ;;  %v8408_v21 = vpop.permute.xlu0 %1099 }
 0x372   : > { %6223 = vmatprep.mubr.msk.f32.mxu0 %vm1499_vm0, %v1179_v36 }
 0x373   : > { %v8398_v61 = vpop.permute.xlu1 %1291  ;;  %1457 = vrot.lane.b32.xlu0 %v8235_v30, %s7416_s19  ;;  %6150 = vmatpush3.xpose.msk.msra.mxu1 %vm1499_vm0, %v8227_v52 }
 0x374   : > { %6151 = vmatprep.subr.msk.mxu1 %vm1499_vm0, %v8213_v54 }
 0x375   : > { %1459 = vrot.lane.b32.xlu1 %v8265_v35, %s7416_s19  ;;  %v8426_v36 = vpop.permute.xlu0 %1055 }
 0x377   : > { %v8410_v0 = vpop.permute.xlu1 %1101  ;;  %1403 = vrot.lane.b32.xlu0 %v8225_v6, %s7417_s22  ;;  %6152 = vmatpush3.xpose.msk.msra.mxu1 %vm1499_vm0, %v8213_v54 }
 0x378   : > { %6153 = vmatprep.subr.msk.mxu1 %vm1499_vm0, %v8186_v13 }
 0x379   : > { %1405 = vrot.lane.b32.xlu1 %v8215_v63, %s7417_s22 }
 0x37b   : > { %v8420_v52 = vpop.permute.xlu1 %1057  ;;  %1397 = vrot.lane.b32.xlu0 %v8168_v37, %s7417_s22  ;;  %6154 = vmatpush3.xpose.msk.msra.mxu1 %vm1499_vm0, %v8186_v13  ;;  %v8442_v13 = vpop.permute.xlu0 %1103 }
 0x37c   : > { %6155 = vmatprep.subr.msk.mxu1 %vm1499_vm0, %v8166_v34 }
 0x37d   : > { %1455 = vrot.lane.b32.xlu1 %v8245_v4, %s7416_s19 }
 0x37f   : > { %v8432_v54 = vpop.permute.xlu1 %1105  ;;  %1447 = vrot.lane.b32.xlu0 %v8205_v48, %s7416_s19  ;;  %6156 = vmatpush3.xpose.msk.msra.mxu1 %vm1499_vm0, %v8166_v34 }
 0x380   : > { %6157 = vmatprep.subr.msk.mxu1 %vm1499_vm0, %v8130_v38 }
 0x381   : > { %1453 = vrot.lane.b32.xlu1 %v8215_v63, %s7416_s19  ;;  %v8458_v63 = vpop.permute.xlu0 %1059 }
 0x383   : > { %v8444_v30 = vpop.permute.xlu1 %1061  ;;  %1443 = vrot.lane.b32.xlu0 %v8182_v45, %s7416_s19  ;;  %6158 = vmatpush3.xpose.msk.msra.mxu1 %vm1499_vm0, %v8130_v38 }
 0x384   : > { %6159 = vmatprep.subr.msk.mxu1 %vm1499_vm0, %v8110_v9 }
 0x385   : > { %1401 = vrot.lane.b32.xlu1 %v8195_v53, %s7417_s22 }
 0x387   : > { %v8454_v34 = vpop.permute.xlu1 %1109  ;;  %6160 = vmatpush3.xpose.msk.msra.mxu1 %vm1499_vm0, %v8110_v9  ;;  %v8472_v9 = vpop.permute.xlu0 %1107 }
 0x388   : > { %10324 = vst [vmem:[#allocation35_spill] sm:$0xff] %v8454_v34  ;;  %6161 = vmatprep.subr.msk.mxu1 %vm1499_vm0, %v8090_v18 }
 0x389   : > { %1451 = vrot.lane.b32.xlu1 %v8225_v6, %s7416_s19  ;;  %v1165_v6 = vmul.f32 0.17677669, %v8098_v20 }
 0x38b   : > { %v8464_v38 = vpop.permute.xlu1 %1065  ;;  %6162 = vmatpush3.xpose.msk.msra.mxu1 %vm1499_vm0, %v8090_v18 }
 0x38c   : > { %6163 = vmatprep.subr.msk.mxu1 %vm1499_vm0, %v8085_v16 }
 0x38d   : > { %1399 = vrot.lane.b32.xlu1 %v8205_v48, %s7417_s22  ;;  %v1164_v48 = vmul.f32 0.17677669, %v8073_v3  ;;  %v1166_v3 = vmul.f32 0.17677669, %v8102_v8  ;;  %v1168_v8 = vmul.f32 0.17677669, %v8158_v33 }
 0x38e   : > { %v1170_v33 = vmul.f32 0.17677669, %v8207_v59  ;;  %v1173_v59 = vmul.f32 0.17677669, %v8273_v28  ;;  %v1176_v28 = vmul.f32 0.17677669, %v8356_v22 }
 0x38f   : > { %v1290_v34 = vpop.permute.xlu1 %1289  ;;  %6164 = vmatpush3.xpose.msk.msra.mxu1 %vm1499_vm0, %v8085_v16  ;;  %v8487_v16 = vpop.permute.xlu0 %1063  ;;  %v1178_v22 = vmul.f32 0.17677669, %v8377_v50  ;;  %v8653_v50 = vld [vmem:[#allocation5 + $0x10] sm:$0xff] }
 0x390   : > { %6165 = vmatprep.subr.msk.mxu1 %vm1499_vm0, %v8077_v7  ;;  %6191 = vmatprep.subr.msk.mxu0 %vm1499_vm0, %v1290_v34 }
 0x391   : > { %1449 = vrot.lane.b32.xlu1 %v8195_v53, %s7416_s19  ;;  %6192 = vmatpush3.xpose.msk.msra.mxu0 %vm1499_vm0, %v1290_v34 }
 0x392   : > { %6193 = vmatprep.subr.msk.mxu0 %vm1499_vm0, %v8319_v17 }
 0x393   : > { %v1322_v18 = vpop.permute.xlu1 %1321  ;;  %6166 = vmatpush3.xpose.msk.msra.mxu1 %vm1499_vm0, %v8077_v7  ;;  %v1167_v7 = vmul.f32 0.17677669, %v8138_v31  ;;  %v1169_v31 = vmul.f32 0.17677669, %v8193_v43 }
 0x394   : > { %6247 = vmatprep.subr.msk.mxu1 %vm1499_vm0, %v1322_v18 }
 0x395   : > { %1395 = vrot.lane.b32.xlu1 %v8182_v45, %s7417_s22  ;;  %6194 = vmatpush3.xpose.msk.msra.mxu0 %vm1499_vm0, %v8319_v17  ;;  %v8508_v17 = vpop.permute.xlu0 %1111 }
 0x396   : > { %6168 = vmatmul.mubr.msk.f32.vlgmr.msra.gmra.mxu1 %vm1499_vm0, %v1164_v48  ;;  %6195 = vmatprep.subr.msk.mxu0 %vm1499_vm0, %v8313_v2  ;;  %v1171_v48 = vmul.f32 0.17677669, %v8233_v5 }
 0x397   : > { %6170 = vmatprep.mubr.msk.f32.mxu1 %vm1499_vm0, %v1165_v6  ;;  %6248 = vmatpush3.xpose.msk.msra.mxu1 %vm1499_vm0, %v1322_v18  ;;  %v8510_v20 = vpop.permute.xlu1 %1113 }
 0x398   : > { %6249 = vmatprep.subr.msk.mxu1 %vm1499_vm0, %v8336_v41 }
 0x399   : > { %1445 = vrot.lane.b32.xlu1 %v8168_v37, %s7416_s19  ;;  %6196 = vmatpush3.xpose.msk.msra.mxu0 %vm1499_vm0, %v8313_v2 }
 0x39a   : > { %6171 = vmatmul.mubr.msk.f32.gmra.mxu1 %vm1499_vm0, %v1166_v3  ;;  %6197 = vmatprep.subr.msk.mxu0 %vm1499_vm0, %v8305_v46  ;;  %v8664_v3 = vld [vmem:[#allocation5 + $0x8] sm:$0xff] }
 0x39b   : > { %6173 = vmatprep.mubr.msk.f32.mxu1 %vm1499_vm0, %v1167_v7  ;;  %6250 = vmatpush3.xpose.msk.msra.mxu1 %vm1499_vm0, %v8336_v41  ;;  %v8533_v41 = vpop.permute.xlu0 %1067  ;;  %v8535_v43 = vpop.permute.xlu1 %1069 }
 0x39c   : > { %6251 = vmatprep.subr.msk.mxu1 %vm1499_vm0, %v8321_v11 }
 0x39d   : > { %1393 = vrot.lane.b32.xlu1 %v8140_v29, %s7417_s22  ;;  %6198 = vmatpush3.xpose.msk.msra.mxu0 %vm1499_vm0, %v8305_v46 }
 0x39e   : > { %6174 = vmatmul.mubr.msk.f32.gmra.mxu1 %vm1499_vm0, %v1168_v8  ;;  %6199 = vmatprep.subr.msk.mxu0 %vm1499_vm0, %v8297_v62  ;;  %v10329_v8 = vld [vmem:[#allocation21_spill] sm:$0xff] }
 0x39f   : > { %6176 = vmatprep.mubr.msk.f32.mxu1 %vm1499_vm0, %v1169_v31  ;;  %6252 = vmatpush3.xpose.msk.msra.mxu1 %vm1499_vm0, %v8321_v11  ;;  %v1172_v11 = vmul.f32 0.17677669, %v8247_v14  ;;  %v8558_v6 = vpop.permute.xlu0 %1115  ;;  %v8560_v5 = vpop.permute.xlu1 %1117  ;;  %v1175_v14 = vmul.f32 0.17677669, %v8344_v25  ;;  %v10327_v25 = vld [vmem:[#allocation24_spill] sm:$0xff] }
 0x3a0   : > { %6253 = vmatprep.subr.msk.mxu1 %vm1499_vm0, %v8307_v49 }
 0x3a1   : > { %1391 = vrot.lane.b32.xlu1 %v8154_v57, %s7417_s22  ;;  %6200 = vmatpush3.xpose.msk.msra.mxu0 %vm1499_vm0, %v8297_v62 }
 0x3a2   : > { %6177 = vmatmul.mubr.msk.f32.gmra.mxu1 %vm1499_vm0, %v1170_v33  ;;  %6201 = vmatprep.subr.msk.mxu0 %vm1499_vm0, %v8283_v47  ;;  %v8673_v33 = vld [vmem:[#allocation5 + $0x20] sm:$0xff] }
 0x3a3   : > { %6179 = vmatprep.mubr.msk.f32.mxu1 %vm1499_vm0, %v1171_v48  ;;  %6254 = vmatpush3.xpose.msk.msra.mxu1 %vm1499_vm0, %v8307_v49  ;;  %v1174_v49 = vmul.f32 0.17677669, %v8285_v60  ;;  %v8583_v60 = vpop.permute.xlu1 %1073  ;;  %v10330_v48 = vld [vmem:[#allocation34_spill] sm:$0xff] }
 0x3a4   : > { %6255 = vmatprep.subr.msk.mxu1 %vm1499_vm0, %v8291_v10 }
 0x3a5   : > { %1441 = vrot.lane.b32.xlu1 %v8140_v29, %s7416_s19  ;;  %6202 = vmatpush3.xpose.msk.msra.mxu0 %vm1499_vm0, %v8283_v47  ;;  %v8581_v47 = vpop.permute.xlu0 %1071 }
 0x3a6   : > { %6180 = vmatmul.mubr.msk.f32.gmra.mxu1 %vm1499_vm0, %v1172_v11  ;;  %6203 = vmatprep.subr.msk.mxu0 %vm1499_vm0, %v8263_v56 }
 0x3a7   : > { %6182 = vmatprep.mubr.msk.f32.mxu1 %vm1499_vm0, %v1173_v59  ;;  %6256 = vmatpush3.xpose.msk.msra.mxu1 %vm1499_vm0, %v8291_v10  ;;  %v8604_v10 = vpop.permute.xlu1 %1121 }
 0x3a8   : > { %6257 = vmatprep.subr.msk.mxu1 %vm1499_vm0, %v8277_v32 }
 0x3a9   : > { %6204 = vmatpush3.xpose.msk.msra.mxu0 %vm1499_vm0, %v8263_v56  ;;  %v1177_v56 = vmul.f32 0.17677669, %v8364_v44  ;;  %v10328_v44 = vld [vmem:[#allocation32_spill] sm:$0xff] }
 0x3aa   : > { %6183 = vmatmul.mubr.msk.f32.gmra.mxu1 %vm1499_vm0, %v1174_v49  ;;  %6205 = vmatprep.subr.msk.mxu0 %vm1499_vm0, %v8243_v12  ;;  %v8683_v49 = vld [vmem:[#allocation5 + $0x18] sm:$0xff] }
 0x3ab   : > { %6185 = vmatprep.mubr.msk.f32.mxu1 %vm1499_vm0, %v1175_v14  ;;  %6258 = vmatpush3.xpose.msk.msra.mxu1 %vm1499_vm0, %v8277_v32  ;;  %v1195_v32 = vmul.f32 0.17677669, %v8408_v21 }
 0x3ac   : > { %6259 = vmatprep.subr.msk.mxu1 %vm1499_vm0, %v8257_v26 }
 0x3ad   : > { %6206 = vmatpush3.xpose.msk.msra.mxu0 %vm1499_vm0, %v8243_v12  ;;  %v8602_v12 = vpop.permute.xlu0 %1119 }
 0x3ae   : > { %6186 = vmatmul.mubr.msk.f32.gmra.mxu1 %vm1499_vm0, %v1176_v28  ;;  %6207 = vmatprep.subr.msk.mxu0 %vm1499_vm0, %v8223_v55  ;;  %v10332_v28 = vld [vmem:[#allocation33_spill] sm:$0xff] }
 0x3af   : > { %6188 = vmatprep.mubr.msk.f32.mxu1 %vm1499_vm0, %v1177_v56  ;;  %6260 = vmatpush3.xpose.msk.msra.mxu1 %vm1499_vm0, %v8257_v26  ;;  %v8622_v26 = vpop.permute.xlu1 %1077 }
 0x3b0   : > { %6261 = vmatprep.subr.msk.mxu1 %vm1499_vm0, %v8237_v19 }
 0x3b1   : > { %6208 = vmatpush3.xpose.msk.msra.mxu0 %vm1499_vm0, %v8223_v55  ;;  %v8620_v55 = vpop.permute.xlu0 %1075 }
 0x3b2   : > { %6189 = vmatmul.mubr.msk.f32.gmra.mxu1 %vm1499_vm0, %v1178_v22  ;;  %6209 = vmatprep.subr.msk.mxu0 %vm1499_vm0, %v8203_v15  ;;  %v8693_v22 = vld [vmem:[#allocation5 + $0x30] sm:$0xff] }
 0x3b3   : > { %6262 = vmatpush3.xpose.msk.msra.mxu1 %vm1499_vm0, %v8237_v19  ;;  %6279 = vmatprep.mubr.msk.f32.mxu1 %vm1499_vm0, %v1195_v32  ;;  %v8636_v19 = vld [vmem:[#allocation5] sm:$0xff]  ;;  %v8640_v46 = vpop.permute.xlu1 %1125 }
 0x3b4   : > { %6263 = vmatprep.subr.msk.mxu1 %vm1499_vm0, %v8217_v1 }
 0x3b5   : > { %6210 = vmatpush3.xpose.msk.msra.mxu0 %vm1499_vm0, %v8203_v15  ;;  %v10325_v15 = vld [vmem:[#allocation26_spill] sm:$0xff]  ;;  %v8638_v62 = vpop.permute.xlu0 %1123 }
 0x3b6   : > { %6211 = vmatprep.subr.msk.mxu0 %vm1499_vm0, %v8180_v42 }
 0x3b7   : > { %6264 = vmatpush3.xpose.msk.msra.mxu1 %vm1499_vm0, %v8217_v1  ;;  %v8662_v18 = vpop.permute.xlu1 %1081 }
 0x3b8   : > { %6265 = vmatprep.subr.msk.mxu1 %vm1499_vm0, %v8197_v58 }
 0x3b9   : > { %6212 = vmatpush3.xpose.msk.msra.mxu0 %vm1499_vm0, %v8180_v42  ;;  %v10326_v42 = vld [vmem:[#allocation22_spill] sm:$0xff]  ;;  %v8660_v34 = vpop.permute.xlu0 %1079 }
 0x3ba   : > { %6213 = vmatprep.subr.msk.mxu0 %vm1499_vm0, %v8152_v51 }
 0x3bb   : > { %6266 = vmatpush3.xpose.msk.msra.mxu1 %vm1499_vm0, %v8197_v58 }
 0x3bc   : > { %6267 = vmatprep.subr.msk.mxu1 %vm1499_vm0, %v10325_v15 }
 0x3bd   : > { %v6113_v1 = vpop.f32.mrf.mxu0  ;;  %6214 = vmatpush3.xpose.msk.msra.mxu0 %vm1499_vm0, %v8152_v51  ;;  %v8695_v32 = vpop.permute.xlu0 %1127 }
 0x3be   : > { %6215 = vmatprep.subr.msk.mxu0 %vm1499_vm0, %v10326_v42  ;;  %v8679_v11 = vadd.f32 %v6113_v1, %v8664_v3 }
 0x3bf   : > { %v1646_v2 = vpop.f32.mrf.mxu0  ;;  %6268 = vmatpush3.xpose.msk.msra.mxu1 %vm1499_vm0, %v10325_v15  ;;  %v8697_v15 = vpop.permute.xlu1 %1129 }
 0x3c0   : > { %v8647_v58 = vadd.f32 %v1646_v2, %v8636_v19  ;;  %6269 = vmatprep.subr.msk.mxu1 %vm1499_vm0, %v10327_v25  ;;  %v8707_v2 = vld [vmem:[#allocation5 + $0x28] sm:$0xff] }
 0x3c1   : > { %v6116_v51 = vpop.f32.mrf.mxu0  ;;  %6216 = vmatpush3.xpose.msk.msra.mxu0 %vm1499_vm0, %v10326_v42 }
 0x3c2   : > { %2400 = vmax.xlane.f32.xlu0 %v8647_v58  ;;  %6217 = vmatprep.subr.msk.mxu0 %vm1499_vm0, %v10328_v44  ;;  %v8703_v1 = vadd.f32 %v6116_v51, %v8683_v49  ;;  %v8717_v51 = vld [vmem:[#allocation5 + $0x40] sm:$0xff] }
 0x3c3   : > { %v1656_v21 = vpop.f32.mrf.mxu0  ;;  %6270 = vmatpush3.xpose.msk.msra.mxu1 %vm1499_vm0, %v10327_v25 }
 0x3c4   : > { %v8667_v7 = vadd.f32 %v1656_v21, %v8653_v50  ;;  %6271 = vmatprep.subr.msk.mxu1 %vm1499_vm0, %v10329_v8  ;;  %v1180_v21 = vmul.f32 0.17677669, %v8391_v27  ;;  %v8734_v27 = vld [vmem:[#allocation5 + $0x38] sm:$0xff] }
 0x3c5   : > { %v6119_v31 = vpop.f32.mrf.mxu0  ;;  %6218 = vmatpush3.xpose.msk.msra.mxu0 %vm1499_vm0, %v10328_v44 }
 0x3c6   : > { %2404 = vmax.xlane.f32.xlu0 %v8667_v7  ;;  %6219 = vmatprep.subr.msk.mxu0 %vm1499_vm0, %v10330_v48 }
 0x3c7   : > { %v1666_v59 = vpop.f32.mrf.mxu0  ;;  %6272 = vmatpush3.xpose.msk.msra.mxu1 %vm1499_vm0, %v10329_v8  ;;  %v10334_v8 = vld [vmem:[#allocation31_spill] sm:$0xff] }
 0x3c8   : > { %v8686_v14 = vadd.f32 %v1666_v59, %v8673_v33  ;;  %6273 = vmatprep.subr.msk.mxu1 %vm1499_vm0, %v10332_v28  ;;  %v8724_v59 = vadd.f32 %v6119_v31, %v8707_v2  ;;  %v8738_v31 = vld [vmem:[#allocation5 + $0x50] sm:$0xff] }
 0x3c9   : > { %2402 = vmax.xlane.f32.xlu1 %v8679_v11  ;;  %v6122_v56 = vpop.f32.mrf.mxu0  ;;  %6220 = vmatpush3.xpose.msk.msra.mxu0 %vm1499_vm0, %v10330_v48  ;;  %v1181_v48 = vmul.f32 0.17677669, %v8426_v36 }
 0x3ca   : > { %10331 = vst [vmem:[#allocation26_spill] sm:$0xff] %v8686_v14  ;;  %2408 = vmax.xlane.f32.xlu0 %v8686_v14  ;;  %6221 = vmatprep.subr.msk.mxu0 %vm1499_vm0, %v8375_v40  ;;  %v1368_v14 = vpop.permute.xlu1 %1367 }
 0x3cb   : > { %v1676_v42 = vpop.f32.mrf.mxu0  ;;  %6274 = vmatpush3.xpose.msk.msra.mxu1 %vm1499_vm0, %v10332_v28 }
 0x3cc   : > { %v8710_v25 = vadd.f32 %v1676_v42, %v8693_v22  ;;  %6275 = vmatprep.subr.msk.mxu1 %vm1499_vm0, %v8366_v23  ;;  %v1370_v42 = vpop.permute.xlu0 %1369 }
 0x3cd   : > { %2406 = vmax.xlane.f32.xlu1 %v8703_v1  ;;  %v6125_v44 = vpop.f32.mrf.mxu0  ;;  %6222 = vmatpush3.xpose.msk.msra.mxu0 %vm1499_vm0, %v8375_v40 }
 0x3ce   : > { %10333 = vst [vmem:[#allocation22_spill] sm:$0xff] %v8710_v25  ;;  %2412 = vmax.xlane.f32.xlu0 %v8710_v25  ;;  %6303 = vmatprep.subr.mxu0 %v10334_v8  ;;  %v8748_v25 = vadd.f32 %v6122_v56, %v8734_v27  ;;  %v8762_v56 = vld [vmem:[#allocation5 + $0x48] sm:$0xff] }
 0x3cf   : > { %v1686_v28 = vpop.f32.mrf.mxu0  ;;  %6276 = vmatpush3.xpose.msk.msra.mxu1 %vm1499_vm0, %v8366_v23  ;;  %v1182_v23 = vmul.f32 0.17677669, %v8420_v52 }
 0x3d0   : > { %v8729_v40 = vadd.f32 %v1686_v28, %v8717_v51  ;;  %6224 = vmatmul.mubr.msk.f32.vlgmr.msra.gmra.mxu0 %vm1499_vm0, %v1180_v21  ;;  %6277 = vmatprep.subr.msk.mxu1 %vm1499_vm0, %v8398_v61  ;;  %v1183_v28 = vmul.f32 0.17677669, %v8458_v63  ;;  %v1197_v63 = vmul.f32 0.17677669, %v8442_v13  ;;  %v8775_v13 = vadd.f32 %v6125_v44, %v8762_v56  ;;  %v8789_v44 = vld [vmem:[#allocation5 + $0x58] sm:$0xff] }
 0x3d1   : > { %2410 = vmax.xlane.f32.xlu1 %v8724_v59  ;;  %v6128_v36 = vpop.f32.mrf.mxu0  ;;  %6226 = vmatprep.mubr.msk.f32.mxu0 %vm1499_vm0, %v1181_v48 }
 0x3d2   : > { %10335 = vst [vmem:[#allocation24_spill] sm:$0xff] %v8729_v40  ;;  %6304 = vmatpush3.msra.mxu0 %v10334_v8  ;;  %2416 = vmax.xlane.f32.xlu0 %v8729_v40  ;;  %v1196_v8 = vmul.f32 0.17677669, %v8410_v0  ;;  %v1364_v40 = vpop.permute.xlu1 %1363  ;;  %v1185_v0 = vmul.f32 0.17677669, %v8487_v16 }
 0x3d3   : > { %6305 = vmatprep.subr.mxu0 %v8301_v39  ;;  %v1696_v21 = vpop.f32.mrf.mxu0  ;;  %6278 = vmatpush3.xpose.msk.msra.mxu1 %vm1499_vm0, %v8398_v61  ;;  %v1366_v61 = vpop.permute.xlu0 %1365  ;;  %v1199_v16 = vmul.f32 0.17677669, %v8472_v9  ;;  %v1187_v9 = vmul.f32 0.17677669, %v8533_v41  ;;  %v8813_v41 = vld [vmem:[#allocation5 + $0x68] sm:$0xff] }
 0x3d4   : > { %v8751_v48 = vadd.f32 %v1696_v21, %v8738_v31  ;;  %6306 = vmatpush3.msra.mxu0 %v8301_v39  ;;  %6359 = vmatprep.subr.mxu1 %v1370_v42  ;;  %v1184_v21 = vmul.f32 0.17677669, %v8444_v30 }
 0x3d5   : > { %6227 = vmatmul.mubr.msk.f32.gmra.mxu0 %vm1499_vm0, %v1182_v23  ;;  %6307 = vmatprep.subr.mxu0 %v8255_v24  ;;  %v8756_v52 = vpop.f32.mrf.mxu0  ;;  %v8766_v23 = vld [vmem:[#allocation5 + $0x60] sm:$0xff] }
 0x3d6   : > { %2414 = vmax.xlane.f32.xlu1 %v8748_v25  ;;  %6229 = vmatprep.mubr.msk.f32.mxu0 %vm1499_vm0, %v1183_v28  ;;  %v10336_v28 = vld [vmem:[#allocation30_spill] sm:$0xff] }
 0x3d7   : > { %6308 = vmatpush3.msra.mxu0 %v8255_v24  ;;  %2420 = vmax.xlane.f32.xlu0 %v8751_v48  ;;  %v1706_v39 = vpop.f32.mrf.mxu0 }
 0x3d8   : > { %6280 = vmatmul.mubr.msk.f32.vlgmr.msra.gmra.mxu1 %vm1499_vm0, %v1196_v8  ;;  %6309 = vmatprep.subr.mxu0 %v8265_v35  ;;  %v8778_v24 = vadd.f32 %v1706_v39, %v8766_v23  ;;  %v1198_v8 = vmul.f32 0.17677669, %v8432_v54  ;;  %v8793_v39 = vld [vmem:[#allocation5 + $0x70] sm:$0xff]  ;;  %v1186_v54 = vmul.f32 0.17677669, %v8464_v38 }
 0x3d9   : > { %6282 = vmatprep.mubr.msk.f32.mxu1 %vm1499_vm0, %v1197_v63  ;;  %6310 = vmatpush3.msra.mxu0 %v8265_v35  ;;  %v8781_v30 = vpop.f32.mrf.mxu0  ;;  %v1362_v63 = vpop.permute.xlu0 %1361 }
 0x3da   : > { %6360 = vmatpush3.msra.mxu1 %v1370_v42  ;;  %6230 = vmatmul.mubr.msk.f32.gmra.mxu0 %vm1499_vm0, %v1184_v21  ;;  %v1360_v35 = vpop.permute.xlu1 %1359 }
 0x3db   : > { %6311 = vmatprep.subr.mxu0 %v10336_v28  ;;  %6361 = vmatprep.subr.mxu1 %v1368_v14  ;;  %v1716_v42 = vpop.f32.mrf.mxu0 }
 0x3dc   : > { %2418 = vmax.xlane.f32.xlu1 %v8775_v13  ;;  %6232 = vmatprep.mubr.msk.f32.mxu0 %vm1499_vm0, %v1185_v0  ;;  %v8804_v21 = vadd.f32 %v1716_v42, %v8793_v39  ;;  %v1189_v42 = vmul.f32 0.17677669, %v8581_v47  ;;  %v1203_v47 = vmul.f32 0.17677669, %v8558_v6  ;;  %v1204_v6 = vmul.f32 0.17677669, %v8560_v5 }
 0x3dd   : > { %6312 = vmatpush3.msra.mxu0 %v10336_v28  ;;  %6362 = vmatpush3.msra.mxu1 %v1368_v14  ;;  %v8801_v14 = vadd.f32 %v6128_v36, %v8789_v44  ;;  %v1358_v0 = vpop.permute.xlu0 %1357  ;;  %v10337_v28 = vld [vmem:[#allocation28_spill] sm:$0xff]  ;;  %v1188_v36 = vmul.f32 0.17677669, %v8535_v43  ;;  %v1202_v43 = vmul.f32 0.17677669, %v8510_v20 }
 0x3de   : > { %2424 = vmax.xlane.f32.xlu0 %v8778_v24  ;;  %6283 = vmatmul.mubr.msk.f32.gmra.mxu1 %vm1499_vm0, %v1198_v8  ;;  %v1356_v38 = vpop.permute.xlu1 %1355  ;;  %v10338_v8 = vld [vmem:[#allocation35_spill] sm:$0xff]  ;;  %v1193_v5 = vmul.f32 0.17677669, %v8660_v34 }
 0x3df   : > { %6313 = vmatprep.subr.mxu0 %v8245_v4  ;;  %6363 = vmatprep.subr.mxu1 %v1366_v61 }
 0x3e0   : > { %6285 = vmatprep.mubr.msk.f32.mxu1 %vm1499_vm0, %v1199_v16  ;;  %6314 = vmatpush3.msra.mxu0 %v8245_v4  ;;  %v1200_v16 = vmul.f32 0.17677669, %v10338_v8  ;;  %v1201_v4 = vmul.f32 0.17677669, %v8508_v17  ;;  %v8824_v17 = vadd.f32 %v8756_v52, %v8813_v41  ;;  %v10340_v52 = vld [vmem:[#allocation27_spill] sm:$0xff] }
 0x3e1   : > { %6364 = vmatpush3.msra.mxu1 %v1366_v61  ;;  %6233 = vmatmul.mubr.msk.f32.gmra.mxu0 %vm1499_vm0, %v1186_v54  ;;  %v10339_v61 = vld [vmem:[#allocation29_spill] sm:$0xff] }
 0x3e2   : > { %6315 = vmatprep.subr.mxu0 %v10337_v28  ;;  %6365 = vmatprep.subr.mxu1 %v1364_v40  ;;  %v1352_v54 = vpop.permute.xlu1 %1351 }
 0x3e3   : > { %2422 = vmax.xlane.f32.xlu1 %v8801_v14  ;;  %6235 = vmatprep.mubr.msk.f32.mxu0 %vm1499_vm0, %v1187_v9  ;;  %v8832_v9 = vld [vmem:[#allocation5 + $0x78] sm:$0xff] }
 0x3e4   : > { %6316 = vmatpush3.msra.mxu0 %v10337_v28  ;;  %6366 = vmatpush3.msra.mxu1 %v1364_v40  ;;  %v1354_v40 = vpop.permute.xlu0 %1353  ;;  %v8841_v8 = vadd.f32 %v8781_v30, %v8832_v9 }
 0x3e5   : > { %2428 = vmax.xlane.f32.xlu0 %v8804_v21  ;;  %6286 = vmatmul.mubr.msk.f32.gmra.mxu1 %vm1499_vm0, %v1200_v16 }
 0x3e6   : > { %6317 = vmatprep.subr.mxu0 %v10339_v61  ;;  %6367 = vmatprep.subr.mxu1 %v1362_v63  ;;  %v1348_v28 = vpop.permute.xlu1 %1347 }
 0x3e7   : > { %6288 = vmatprep.mubr.msk.f32.mxu1 %vm1499_vm0, %v1201_v4  ;;  %6318 = vmatpush3.msra.mxu0 %v10339_v61 }
 0x3e8   : > { %6368 = vmatpush3.msra.mxu1 %v1362_v63  ;;  %6236 = vmatmul.mubr.msk.f32.gmra.mxu0 %vm1499_vm0, %v1188_v36  ;;  %v1190_v63 = vmul.f32 0.17677669, %v8583_v60  ;;  %v1350_v20 = vpop.permute.xlu0 %1349  ;;  %v1205_v60 = vmul.f32 0.17677669, %v8602_v12  ;;  %v1207_v12 = vmul.f32 0.17677669, %v8638_v62 }
 0x3e9   : > { %6319 = vmatprep.subr.mxu0 %v8195_v53  ;;  %6369 = vmatprep.subr.mxu1 %v1360_v35  ;;  %v1209_v62 = vmul.f32 0.17677669, %v8695_v32 }
 0x3ea   : > { %2426 = vmax.xlane.f32.xlu1 %v8824_v17  ;;  %6238 = vmatprep.mubr.msk.f32.mxu0 %vm1499_vm0, %v1189_v42 }
 0x3eb   : > { %6320 = vmatpush3.msra.mxu0 %v8195_v53  ;;  %6370 = vmatpush3.msra.mxu1 %v1360_v35  ;;  %v1191_v53 = vmul.f32 0.17677669, %v8620_v55  ;;  %v1192_v55 = vmul.f32 0.17677669, %v8622_v26  ;;  %v1344_v35 = vpop.permute.xlu1 %1343 }
 0x3ec   : > { %6289 = vmatmul.mubr.msk.f32.gmra.mxu1 %vm1499_vm0, %v1202_v43  ;;  %6321 = vmatprep.subr.mxu0 %v10340_v52  ;;  %v1346_v30 = vpop.permute.xlu0 %1345 }
 0x3ed   : > { %6371 = vmatprep.subr.mxu1 %v1358_v0  ;;  %6291 = vmatprep.mubr.msk.f32.mxu1 %vm1499_vm0, %v1203_v47 }
 0x3ee   : > { %6322 = vmatpush3.msra.mxu0 %v10340_v52  ;;  %6372 = vmatpush3.msra.mxu1 %v1358_v0 }
 0x3ef   : > { %6239 = vmatmul.mubr.msk.f32.gmra.mxu0 %vm1499_vm0, %v1190_v63  ;;  %6323 = vmatprep.subr.mxu0 %v8168_v37  ;;  %v1340_v34 = vpop.permute.xlu1 %1339 }
 0x3f0   : > { %6373 = vmatprep.subr.mxu1 %v1356_v38  ;;  %2430 = vmax.xlane.f32.xlu1 %v8841_v8  ;;  %v1342_v26 = vpop.permute.xlu0 %1341 }
 0x3f1   : > { %6241 = vmatprep.mubr.msk.f32.mxu0 %vm1499_vm0, %v1191_v53  ;;  %6324 = vmatpush3.msra.mxu0 %v8168_v37  ;;  %v1206_v37 = vmul.f32 0.17677669, %v8604_v10  ;;  %v10341_v10 = vld [vmem:[#allocation20_spill] sm:$0xff] }
 0x3f2   : > { %6374 = vmatpush3.msra.mxu1 %v1356_v38  ;;  %6325 = vmatprep.subr.mxu0 %v8182_v45 }
 0x3f3   : > { %6292 = vmatmul.mubr.msk.f32.gmra.mxu1 %vm1499_vm0, %v1204_v6  ;;  %6375 = vmatprep.subr.mxu1 %v1354_v40  ;;  %v8879_v38 = vpop.permute.xlu1 %1417 }
 0x3f4   : > { %6294 = vmatprep.mubr.msk.f32.mxu1 %vm1499_vm0, %v1205_v60  ;;  %6326 = vmatpush3.msra.mxu0 %v8182_v45  ;;  %v1194_v45 = vmul.f32 0.17677669, %v8662_v18  ;;  %v10342_v18 = vld [vmem:[#allocation23_spill] sm:$0xff]  ;;  %v8877_v0 = vpop.permute.xlu0 %1415  ;;  %10344 = vst [vmem:[#allocation21_spill] sm:$0xff] %v8879_v38 }
 0x3f5   : > { %6376 = vmatpush3.msra.mxu1 %v1354_v40  ;;  %6242 = vmatmul.mubr.msk.f32.gmra.mxu0 %vm1499_vm0, %v1192_v55  ;;  %10343 = vst [vmem:[#allocation32_spill] sm:$0xff] %v8877_v0 }
 0x3f6   : > { %6327 = vmatprep.subr.mxu0 %v8140_v29  ;;  %6377 = vmatprep.subr.mxu1 %v1352_v54 }
 0x3f7   : > { %6244 = vmatprep.mubr.msk.f32.mxu0 %vm1499_vm0, %v1193_v5  ;;  %6328 = vmatpush3.msra.mxu0 %v8140_v29  ;;  %v1208_v29 = vmul.f32 0.17677669, %v8640_v46  ;;  %v1210_v46 = vmul.f32 0.17677669, %v8697_v15  ;;  %v8888_v4 = vpop.permute.xlu1 %1413 }
 0x3f8   : > { %6378 = vmatpush3.msra.mxu1 %v1352_v54  ;;  %6329 = vmatprep.subr.mxu0 %v8154_v57  ;;  %v8885_v32 = vpop.permute.xlu0 %1465  ;;  %10346 = vst [vmem:[#allocation33_spill] sm:$0xff] %v8888_v4 }
 0x3f9   : > { %6295 = vmatmul.mubr.msk.f32.gmra.mxu1 %vm1499_vm0, %v1206_v37  ;;  %6379 = vmatprep.subr.mxu1 %v1350_v20  ;;  %10345 = vst [vmem:[#allocation34_spill] sm:$0xff] %v8885_v32 }
 0x3fa   : > { %6297 = vmatprep.mubr.msk.f32.mxu1 %vm1499_vm0, %v1207_v12  ;;  %6330 = vmatpush3.msra.mxu0 %v8154_v57 }
 0x3fb   : > { %6380 = vmatpush3.msra.mxu1 %v1350_v20  ;;  %6245 = vmatmul.mubr.msk.f32.gmra.mxu0 %vm1499_vm0, %v1194_v45  ;;  %v8897_v42 = vpop.permute.xlu1 %1463 }
 0x3fc   : > { %6331 = vmatprep.subr.mxu0 %v10341_v10  ;;  %6381 = vmatprep.subr.mxu1 %v1348_v28  ;;  %10347 = vst [vmem:[#allocation31_spill] sm:$0xff] %v8897_v42  ;;  %v8906_v47 = vpop.permute.xlu0 %1411 }
 0x3fd   : > { %6332 = vmatpush3.msra.mxu0 %v10341_v10  ;;  %6382 = vmatpush3.msra.mxu1 %v1348_v28  ;;  %10351 = vst [vmem:[#allocation29_spill] sm:$0xff] %v8906_v47 }
 0x3fe   : > { %6298 = vmatmul.mubr.msk.f32.gmra.mxu1 %vm1499_vm0, %v1208_v29  ;;  %6333 = vmatprep.subr.mxu0 %v10342_v18 }
 0x3ff   : > { %6383 = vmatprep.subr.mxu1 %v1346_v30  ;;  %6300 = vmatprep.mubr.msk.f32.mxu1 %vm1499_vm0, %v1209_v62  ;;  %v8900_v40 = vpop.permute.xlu1 %1459 }
 0x400   : > { %6334 = vmatpush3.msra.mxu0 %v10342_v18  ;;  %6384 = vmatpush3.msra.mxu1 %v1346_v30  ;;  %10348 = vst [vmem:[#allocation30_spill] sm:$0xff] %v8900_v40  ;;  %v8910_v63 = vpop.permute.xlu0 %1461 }
 0x401   : > { %6385 = vmatprep.subr.mxu1 %v1344_v35  ;;  %6415 = vmatprep.subr.mxu0 %v8879_v38  ;;  %10353 = vst [vmem:[#allocation36_spill] sm:$0xff] %v8910_v63 }
 0x402   : > { %6386 = vmatpush3.msra.mxu1 %v1344_v35 }
 0x403   : > { %6301 = vmatmul.mubr.msk.f32.gmra.mxu1 %vm1499_vm0, %v1210_v46  ;;  %6387 = vmatprep.subr.mxu1 %v1342_v26  ;;  %v8902_v54 = vpop.permute.xlu1 %1405 }
 0x404   : > { %6388 = vmatpush3.msra.mxu1 %v1342_v26  ;;  %10349 = vst [vmem:[#allocation28_spill] sm:$0xff] %v8902_v54  ;;  %v8914_v28 = vpop.permute.xlu0 %1409 }
 0x405   : > { %6389 = vmatprep.subr.mxu1 %v1340_v34  ;;  %10355 = vst [vmem:[#allocation38_spill] sm:$0xff] %v8914_v28 }
 0x406   : > { %6390 = vmatpush3.msra.mxu1 %v1340_v34 }
 0x407   : > { %6471 = vmatprep.subr.mxu1 %v8885_v32  ;;  %v8904_v43 = vpop.permute.xlu1 %1455 }
 0x408   : > { %10350 = vst [vmem:[#allocation35_spill] sm:$0xff] %v8904_v43  ;;  %v8918_v6 = vpop.permute.xlu0 %1407 }
 0x409   : > { %10357 = vst [vmem:[#allocation40_spill] sm:$0xff] %v8918_v6 }
 0x40b   : > { %v8908_v52 = vpop.permute.xlu1 %1453 }
 0x40c   : > { %10352 = vst [vmem:[#allocation27_spill] sm:$0xff] %v8908_v52  ;;  %v8922_v55 = vpop.permute.xlu0 %1457 }
 0x40d   : > { %10359 = vst [vmem:[#allocation42_spill] sm:$0xff] %v8922_v55 }
 0x40f   : > { %v8912_v20 = vpop.permute.xlu1 %1401 }
 0x410   : > { %10354 = vst [vmem:[#allocation37_spill] sm:$0xff] %v8912_v20  ;;  %v8929_v45 = vpop.permute.xlu0 %1403 }
 0x411   : > { %10361 = vst [vmem:[#allocation44_spill] sm:$0xff] %v8929_v45 }
 0x413   : > { %v8916_v53 = vpop.permute.xlu1 %1451 }
 0x414   : > { %10356 = vst [vmem:[#allocation39_spill] sm:$0xff] %v8916_v53 }
 0x417   : > { %v8920_v60 = vpop.permute.xlu1 %1399 }
 0x418   : > { %10358 = vst [vmem:[#allocation41_spill] sm:$0xff] %v8920_v60 }
 0x41b   : > { %v8924_v30 = vpop.permute.xlu1 %1449 }
 0x41c   : > { %10360 = vst [vmem:[#allocation43_spill] sm:$0xff] %v8924_v30  ;;  %v8945_v30 = vpop.permute.xlu0 %1397 }
 0x41d   : > { %10363 = vst [vmem:[#allocation46_spill] sm:$0xff] %v8945_v30 }
 0x41f   : > { %v8931_v26 = vpop.permute.xlu1 %1395 }
 0x420   : > { %10362 = vst [vmem:[#allocation45_spill] sm:$0xff] %v8931_v26  ;;  %v8961_v40 = vpop.permute.xlu0 %1447 }
 0x421   : > { %10365 = vst [vmem:[#allocation48_spill] sm:$0xff] %v8961_v40 }
 0x424   : > { %v8977_v32 = vpop.permute.xlu0 %1443 }
 0x425   : > { %10367 = vst [vmem:[#allocation50_spill] sm:$0xff] %v8977_v32 }
 0x44b   : > { %v2401_v26 = vpop.xlane.xlu0 %2400 }
 0x44f   : > { %v2405_v45 = vpop.xlane.xlu0 %2404 }
 0x453   : > { %v2409_v57 = vpop.xlane.xlu0 %2408 }
 0x456   : > { %v6169_v16 = vpop.f32.mrf.mxu1 }
 0x457   : > { %v8891_v36 = vadd.f32 %v6169_v16, %v8664_v3  ;;  %v2413_v0 = vpop.xlane.xlu0 %2412 }
 0x458   : > { %v1871_v15 = vpop.f32.mrf.mxu1 }
 0x459   : > { %2434 = vmax.xlane.f32.xlu0 %v8891_v36  ;;  %v8895_v61 = vadd.f32 %v1871_v15, %v8636_v19 }
 0x45a   : > { %v6172_v35 = vpop.f32.mrf.mxu1 }
 0x45b   : > { %v8938_v62 = vadd.f32 %v6172_v35, %v8683_v49 }
 0x45c   : > { %v1881_v29 = vpop.f32.mrf.mxu1 }
 0x45d   : > { %2432 = vmax.xlane.f32.xlu0 %v8895_v61  ;;  %v8942_v16 = vadd.f32 %v1881_v29, %v8653_v50 }
 0x490   : > { %v6225_v5 = vpop.f32.mrf.mxu0 }
 0x491   : > { %v8927_v37 = vadd.f32 %v6225_v5, %v8664_v3  ;;  %v6175_v5 = vpop.f32.mrf.mxu1 }
 0x492   : > { %v2096_v12 = vpop.f32.mrf.mxu0  ;;  %v8958_v43 = vadd.f32 %v6175_v5, %v8707_v2 }
 0x493   : > { %v8934_v34 = vadd.f32 %v2096_v12, %v8636_v19  ;;  %2466 = vmax.xlane.f32.xlu1 %v8927_v37  ;;  %v8947_v12 = vpop.permute.xlu1 %1445  ;;  %v1891_v29 = vpop.f32.mrf.mxu1 }
 0x494   : > { %10364 = vst [vmem:[#allocation47_spill] sm:$0xff] %v8947_v12 }
 0x495   : > { %v6228_v46 = vpop.f32.mrf.mxu0  ;;  %2464 = vmax.xlane.f32.xlu0 %v8934_v34 }
 0x496   : > { %v8950_v53 = vadd.f32 %v6228_v46, %v8683_v49  ;;  %v8966_v46 = vadd.f32 %v1891_v29, %v8673_v33 }
 0x497   : > { %v2106_v15 = vpop.f32.mrf.mxu0  ;;  %2438 = vmax.xlane.f32.xlu1 %v8938_v62  ;;  %v8963_v12 = vpop.permute.xlu1 %1393 }
 0x498   : > { %v8954_v52 = vadd.f32 %v2106_v15, %v8653_v50  ;;  %10366 = vst [vmem:[#allocation49_spill] sm:$0xff] %v8963_v12  ;;  %v6178_v15 = vpop.f32.mrf.mxu1 }
 0x499   : > { %2436 = vmax.xlane.f32.xlu0 %v8942_v16  ;;  %v8982_v29 = vadd.f32 %v6178_v15, %v8734_v27 }
 0x49a   : > { %v6231_v35 = vpop.f32.mrf.mxu0  ;;  %v1901_v40 = vpop.f32.mrf.mxu1 }
 0x49b   : > { %2470 = vmax.xlane.f32.xlu1 %v8950_v53  ;;  %v8970_v63 = vadd.f32 %v6231_v35, %v8707_v2  ;;  %v8979_v18 = vpop.permute.xlu1 %1391  ;;  %v8986_v12 = vadd.f32 %v1901_v40, %v8693_v22 }
 0x49c   : > { %v2116_v55 = vpop.f32.mrf.mxu0  ;;  %10368 = vst [vmem:[#allocation51_spill] sm:$0xff] %v8979_v18 }
 0x49d   : > { %2468 = vmax.xlane.f32.xlu0 %v8954_v52  ;;  %v8974_v42 = vadd.f32 %v2116_v55, %v8673_v33  ;;  %v6181_v55 = vpop.f32.mrf.mxu1 }
 0x49e   : > { %v9000_v40 = vadd.f32 %v6181_v55, %v8762_v56 }
 0x49f   : > { %2442 = vmax.xlane.f32.xlu1 %v8958_v43  ;;  %v8993_v18 = vpop.permute.xlu1 %1441  ;;  %v1911_v60 = vpop.f32.mrf.mxu1 }
 0x4a0   : > { %10370 = vst [vmem:[#allocation53_spill] sm:$0xff] %v8993_v18  ;;  %v9004_v54 = vadd.f32 %v1911_v60, %v8717_v51 }
 0x4a1   : > { %2440 = vmax.xlane.f32.xlu0 %v8966_v46  ;;  %v6234_v5 = vpop.f32.mrf.mxu0  ;;  %v6184_v18 = vpop.f32.mrf.mxu1 }
 0x4a2   : > { %v8990_v30 = vadd.f32 %v6234_v5, %v8734_v27  ;;  %v9016_v60 = vadd.f32 %v6184_v18, %v8789_v44 }
 0x4a3   : > { %2474 = vmax.xlane.f32.xlu1 %v8970_v63  ;;  %v2126_v35 = vpop.f32.mrf.mxu0  ;;  %v2403_v5 = vpop.xlane.xlu1 %2402 }
 0x4a4   : > { %10369 = vst [vmem:[#allocation52_spill] sm:$0xff] %v8990_v30  ;;  %v8996_v15 = vadd.f32 %v2126_v35, %v8693_v22  ;;  %v1921_v6 = vpop.f32.mrf.mxu1  ;;  %10374 = vst [vmem:[#allocation57_spill] sm:$0xff] %v9016_v60 }
 0x4a5   : > { %2472 = vmax.xlane.f32.xlu0 %v8974_v42 }
 0x4a6   : > { %10371 = vst [vmem:[#allocation54_spill] sm:$0xff] %v8996_v15  ;;  %v6187_v10 = vpop.f32.mrf.mxu1 }
 0x4a7   : > { %2446 = vmax.xlane.f32.xlu1 %v8982_v29  ;;  %v2407_v28 = vpop.xlane.xlu1 %2406 }
 0x4a8   : > { %v6237_v32 = vpop.f32.mrf.mxu0  ;;  %v2531_v18 = vsub.f32 %v8703_v1, %v2407_v28 }
 0x4a9   : > { %2444 = vmax.xlane.f32.xlu0 %v8986_v12  ;;  %v9008_v35 = vadd.f32 %v6237_v32, %v8762_v56  ;;  %v9020_v32 = vadd.f32 %v1921_v6, %v8738_v31  ;;  %v1931_v6 = vpop.f32.mrf.mxu1 }
 0x4aa   : > { %v2136_v20 = vpop.f32.mrf.mxu0  ;;  %v9040_v28 = vadd.f32 %v1931_v6, %v8766_v23 }
 0x4ab   : > { %2478 = vmax.xlane.f32.xlu1 %v8990_v30  ;;  %10372 = vst [vmem:[#allocation55_spill] sm:$0xff] %v9008_v35  ;;  %v9012_v55 = vadd.f32 %v2136_v20, %v8717_v51  ;;  %v2529_v20 = vsub.f32 %v8679_v11, %v2403_v5  ;;  %v2411_v38 = vpop.xlane.xlu1 %2410  ;;  %v9035_v11 = vadd.f32 %v6187_v10, %v8813_v41  ;;  %v2598_v5 = vmul.f32 1.442695, %v2531_v18 }
 0x4ac   : > { %v2533_v1 = vsub.f32 %v8724_v59, %v2411_v38  ;;  %10377 = vst [vmem:[#allocation60_spill] sm:$0xff] %v9040_v28  ;;  %v10379_v59 = vld [vmem:[#allocation22_spill] sm:$0xff] }
 0x4ad   : > { %2476 = vmax.xlane.f32.xlu0 %v8996_v15  ;;  %10373 = vst [vmem:[#allocation56_spill] sm:$0xff] %v9012_v55  ;;  %v2528_v15 = vsub.f32 %v8647_v58, %v2401_v26  ;;  %v2417_v58 = vpop.xlane.xlu0 %2416  ;;  %v2534_v38 = vsub.f32 %v10379_v59, %v2413_v0  ;;  %v10382_v0 = vld [vmem:[#allocation24_spill] sm:$0xff] }
 0x4ae   : > { %v2602_v6 = vmul.f32 1.442695, %v2533_v1  ;;  %v2536_v1 = vsub.f32 %v10382_v0, %v2417_v58 }
 0x4af   : > { %2450 = vmax.xlane.f32.xlu1 %v9000_v40  ;;  %v6240_v30 = vpop.f32.mrf.mxu0  ;;  %v2415_v26 = vpop.xlane.xlu1 %2414 }
 0x4b0   : > { %v9025_v4 = vadd.f32 %v6240_v30, %v8789_v44  ;;  %v2608_v58 = vmul.f32 1.442695, %v2536_v1 }
 0x4b1   : > { %2448 = vmax.xlane.f32.xlu0 %v9004_v54  ;;  %v2146_v47 = vpop.f32.mrf.mxu0  ;;  %v2421_v59 = vpop.xlane.xlu0 %2420 }
 0x4b2   : > { %10375 = vst [vmem:[#allocation58_spill] sm:$0xff] %v9025_v4 }
 0x4b3   : > { %2482 = vmax.xlane.f32.xlu1 %v9008_v35 }
 0x4b5   : > { %2480 = vmax.xlane.f32.xlu0 %v9012_v55  ;;  %v6243_v35 = vpop.f32.mrf.mxu0  ;;  %v9030_v55 = vadd.f32 %v2146_v47, %v8738_v31  ;;  %v2592_v47 = vmul.f32 1.442695, %v2528_v15 }
 0x4b6   : > { %v9045_v10 = vadd.f32 %v6243_v35, %v8813_v41 }
 0x4b7   : > { %2454 = vmax.xlane.f32.xlu1 %v9016_v60  ;;  %10376 = vst [vmem:[#allocation59_spill] sm:$0xff] %v9030_v55  ;;  %v2594_v60 = vmul.f32 1.442695, %v2529_v20  ;;  %v2156_v30 = vpop.f32.mrf.mxu0  ;;  %v6190_v20 = vpop.f32.mrf.mxu1 }
 0x4b8   : > { %10378 = vst [vmem:[#allocation61_spill] sm:$0xff] %v9045_v10  ;;  %v9055_v35 = vadd.f32 %v6190_v20, %v8832_v9  ;;  %v2535_v20 = vsub.f32 %v8748_v25, %v2415_v26 }
 0x4b9   : > { %2452 = vmax.xlane.f32.xlu0 %v9020_v32  ;;  %6796 = vpow2.f32 %v2594_v60  ;;  %v1941_v60 = vpop.f32.mrf.mxu1 }
 0x4ba   : > { %6798 = vpow2.f32 %v2598_v5  ;;  %v2604_v5 = vmul.f32 1.442695, %v2534_v38  ;;  %v2538_v38 = vsub.f32 %v8751_v48, %v2421_v59 }
 0x4bb   : > { %2486 = vmax.xlane.f32.xlu1 %v9025_v4  ;;  %v2530_v4 = vsub.f32 %v8667_v7, %v2405_v45  ;;  %v6246_v18 = vpop.f32.mrf.mxu0  ;;  %6800 = vpow2.f32 %v2592_v47  ;;  %v10381_v45 = vld [vmem:[#allocation26_spill] sm:$0xff]  ;;  %v9063_v47 = vpop.f32.mrf.mxu1 }
 0x4bc   : > { %v2532_v15 = vsub.f32 %v10381_v45, %v2409_v57  ;;  %6802 = vpow2.f32 %v2602_v6  ;;  %v2612_v26 = vmul.f32 1.442695, %v2538_v38 }
 0x4bd   : > { %2484 = vmax.xlane.f32.xlu0 %v9030_v55  ;;  %v9050_v55 = vadd.f32 %v2156_v30, %v8766_v23  ;;  %v2596_v7 = vmul.f32 1.442695, %v2530_v4  ;;  %v9060_v30 = vadd.f32 %v6246_v18, %v8832_v9  ;;  %v2419_v4 = vpop.xlane.xlu1 %2418  ;;  %v9072_v18 = vadd.f32 %v1941_v60, %v8793_v39  ;;  %v2321_v6 = vpop.f32.mrf.mxu1 }
 0x4be   : > { %v2600_v57 = vmul.f32 1.442695, %v2532_v15  ;;  %v2537_v15 = vsub.f32 %v8775_v13, %v2419_v4  ;;  %v2425_v60 = vpop.xlane.xlu0 %2424 }
 0x4bf   : > { %2458 = vmax.xlane.f32.xlu1 %v9035_v11  ;;  %10380 = vst [vmem:[#allocation22_spill] sm:$0xff] %v9050_v55  ;;  %10383 = vst [vmem:[#allocation26_spill] sm:$0xff] %v9060_v30  ;;  %6804 = vpow2.f32 %v2596_v7  ;;  %v2606_v7 = vmul.f32 1.442695, %v2535_v20  ;;  %v2540_v59 = vsub.f32 %v8778_v24, %v2425_v60 }
 0x4c0   : > { %6806 = vpow2.f32 %v2604_v5  ;;  %v9082_v5 = vpop.f32.mrf.mxu1  ;;  %v2610_v0 = vmul.f32 1.442695, %v2537_v15 }
 0x4c1   : > { %2456 = vmax.xlane.f32.xlu0 %v9040_v28  ;;  %v2166_v28 = vpop.f32.mrf.mxu0  ;;  %6808 = vpow2.f32 %v2600_v57 }
 0x4c2   : > { %v9067_v45 = vadd.f32 %v2166_v28, %v8793_v39  ;;  %v2423_v28 = vpop.xlane.xlu1 %2422  ;;  %6810 = vpow2.f32 %v2608_v58  ;;  %v2331_v57 = vpop.f32.mrf.mxu1 }
 0x4c3   : > { %2490 = vmax.xlane.f32.xlu1 %v9045_v10  ;;  %6812 = vpow2.f32 %v2606_v7  ;;  %v2539_v1 = vsub.f32 %v8801_v14, %v2423_v28  ;;  %v2616_v14 = vmul.f32 1.442695, %v2540_v59  ;;  %v2429_v15 = vpop.xlane.xlu0 %2428 }
 0x4c4   : > { %10384 = vst [vmem:[#allocation24_spill] sm:$0xff] %v9067_v45  ;;  %6814 = vpow2.f32 %v2612_v26  ;;  %v6287_v28 = vpop.f32.mrf.mxu1  ;;  %v2542_v60 = vsub.f32 %v8804_v21, %v2429_v15  ;;  %v9117_v15 = vadd.f32 %v2321_v6, %v8636_v19  ;;  %v9132_v19 = vadd.f32 %v2331_v57, %v8653_v50 }
 0x4c5   : > { %2488 = vmax.xlane.f32.xlu0 %v9050_v55  ;;  %6816 = vpow2.f32 %v2610_v0  ;;  %v2614_v20 = vmul.f32 1.442695, %v2539_v1 }
 0x4c6   : > { %v9077_v25 = vpop.eup %6796  ;;  %v2427_v38 = vpop.xlane.xlu1 %2426  ;;  %10385 = vst [vmem:[#allocation62_spill] sm:$0xff] %v9117_v15  ;;  %10386 = vst [vmem:[#allocation63_spill] sm:$0xff] %v9132_v19 }
 0x4c7   : > { %2462 = vmax.xlane.f32.xlu1 %v9055_v35  ;;  %v9080_v48 = vpop.eup %6798  ;;  %6818 = vpow2.f32 %v2614_v20  ;;  %v2541_v24 = vsub.f32 %v8824_v17, %v2427_v38  ;;  %v2341_v1 = vpop.f32.mrf.mxu1 }
 0x4c8   : > { %v9086_v13 = vpop.eup %6800  ;;  %6820 = vpow2.f32 %v2616_v14  ;;  %v9147_v50 = vadd.f32 %v2341_v1, %v8673_v33 }
 0x4c9   : > { %2494 = vmax.xlane.f32.xlu0 %v9060_v30  ;;  %v9090_v4 = vpop.eup %6802  ;;  %v2618_v59 = vmul.f32 1.442695, %v2541_v24  ;;  %v2620_v30 = vmul.f32 1.442695, %v2542_v60  ;;  %v6290_v38 = vpop.f32.mrf.mxu1 }
 0x4ca   : > { %v2431_v20 = vpop.xlane.xlu1 %2430 }
 0x4cb   : > { %2492 = vmax.xlane.f32.xlu1 %v9067_v45  ;;  %6822 = vpow2.f32 %v2618_v59  ;;  %v2543_v21 = vsub.f32 %v8841_v8, %v2431_v20  ;;  %v2351_v24 = vpop.f32.mrf.mxu1 }
 0x4cc   : > { %v9093_v58 = vpop.eup %6804  ;;  %6824 = vpow2.f32 %v2620_v30  ;;  %v9128_v30 = vadd.f32 %v9063_v47, %v8664_v3  ;;  %v9143_v3 = vadd.f32 %v9082_v5, %v8683_v49  ;;  %v9159_v5 = vadd.f32 %v6287_v28, %v8707_v2 }
 0x4cd   : > { %2460 = vmax.xlane.f32.xlu0 %v9072_v18  ;;  %v9096_v7 = vpop.eup %6806  ;;  %v2622_v60 = vmul.f32 1.442695, %v2543_v21  ;;  %v6293_v8 = vpop.f32.mrf.mxu1 }
 0x4ce   : > { %v9100_v26 = vpop.eup %6808 }
 0x4cf   : > { %2722 = vadd.xlane.f32.xlu1 %v9077_v25  ;;  %v9104_v0 = vpop.eup %6810  ;;  %6826 = vpow2.f32 %v2622_v60  ;;  %v2361_v6 = vpop.f32.mrf.mxu1 }
 0x4d0   : > { %v9107_v45 = vpop.eup %6812  ;;  %v9163_v33 = vadd.f32 %v2361_v6, %v8717_v51  ;;  %v9176_v51 = vadd.f32 %v6293_v8, %v8762_v56 }
 0x4d1   : > { %2726 = vadd.xlane.f32.xlu0 %v9080_v48  ;;  %v9110_v17 = vpop.eup %6814  ;;  %v6296_v10 = vpop.f32.mrf.mxu1 }
 0x4d2   : > { %v9114_v14 = vpop.eup %6816 }
 0x4d3   : > { %2720 = vadd.xlane.f32.xlu1 %v9086_v13  ;;  %v2371_v47 = vpop.f32.mrf.mxu1 }
 0x4d4   : > { %v9121_v55 = vpop.eup %6818 }
 0x4d5   : > { %2730 = vadd.xlane.f32.xlu0 %v9090_v4  ;;  %v9124_v59 = vpop.eup %6820  ;;  %v6299_v49 = vpop.f32.mrf.mxu1 }
 0x4d6   : > { %v9192_v56 = vadd.f32 %v6299_v49, %v8813_v41 }
 0x4d7   : > { %2724 = vadd.xlane.f32.xlu1 %v9093_v58 }
 0x4d8   : > { %v9136_v20 = vpop.eup %6822 }
 0x4d9   : > { %2732 = vadd.xlane.f32.xlu0 %v9096_v7  ;;  %10387 = vst [vmem:[#allocation64_spill] sm:$0xff] %v9136_v20  ;;  %v9139_v60 = vpop.eup %6824 }
 0x4da   : > { %10388 = vst [vmem:[#allocation65_spill] sm:$0xff] %v9139_v60 }
 0x4db   : > { %2728 = vadd.xlane.f32.xlu1 %v9100_v26 }
 0x4dd   : > { %2736 = vadd.xlane.f32.xlu0 %v9104_v0 }
 0x4df   : > { %2734 = vadd.xlane.f32.xlu1 %v9107_v45 }
 0x4e1   : > { %2740 = vadd.xlane.f32.xlu0 %v9110_v17 }
 0x4e2   : > { %v2435_v21 = vpop.xlane.xlu0 %2434 }
 0x4e3   : > { %2738 = vadd.xlane.f32.xlu1 %v9114_v14 }
 0x4e5   : > { %2496 = vmax.xlane.f32.xlu0 %v9117_v15 }
 0x4e6   : > { %v2433_v57 = vpop.xlane.xlu0 %2432 }
 0x4e7   : > { %2742 = vadd.xlane.f32.xlu1 %v9121_v55  ;;  %v2544_v15 = vsub.f32 %v8895_v61, %v2433_v57  ;;  %v2545_v61 = vsub.f32 %v8891_v36, %v2435_v21 }
 0x4e9   : > { %2744 = vadd.xlane.f32.xlu0 %v9124_v59  ;;  %v2624_v1 = vmul.f32 1.442695, %v2544_v15  ;;  %v2626_v28 = vmul.f32 1.442695, %v2545_v61 }
 0x4eb   : > { %2498 = vmax.xlane.f32.xlu1 %v9128_v30  ;;  %6828 = vpow2.f32 %v2624_v1 }
 0x4ec   : > { %6830 = vpow2.f32 %v2626_v28 }
 0x4ed   : > { %2500 = vmax.xlane.f32.xlu0 %v9132_v19  ;;  %v9151_v19 = vpop.eup %6826 }
 0x4ef   : > { %2746 = vadd.xlane.f32.xlu1 %v9136_v20  ;;  %v9154_v20 = vadd.f32 %v2351_v24, %v8693_v22  ;;  %v9167_v22 = vadd.f32 %v6290_v38, %v8734_v27  ;;  %v9172_v24 = vadd.f32 %v2371_v47, %v8738_v31  ;;  %v9184_v38 = vadd.f32 %v6296_v10, %v8789_v44 }
 0x4f1   : > { %2748 = vadd.xlane.f32.xlu0 %v9139_v60  ;;  %v2381_v60 = vpop.f32.mrf.mxu1 }
 0x4f2   : > { %v9180_v27 = vadd.f32 %v2381_v60, %v8766_v23 }
 0x4f3   : > { %2502 = vmax.xlane.f32.xlu1 %v9143_v3  ;;  %v6302_v2 = vpop.f32.mrf.mxu1 }
 0x4f4   : > { %v9199_v44 = vadd.f32 %v6302_v2, %v8832_v9 }
 0x4f5   : > { %2504 = vmax.xlane.f32.xlu0 %v9147_v50  ;;  %v2391_v36 = vpop.f32.mrf.mxu1 }
 0x4f6   : > { %v9188_v31 = vadd.f32 %v2391_v36, %v8793_v39 }
 0x4f7   : > { %2750 = vadd.xlane.f32.xlu1 %v9151_v19 }
 0x4f8   : > { %v9196_v23 = vpop.eup %6828 }
 0x4f9   : > { %2508 = vmax.xlane.f32.xlu0 %v9154_v20  ;;  %v9203_v39 = vpop.eup %6830 }
 0x4fb   : > { %2506 = vmax.xlane.f32.xlu1 %v9159_v5 }
 0x4fd   : > { %2512 = vmax.xlane.f32.xlu0 %v9163_v33 }
 0x4ff   : > { %2510 = vmax.xlane.f32.xlu1 %v9167_v22 }
 0x501   : > { %2516 = vmax.xlane.f32.xlu0 %v9172_v24 }
 0x503   : > { %2514 = vmax.xlane.f32.xlu1 %v9176_v51 }
 0x505   : > { %2520 = vmax.xlane.f32.xlu0 %v9180_v27 }
 0x507   : > { %2518 = vmax.xlane.f32.xlu1 %v9184_v38 }
 0x509   : > { %2524 = vmax.xlane.f32.xlu0 %v9188_v31 }
 0x50b   : > { %2522 = vmax.xlane.f32.xlu1 %v9192_v56 }
 0x50d   : > { %2752 = vadd.xlane.f32.xlu0 %v9196_v23 }
 0x50f   : > { %2526 = vmax.xlane.f32.xlu1 %v9199_v44 }
 0x513   : > { %2754 = vadd.xlane.f32.xlu1 %v9203_v39 }
 0x51c   : > { %v2467_v10 = vpop.xlane.xlu1 %2466 }
 0x51d   : > { %v2561_v41 = vsub.f32 %v8927_v37, %v2467_v10 }
 0x51e   : > { %v2465_v15 = vpop.xlane.xlu0 %2464 }
 0x51f   : > { %v2658_v8 = vmul.f32 1.442695, %v2561_v41  ;;  %v2560_v6 = vsub.f32 %v8934_v34, %v2465_v15 }
 0x520   : > { %v2439_v21 = vpop.xlane.xlu1 %2438 }
 0x521   : > { %6832 = vpow2.f32 %v2658_v8  ;;  %v2656_v60 = vmul.f32 1.442695, %v2560_v6  ;;  %v2547_v9 = vsub.f32 %v8938_v62, %v2439_v21 }
 0x522   : > { %v2437_v47 = vpop.xlane.xlu0 %2436 }
 0x523   : > { %6834 = vpow2.f32 %v2656_v60  ;;  %v2630_v57 = vmul.f32 1.442695, %v2547_v9  ;;  %v2546_v1 = vsub.f32 %v8942_v16, %v2437_v47 }
 0x524   : > { %v2471_v49 = vpop.xlane.xlu1 %2470 }
 0x525   : > { %6836 = vpow2.f32 %v2630_v57  ;;  %v2563_v61 = vsub.f32 %v8950_v53, %v2471_v49  ;;  %v2628_v34 = vmul.f32 1.442695, %v2546_v1 }
 0x526   : > { %v2469_v2 = vpop.xlane.xlu0 %2468 }
 0x527   : > { %v2662_v37 = vmul.f32 1.442695, %v2563_v61  ;;  %v2562_v28 = vsub.f32 %v8954_v52, %v2469_v2 }
 0x528   : > { %v2443_v36 = vpop.xlane.xlu1 %2442 }
 0x529   : > { %6838 = vpow2.f32 %v2662_v37  ;;  %v2660_v10 = vmul.f32 1.442695, %v2562_v28  ;;  %v2549_v41 = vsub.f32 %v8958_v43, %v2443_v36 }
 0x52a   : > { %v2441_v62 = vpop.xlane.xlu0 %2440 }
 0x52b   : > { %6840 = vpow2.f32 %v2660_v10  ;;  %v2634_v15 = vmul.f32 1.442695, %v2549_v41  ;;  %v2548_v6 = vsub.f32 %v8966_v46, %v2441_v62 }
 0x52c   : > { %v2475_v8 = vpop.xlane.xlu1 %2474  ;;  %6842 = vpow2.f32 %v2628_v34 }
 0x52d   : > { %v2565_v16 = vsub.f32 %v8970_v63, %v2475_v8  ;;  %6844 = vpow2.f32 %v2634_v15  ;;  %v2632_v43 = vmul.f32 1.442695, %v2548_v6 }
 0x52e   : > { %v9215_v53 = vpop.eup %6832  ;;  %v2473_v21 = vpop.xlane.xlu0 %2472 }
 0x52f   : > { %10389 = vst [vmem:[#allocation66_spill] sm:$0xff] %v9215_v53  ;;  %v2666_v60 = vmul.f32 1.442695, %v2565_v16  ;;  %2786 = vadd.xlane.f32.xlu1 %v9215_v53  ;;  %v2564_v47 = vsub.f32 %v8974_v42, %v2473_v21 }
 0x530   : > { %v9218_v52 = vpop.eup %6834  ;;  %v2447_v9 = vpop.xlane.xlu1 %2446 }
 0x531   : > { %6846 = vpow2.f32 %v2666_v60  ;;  %2784 = vadd.xlane.f32.xlu0 %v9218_v52  ;;  %v2664_v1 = vmul.f32 1.442695, %v2564_v47  ;;  %v2551_v61 = vsub.f32 %v8982_v29, %v2447_v9 }
 0x532   : > { %v9222_v57 = vpop.eup %6836  ;;  %v2445_v46 = vpop.xlane.xlu0 %2444  ;;  %6848 = vpow2.f32 %v2632_v43 }
 0x533   : > { %v2550_v63 = vsub.f32 %v8986_v12, %v2445_v46  ;;  %2758 = vadd.xlane.f32.xlu1 %v9222_v57  ;;  %v2638_v12 = vmul.f32 1.442695, %v2551_v61 }
 0x534   : > { %v9226_v49 = vpop.xlane.xlu1 %2478 }
 0x535   : > { %v2636_v2 = vmul.f32 1.442695, %v2550_v63 }
 0x536   : > { %v9229_v37 = vpop.eup %6838  ;;  %v9231_v28 = vpop.xlane.xlu0 %2476 }
 0x537   : > { %10390 = vst [vmem:[#allocation67_spill] sm:$0xff] %v9229_v37  ;;  %6850 = vpow2.f32 %v2636_v2  ;;  %2790 = vadd.xlane.f32.xlu1 %v9229_v37 }
 0x538   : > { %v9234_v42 = vpop.eup %6840  ;;  %v2451_v36 = vpop.xlane.xlu1 %2450  ;;  %6852 = vpow2.f32 %v2664_v1 }
 0x539   : > { %10391 = vst [vmem:[#allocation68_spill] sm:$0xff] %v9234_v42  ;;  %v2553_v34 = vsub.f32 %v9000_v40, %v2451_v36  ;;  %2788 = vadd.xlane.f32.xlu0 %v9234_v42  ;;  %v9238_v10 = vpop.eup %6842  ;;  %6854 = vpow2.f32 %v2638_v12 }
 0x53a   : > { %v2449_v29 = vpop.xlane.xlu0 %2448  ;;  %v9244_v15 = vpop.eup %6844 }
 0x53b   : > { %v2552_v41 = vsub.f32 %v9004_v54, %v2449_v29  ;;  %2756 = vadd.xlane.f32.xlu1 %v9238_v10  ;;  %v2642_v8 = vmul.f32 1.442695, %v2553_v34  ;;  %v10393_v54 = vld [vmem:[#allocation57_spill] sm:$0xff] }
 0x53c   : > { %v9242_v62 = vpop.xlane.xlu1 %2482 }
 0x53d   : > { %v2640_v6 = vmul.f32 1.442695, %v2552_v41 }
 0x53e   : > { %v9246_v16 = vpop.eup %6846  ;;  %v9248_v21 = vpop.xlane.xlu0 %2480 }
 0x53f   : > { %10392 = vst [vmem:[#allocation69_spill] sm:$0xff] %v9246_v16  ;;  %6856 = vpow2.f32 %v2640_v6  ;;  %2762 = vadd.xlane.f32.xlu1 %v9244_v15  ;;  %2794 = vadd.xlane.f32.xlu0 %v9246_v16  ;;  %v9253_v9 = vpop.eup %6848 }
 0x540   : > { %v2455_v40 = vpop.xlane.xlu1 %2454  ;;  %6858 = vpow2.f32 %v2642_v8  ;;  %v10395_v8 = vld [vmem:[#allocation60_spill] sm:$0xff] }
 0x541   : > { %v2555_v60 = vsub.f32 %v10393_v54, %v2455_v40 }
 0x542   : > { %v2453_v43 = vpop.xlane.xlu0 %2452 }
 0x543   : > { %v2646_v47 = vmul.f32 1.442695, %v2555_v60  ;;  %v2554_v46 = vsub.f32 %v9020_v32, %v2453_v43  ;;  %2760 = vadd.xlane.f32.xlu1 %v9253_v9 }
 0x544   : > { %v9257_v63 = vpop.eup %6850  ;;  %v9259_v1 = vpop.xlane.xlu1 %2486 }
 0x545   : > { %6860 = vpow2.f32 %v2646_v47  ;;  %v2644_v61 = vmul.f32 1.442695, %v2554_v46  ;;  %2764 = vadd.xlane.f32.xlu0 %v9257_v63  ;;  %v9262_v2 = vpop.eup %6852  ;;  %v10396_v46 = vld [vmem:[#allocation54_spill] sm:$0xff] }
 0x546   : > { %10394 = vst [vmem:[#allocation57_spill] sm:$0xff] %v9262_v2  ;;  %v9264_v36 = vpop.xlane.xlu0 %2484  ;;  %v9268_v34 = vpop.eup %6854 }
 0x547   : > { %6862 = vpow2.f32 %v2644_v61  ;;  %2792 = vadd.xlane.f32.xlu1 %v9262_v2  ;;  %v2566_v61 = vsub.f32 %v10396_v46, %v9231_v28 }
 0x548   : > { %v2459_v12 = vpop.xlane.xlu1 %2458 }
 0x549   : > { %v2557_v32 = vsub.f32 %v9035_v11, %v2459_v12 }
 0x54a   : > { %v2457_v29 = vpop.xlane.xlu0 %2456 }
 0x54b   : > { %v2650_v41 = vmul.f32 1.442695, %v2557_v32  ;;  %v2556_v6 = vsub.f32 %v10395_v8, %v2457_v29  ;;  %2766 = vadd.xlane.f32.xlu1 %v9268_v34 }
 0x54c   : > { %v9272_v40 = vpop.eup %6856  ;;  %v9274_v54 = vpop.xlane.xlu1 %2490 }
 0x54d   : > { %6864 = vpow2.f32 %v2650_v41  ;;  %v2648_v60 = vmul.f32 1.442695, %v2556_v6  ;;  %2768 = vadd.xlane.f32.xlu0 %v9272_v40  ;;  %v9277_v43 = vpop.eup %6858 }
 0x54e   : > { %v9279_v47 = vpop.xlane.xlu0 %2488 }
 0x54f   : > { %6866 = vpow2.f32 %v2648_v60  ;;  %2770 = vadd.xlane.f32.xlu1 %v9277_v43  ;;  %v2668_v60 = vmul.f32 1.442695, %v2566_v61 }
 0x550   : > { %v2463_v11 = vpop.xlane.xlu1 %2462 }
 0x551   : > { %v2559_v12 = vsub.f32 %v9055_v35, %v2463_v11 }
 0x552   : > { %v9285_v32 = vpop.eup %6860  ;;  %v9287_v29 = vpop.xlane.xlu0 %2494 }
 0x553   : > { %10397 = vst [vmem:[#allocation60_spill] sm:$0xff] %v9285_v32  ;;  %v2654_v41 = vmul.f32 1.442695, %v2559_v12  ;;  %2774 = vadd.xlane.f32.xlu1 %v9285_v32 }
 0x554   : > { %v9290_v8 = vpop.eup %6862  ;;  %v9292_v6 = vpop.xlane.xlu1 %2492 }
 0x555   : > { %6868 = vpow2.f32 %v2654_v41  ;;  %2772 = vadd.xlane.f32.xlu0 %v9290_v8 }
 0x556   : > { %v9295_v16 = vpop.xlane.xlu0 %2460  ;;  %6870 = vpow2.f32 %v2668_v60 }
 0x558   : > { %v2723_v28 = vpop.xlane.xlu1 %2722 }
 0x559   : > { %6872 = vrcp.f32 %v2723_v28 }
 0x55a   : > { %v9297_v35 = vpop.eup %6864  ;;  %v2727_v11 = vpop.xlane.xlu0 %2726 }
 0x55b   : > { %10398 = vst [vmem:[#allocation54_spill] sm:$0xff] %v9297_v35  ;;  %2778 = vadd.xlane.f32.xlu1 %v9297_v35 }
 0x55c   : > { %v9300_v46 = vpop.eup %6866  ;;  %v2721_v12 = vpop.xlane.xlu1 %2720 }
 0x55d   : > { %10399 = vst [vmem:[#allocation70_spill] sm:$0xff] %v9300_v46  ;;  %6874 = vrcp.f32 %v2721_v12  ;;  %2776 = vadd.xlane.f32.xlu0 %v9300_v46 }
 0x55e   : > { %v2731_v61 = vpop.xlane.xlu0 %2730  ;;  %6876 = vrcp.f32 %v2727_v11 }
 0x560   : > { %v2725_v41 = vpop.xlane.xlu1 %2724 }
 0x561   : > { %6878 = vrcp.f32 %v2725_v41 }
 0x562   : > { %v9303_v2 = vpop.eup %6868  ;;  %v2733_v37 = vpop.xlane.xlu0 %2732  ;;  %6880 = vrcp.f32 %v2731_v61 }
 0x563   : > { %10400 = vst [vmem:[#allocation71_spill] sm:$0xff] %v9303_v2  ;;  %2782 = vadd.xlane.f32.xlu1 %v9303_v2  ;;  %v9306_v42 = vpop.eup %6870 }
 0x564   : > { %v2729_v60 = vpop.xlane.xlu1 %2728  ;;  %10401 = vst [vmem:[#allocation72_spill] sm:$0xff] %v9306_v42 }
 0x565   : > { %6882 = vrcp.f32 %v2729_v60 }
 0x566   : > { %6884 = vrcp.f32 %v2733_v37  ;;  %v2737_v28 = vpop.xlane.xlu0 %2736  ;;  %v6873_v53 = vpop.eup %6872 }
 0x567   : > { %2796 = vadd.xlane.f32.xlu1 %v9306_v42  ;;  %6886 = vrcp.f32 %v2737_v28  ;;  %v2913_v61 = vmul.f32 %v6873_v53, %v9077_v25  ;;  %v10402_v42 = vld [vmem:[#allocation21_spill] sm:$0xff] }
 0x568   : > { %v2735_v12 = vpop.xlane.xlu1 %2734  ;;  %v10404_v53 = vld [vmem:[#allocation33_spill] sm:$0xff] }
 0x569   : > { %6888 = vrcp.f32 %v2735_v12  ;;  %v10403_v12 = vld [vmem:[#allocation32_spill] sm:$0xff] }
 0x56a   : > { %v6875_v11 = vpop.eup %6874  ;;  %v2741_v41 = vpop.xlane.xlu0 %2740 }
 0x56b   : > { %v2912_v35 = vmul.f32 %v6875_v11, %v9086_v13  ;;  %6890 = vrcp.f32 %v2741_v41  ;;  %v6877_v2 = vpop.eup %6876 }
 0x56c   : > { %v2739_v46 = vpop.xlane.xlu1 %2738  ;;  %v2915_v13 = vmul.f32 %v6877_v2, %v9080_v48  ;;  %v10406_v48 = vld [vmem:[#allocation29_spill] sm:$0xff] }
 0x56d   : > { %6892 = vrcp.f32 %v2739_v46  ;;  %6335 = vmatprep.mubr.f32.mxu0 %v2912_v35 }
 0x56e   : > { %v6879_v60 = vpop.eup %6878  ;;  %6336 = vmatmul.mubr.f32.vlgmr.msra.gmra.mxu0 %v2913_v61  ;;  %v9311_v37 = vpop.xlane.xlu0 %2496 }
 0x56f   : > { %6416 = vmatpush3.msra.mxu0 %v10402_v42  ;;  %v2914_v28 = vmul.f32 %v6879_v60, %v9093_v58  ;;  %v6881_v11 = vpop.eup %6880  ;;  %v10405_v58 = vld [vmem:[#allocation20_spill] sm:$0xff] }
 0x570   : > { %6417 = vmatprep.subr.mxu0 %v10403_v12  ;;  %v2743_v32 = vpop.xlane.xlu1 %2742 }
 0x571   : > { %6418 = vmatpush3.msra.mxu0 %v10403_v12  ;;  %6894 = vrcp.f32 %v2743_v32  ;;  %6338 = vmatprep.mubr.f32.mxu0 %v2914_v28  ;;  %v2917_v32 = vmul.f32 %v6881_v11, %v9090_v4  ;;  %v10407_v28 = vld [vmem:[#allocation38_spill] sm:$0xff]  ;;  %v10409_v11 = vld [vmem:[#allocation40_spill] sm:$0xff] }
 0x572   : > { %v6883_v25 = vpop.eup %6882  ;;  %6419 = vmatprep.subr.mxu0 %v10404_v53  ;;  %6339 = vmatmul.mubr.f32.gmra.mxu0 %v2915_v13  ;;  %v2745_v35 = vpop.xlane.xlu0 %2744 }
 0x573   : > { %v6885_v46 = vpop.eup %6884  ;;  %6420 = vmatpush3.msra.mxu0 %v10404_v53  ;;  %1389 = vrot.lane.b32.xlu0 %v10405_v58, %s7417_s22  ;;  %v2916_v42 = vmul.f32 %v6883_v25, %v9100_v26  ;;  %6896 = vrcp.f32 %v2745_v35  ;;  %v10408_v25 = vld [vmem:[#allocation25_spill] sm:$0xff] }
 0x574   : > { %6421 = vmatprep.subr.mxu0 %v10406_v48  ;;  %v2499_v2 = vpop.xlane.xlu1 %2498  ;;  %v6887_v41 = vpop.eup %6886  ;;  %v2918_v26 = vmul.f32 %v6885_v46, %v9096_v7  ;;  %v10410_v7 = vld [vmem:[#allocation28_spill] sm:$0xff] }
 0x575   : > { %6422 = vmatpush3.msra.mxu0 %v10406_v48  ;;  %v2577_v61 = vsub.f32 %v9128_v30, %v2499_v2  ;;  %6341 = vmatprep.mubr.f32.mxu0 %v2916_v42  ;;  %v2920_v35 = vmul.f32 %v6887_v41, %v9104_v0  ;;  %v10411_v48 = vld [vmem:[#allocation44_spill] sm:$0xff]  ;;  %v10412_v41 = vld [vmem:[#allocation37_spill] sm:$0xff] }
 0x576   : > { %v6889_v60 = vpop.eup %6888  ;;  %6423 = vmatprep.subr.mxu0 %v10407_v28  ;;  %6342 = vmatmul.mubr.f32.gmra.mxu0 %v2917_v32  ;;  %v9328_v12 = vpop.xlane.xlu0 %2500 }
 0x577   : > { %v2690_v13 = vmul.f32 1.442695, %v2577_v61  ;;  %6424 = vmatpush3.msra.mxu0 %v10407_v28  ;;  %1439 = vrot.lane.b32.xlu0 %v10408_v25, %s7416_s19  ;;  %v2919_v4 = vmul.f32 %v6889_v60, %v9107_v45  ;;  %v2558_v28 = vsub.f32 %v9072_v18, %v9295_v16  ;;  %v10415_v16 = vld [vmem:[#allocation62_spill] sm:$0xff] }
 0x578   : > { %6425 = vmatprep.subr.mxu0 %v10409_v11  ;;  %6344 = vmatprep.mubr.f32.mxu0 %v2918_v26  ;;  %v2747_v30 = vpop.xlane.xlu1 %2746  ;;  %v6891_v53 = vpop.eup %6890  ;;  %v10413_v26 = vld [vmem:[#allocation41_spill] sm:$0xff] }
 0x579   : > { %6898 = vpow2.f32 %v2690_v13  ;;  %6426 = vmatpush3.msra.mxu0 %v10409_v11  ;;  %v2922_v32 = vmul.f32 %v6891_v53, %v9110_v17  ;;  %v2652_v18 = vmul.f32 1.442695, %v2558_v28  ;;  %v10416_v53 = vld [vmem:[#allocation45_spill] sm:$0xff] }
 0x57a   : > { %v6893_v42 = vpop.eup %6892  ;;  %6900 = vrcp.f32 %v2747_v30  ;;  %6427 = vmatprep.subr.mxu0 %v10410_v7  ;;  %6345 = vmatmul.mubr.f32.gmra.mxu0 %v2919_v4  ;;  %v2749_v46 = vpop.xlane.xlu0 %2748  ;;  %v10414_v4 = vld [vmem:[#allocation46_spill] sm:$0xff]  ;;  %v2576_v30 = vsub.f32 %v10415_v16, %v9311_v37 }
 0x57b   : > { %6428 = vmatpush3.msra.mxu0 %v10410_v7  ;;  %6347 = vmatprep.mubr.f32.mxu0 %v2920_v35  ;;  %v2921_v45 = vmul.f32 %v6893_v42, %v9114_v14  ;;  %6902 = vrcp.f32 %v2749_v46  ;;  %v10417_v46 = vld [vmem:[#allocation49_spill] sm:$0xff] }
 0x57c   : > { %6429 = vmatprep.subr.mxu0 %v10411_v48  ;;  %v2503_v2 = vpop.xlane.xlu1 %2502 }
 0x57d   : > { %6430 = vmatpush3.msra.mxu0 %v10411_v48  ;;  %v2579_v37 = vsub.f32 %v9143_v3, %v2503_v2  ;;  %v10418_v48 = vld [vmem:[#allocation51_spill] sm:$0xff] }
 0x57e   : > { %v6895_v0 = vpop.eup %6894  ;;  %6431 = vmatprep.subr.mxu0 %v10412_v41  ;;  %6348 = vmatmul.mubr.f32.gmra.mxu0 %v2921_v45  ;;  %v2505_v61 = vpop.xlane.xlu0 %2504 }
 0x57f   : > { %6432 = vmatpush3.msra.mxu0 %v10412_v41  ;;  %v2580_v60 = vsub.f32 %v9147_v50, %v2505_v61  ;;  %6350 = vmatprep.mubr.f32.mxu0 %v2922_v32  ;;  %v2923_v14 = vmul.f32 %v6895_v0, %v9121_v55  ;;  %v10419_v0 = vld [vmem:[#allocation64_spill] sm:$0xff] }
 0x580   : > { %6433 = vmatprep.subr.mxu0 %v10413_v26  ;;  %v2751_v13 = vpop.xlane.xlu1 %2750  ;;  %v6897_v25 = vpop.eup %6896 }
 0x581   : > { %v2696_v17 = vmul.f32 1.442695, %v2580_v60  ;;  %6434 = vmatpush3.msra.mxu0 %v10413_v26  ;;  %6904 = vrcp.f32 %v2751_v13  ;;  %v2924_v50 = vmul.f32 %v6897_v25, %v9124_v59  ;;  %v10421_v26 = vld [vmem:[#allocation63_spill] sm:$0xff]  ;;  %v2694_v25 = vmul.f32 1.442695, %v2579_v37 }
 0x582   : > { %6435 = vmatprep.subr.mxu0 %v10414_v4  ;;  %6351 = vmatmul.mubr.f32.gmra.mxu0 %v2923_v14  ;;  %v2509_v11 = vpop.xlane.xlu0 %2508  ;;  %v10420_v14 = vld [vmem:[#allocation65_spill] sm:$0xff]  ;;  %v2578_v13 = vsub.f32 %v10421_v26, %v9328_v12 }
 0x583   : > { %6906 = vpow2.f32 %v2696_v17  ;;  %6436 = vmatpush3.msra.mxu0 %v10414_v4  ;;  %v2582_v55 = vsub.f32 %v9154_v20, %v2509_v11  ;;  %6353 = vmatprep.mubr.f32.mxu0 %v2924_v50  ;;  %v2688_v20 = vmul.f32 1.442695, %v2576_v30 }
 0x584   : > { %6437 = vmatprep.subr.mxu0 %v10416_v53  ;;  %v2507_v35 = vpop.xlane.xlu1 %2506  ;;  %v2692_v50 = vmul.f32 1.442695, %v2578_v13 }
 0x585   : > { %v2700_v42 = vmul.f32 1.442695, %v2582_v55  ;;  %6438 = vmatpush3.msra.mxu0 %v10416_v53  ;;  %v2581_v4 = vsub.f32 %v9159_v5, %v2507_v35  ;;  %v10422_v53 = vld [vmem:[#allocation52_spill] sm:$0xff] }
 0x586   : > { %v9360_v7 = vpop.eup %6898  ;;  %6439 = vmatprep.subr.mxu0 %v10417_v46  ;;  %v9363_v59 = vpop.xlane.xlu0 %2512 }
 0x587   : > { %v6901_v45 = vpop.eup %6900  ;;  %6908 = vpow2.f32 %v2700_v42  ;;  %6440 = vmatpush3.msra.mxu0 %v10417_v46  ;;  %2818 = vadd.xlane.f32.xlu1 %v9360_v7  ;;  %v2698_v16 = vmul.f32 1.442695, %v2581_v4  ;;  %v2567_v42 = vsub.f32 %v10422_v53, %v9226_v49  ;;  %v10426_v4 = vld [vmem:[#allocation36_spill] sm:$0xff] }
 0x588   : > { %6910 = vpow2.f32 %v2652_v18  ;;  %6441 = vmatprep.subr.mxu0 %v10418_v48  ;;  %v9369_v32 = vpop.xlane.xlu1 %2510  ;;  %v2925_v41 = vmul.f32 %v6901_v45, %v10419_v0  ;;  %v6903_v61 = vpop.eup %6902 }
 0x589   : > { %6442 = vmatpush3.msra.mxu0 %v10418_v48  ;;  %v2926_v28 = vmul.f32 %v6903_v61, %v10420_v14  ;;  %6912 = vpow2.f32 %v2688_v20  ;;  %v2670_v46 = vmul.f32 1.442695, %v2567_v42  ;;  %v10423_v61 = vld [vmem:[#allocation23_spill] sm:$0xff] }
 0x58a   : > { %6354 = vmatmul.mubr.f32.gmra.mxu0 %v2925_v41  ;;  %v9373_v60 = vpop.xlane.xlu0 %2516  ;;  %6914 = vpow2.f32 %v2694_v25  ;;  %v10424_v25 = vld [vmem:[#allocation34_spill] sm:$0xff]  ;;  %v10430_v42 = vld [vmem:[#allocation35_spill] sm:$0xff] }
 0x58b   : > { %6356 = vmatprep.mubr.f32.mxu0 %v2926_v28  ;;  %6916 = vpow2.f32 %v2692_v50  ;;  %v10427_v50 = vld [vmem:[#allocation30_spill] sm:$0xff] }
 0x58c   : > { %v9378_v3 = vpop.xlane.xlu1 %2514  ;;  %6918 = vpow2.f32 %v2698_v16 }
 0x58e   : > { %v9380_v2 = vpop.xlane.xlu0 %2520  ;;  %v6905_v17 = vpop.eup %6904 }
 0x58f   : > { %v2927_v18 = vmul.f32 %v6905_v17, %v9151_v19  ;;  %v10425_v17 = vld [vmem:[#allocation31_spill] sm:$0xff] }
 0x590   : > { %v9383_v11 = vpop.eup %6906  ;;  %v9385_v55 = vpop.xlane.xlu1 %2518 }
 0x591   : > { %2824 = vadd.xlane.f32.xlu1 %v9383_v11  ;;  %6357 = vmatmul.mubr.f32.gmra.mxu0 %v2927_v18  ;;  %v10428_v18 = vld [vmem:[#allocation42_spill] sm:$0xff] }
 0x592   : > { %v9389_v12 = vpop.xlane.xlu0 %2524 }
 0x594   : > { %v9391_v30 = vpop.eup %6908  ;;  %v9395_v5 = vpop.xlane.xlu1 %2522 }
 0x595   : > { %v9397_v35 = vpop.eup %6910  ;;  %2828 = vadd.xlane.f32.xlu1 %v9391_v30 }
 0x596   : > { %2780 = vadd.xlane.f32.xlu0 %v9397_v35  ;;  %v2753_v19 = vpop.xlane.xlu0 %2752  ;;  %v9403_v20 = vpop.eup %6912 }
 0x597   : > { %6920 = vrcp.f32 %v2753_v19  ;;  %v9406_v37 = vpop.eup %6914 }
 0x598   : > { %v9401_v45 = vpop.xlane.xlu1 %2526  ;;  %6922 = vpow2.f32 %v2670_v46  ;;  %v9409_v48 = vpop.eup %6916  ;;  %v10431_v46 = vld [vmem:[#allocation27_spill] sm:$0xff] }
 0x599   : > { %v9412_v0 = vpop.eup %6918 }
 0x59a   : > { %2816 = vadd.xlane.f32.xlu0 %v9403_v20 }
 0x59c   : > { %v2755_v49 = vpop.xlane.xlu1 %2754 }
 0x59d   : > { %6924 = vrcp.f32 %v2755_v49 }
 0x59e   : > { %2822 = vadd.xlane.f32.xlu0 %v9406_v37 }
 0x5a2   : > { %2820 = vadd.xlane.f32.xlu0 %v9409_v48 }
 0x5a4   : > { %v6921_v41 = vpop.eup %6920 }
 0x5a5   : > { %v2928_v14 = vmul.f32 %v6921_v41, %v9196_v23  ;;  %v9418_v28 = vpop.eup %6922  ;;  %v2583_v23 = vsub.f32 %v9167_v22, %v9369_v32  ;;  %v2584_v32 = vsub.f32 %v9163_v33, %v9363_v59  ;;  %v10432_v41 = vld [vmem:[#allocation39_spill] sm:$0xff]  ;;  %v10434_v33 = vld [vmem:[#allocation48_spill] sm:$0xff] }
 0x5a6   : > { %2826 = vadd.xlane.f32.xlu0 %v9412_v0  ;;  %1387 = vrot.lane.b32.xlu1 %v10423_v61, %s7417_s22 }
 0x5a7   : > { %6391 = vmatprep.mubr.f32.mxu1 %v2928_v14  ;;  %v2702_v53 = vmul.f32 1.442695, %v2583_v23  ;;  %v10433_v14 = vld [vmem:[#allocation43_spill] sm:$0xff] }
 0x5aa   : > { %2798 = vadd.xlane.f32.xlu0 %v9418_v28  ;;  %v6925_v26 = vpop.eup %6924 }
 0x5ab   : > { %v2929_v13 = vmul.f32 %v6925_v26, %v9203_v39  ;;  %v10429_v39 = vld [vmem:[#allocation55_spill] sm:$0xff]  ;;  %v2704_v26 = vmul.f32 1.442695, %v2584_v32 }
 0x5ac   : > { %v2569_v16 = vsub.f32 %v10429_v39, %v9242_v62  ;;  %v10439_v39 = vld [vmem:[#allocation58_spill] sm:$0xff] }
 0x5ad   : > { %6392 = vmatmul.mubr.f32.vlgmr.msra.gmra.mxu1 %v2929_v13  ;;  %v2585_v13 = vsub.f32 %v9176_v51, %v9378_v3  ;;  %v10437_v51 = vld [vmem:[#allocation50_spill] sm:$0xff] }
 0x5ae   : > { %6472 = vmatpush3.msra.mxu1 %v10424_v25  ;;  %v2674_v49 = vmul.f32 1.442695, %v2569_v16  ;;  %v10435_v25 = vld [vmem:[#allocation47_spill] sm:$0xff]  ;;  %v2571_v16 = vsub.f32 %v10439_v39, %v9259_v1 }
 0x5af   : > { %6473 = vmatprep.subr.mxu1 %v10425_v17  ;;  %v2706_v23 = vmul.f32 1.442695, %v2585_v13 }
 0x5b0   : > { %6474 = vmatpush3.msra.mxu1 %v10425_v17  ;;  %v10436_v17 = vld [vmem:[#allocation59_spill] sm:$0xff] }
 0x5b1   : > { %6475 = vmatprep.subr.mxu1 %v10426_v4 }
 0x5b2   : > { %6476 = vmatpush3.msra.mxu1 %v10426_v4  ;;  %v2570_v4 = vsub.f32 %v10436_v17, %v9264_v36 }
 0x5b3   : > { %6477 = vmatprep.subr.mxu1 %v10427_v50 }
 0x5b4   : > { %6478 = vmatpush3.msra.mxu1 %v10427_v50  ;;  %v10438_v50 = vld [vmem:[#allocation53_spill] sm:$0xff] }
 0x5b5   : > { %6479 = vmatprep.subr.mxu1 %v10428_v18 }
 0x5b6   : > { %6480 = vmatpush3.msra.mxu1 %v10428_v18  ;;  %v2676_v18 = vmul.f32 1.442695, %v2570_v4 }
 0x5b7   : > { %6481 = vmatprep.subr.mxu1 %v10430_v42 }
 0x5b8   : > { %v9436_v19 = vpop.xlane.xlu1 %2786  ;;  %6482 = vmatpush3.msra.mxu1 %v10430_v42 }
 0x5b9   : > { %6483 = vmatprep.subr.mxu1 %v10431_v46 }
 0x5ba   : > { %v2785_v22 = vpop.xlane.xlu0 %2784  ;;  %6484 = vmatpush3.msra.mxu1 %v10431_v46 }
 0x5bb   : > { %6926 = vrcp.f32 %v2785_v22  ;;  %6485 = vmatprep.subr.mxu1 %v10432_v41  ;;  %v10440_v22 = vld [vmem:[#allocation56_spill] sm:$0xff] }
 0x5bc   : > { %6928 = vpow2.f32 %v2702_v53  ;;  %v2759_v62 = vpop.xlane.xlu1 %2758  ;;  %6486 = vmatpush3.msra.mxu1 %v10432_v41  ;;  %v2568_v32 = vsub.f32 %v10440_v22, %v9248_v21  ;;  %v2587_v41 = vsub.f32 %v9184_v38, %v9385_v55 }
 0x5bd   : > { %6487 = vmatprep.subr.mxu1 %v10433_v14  ;;  %6930 = vpow2.f32 %v2674_v49  ;;  %v2678_v49 = vmul.f32 1.442695, %v2571_v16 }
 0x5be   : > { %6488 = vmatpush3.msra.mxu1 %v10433_v14  ;;  %6932 = vpow2.f32 %v2704_v26  ;;  %v2672_v13 = vmul.f32 1.442695, %v2568_v32  ;;  %v2710_v38 = vmul.f32 1.442695, %v2587_v41 }
 0x5bf   : > { %6489 = vmatprep.subr.mxu1 %v10434_v33  ;;  %6934 = vrcp.f32 %v2759_v62 }
 0x5c0   : > { %v9450_v59 = vpop.xlane.xlu1 %2790  ;;  %1437 = vrot.lane.b32.xlu0 %v10405_v58, %s7416_s19  ;;  %6490 = vmatpush3.msra.mxu1 %v10434_v33  ;;  %v2586_v33 = vsub.f32 %v9172_v24, %v9373_v60  ;;  %v10442_v60 = vld [vmem:[#allocation22_spill] sm:$0xff] }
 0x5c1   : > { %6491 = vmatprep.subr.mxu1 %v10435_v25 }
 0x5c2   : > { %6492 = vmatpush3.msra.mxu1 %v10435_v25  ;;  %v9463_v58 = vpop.xlane.xlu0 %2788 }
 0x5c3   : > { %6493 = vmatprep.subr.mxu1 %v10437_v51 }
 0x5c4   : > { %v2757_v3 = vpop.xlane.xlu1 %2756  ;;  %1435 = vrot.lane.b32.xlu0 %v10423_v61, %s7416_s19  ;;  %6494 = vmatpush3.msra.mxu1 %v10437_v51  ;;  %v2589_v51 = vsub.f32 %v9192_v56, %v9395_v5  ;;  %v10443_v56 = vld [vmem:[#allocation26_spill] sm:$0xff]  ;;  %s5223_s19 = scalar_lea.sflag [#allocation4], %s7640_s1 }
 0x5c5   : > { %6936 = vrcp.f32 %v2757_v3  ;;  %6495 = vmatprep.subr.mxu1 %v10438_v50  ;;  %v2575_v5 = vsub.f32 %v10443_v56, %v9287_v29  ;;  %v2591_v29 = vsub.f32 %v9199_v44, %v9401_v45 }
 0x5c6   : > { %6496 = vmatpush3.msra.mxu1 %v10438_v50  ;;  %6938 = vpow2.f32 %v2706_v23  ;;  %v2708_v23 = vmul.f32 1.442695, %v2586_v33 }
 0x5c7   : > { %6940 = vpow2.f32 %v2676_v18  ;;  %v2572_v18 = vsub.f32 %v10442_v60, %v9279_v47  ;;  %v2588_v47 = vsub.f32 %v9180_v27, %v9380_v2  ;;  %v10444_v27 = vld [vmem:[#allocation24_spill] sm:$0xff] }
 0x5c8   : > { %v6927_v36 = vpop.eup %6926  ;;  %v2763_v53 = vpop.xlane.xlu1 %2762  ;;  %v2574_v2 = vsub.f32 %v10444_v27, %v9292_v6  ;;  %v2590_v6 = vsub.f32 %v9188_v31, %v9389_v12 }
 0x5c9   : > { %v9469_v42 = vpop.eup %6928  ;;  %v2944_v61 = vmul.f32 %v6927_v36, %v9218_v52  ;;  %v9472_v46 = vpop.xlane.xlu0 %2794  ;;  %6942 = vrcp.f32 %v2763_v53  ;;  %v10441_v52 = vld [vmem:[#allocation61_spill] sm:$0xff]  ;;  %v2680_v53 = vmul.f32 1.442695, %v2572_v18 }
 0x5ca   : > { %2830 = vadd.xlane.f32.xlu1 %v9469_v42  ;;  %v9479_v62 = vpop.eup %6930  ;;  %v2573_v14 = vsub.f32 %v10441_v52, %v9274_v54 }
 0x5cb   : > { %6447 = vmatprep.mubr.f32.mxu0 %v2944_v61  ;;  %v9484_v21 = vpop.eup %6932 }
 0x5cc   : > { %v2761_v1 = vpop.xlane.xlu1 %2760  ;;  %v6935_v25 = vpop.eup %6934  ;;  %v2682_v4 = vmul.f32 1.442695, %v2573_v14  ;;  %v2712_v14 = vmul.f32 1.442695, %v2588_v47  ;;  %v10446_v47 = vld [vmem:[#allocation70_spill] sm:$0xff] }
 0x5cd   : > { %6944 = vrcp.f32 %v2761_v1  ;;  %v2931_v50 = vmul.f32 %v6935_v25, %v9222_v57  ;;  %v2714_v57 = vmul.f32 1.442695, %v2589_v51 }
 0x5ce   : > { %2802 = vadd.xlane.f32.xlu1 %v9479_v62  ;;  %v2765_v26 = vpop.xlane.xlu0 %2764 }
 0x5cf   : > { %6946 = vrcp.f32 %v2765_v26 }
 0x5d0   : > { %6948 = vpow2.f32 %v2678_v49  ;;  %v9488_v55 = vpop.xlane.xlu1 %2792  ;;  %v2686_v49 = vmul.f32 1.442695, %v2575_v5  ;;  %v10445_v5 = vld [vmem:[#allocation60_spill] sm:$0xff] }
 0x5d1   : > { %6950 = vpow2.f32 %v2672_v13  ;;  %v2684_v13 = vmul.f32 1.442695, %v2574_v2 }
 0x5d2   : > { %v6937_v17 = vpop.eup %6936  ;;  %2832 = vadd.xlane.f32.xlu1 %v9484_v21  ;;  %6952 = vpow2.f32 %v2710_v38 }
 0x5d3   : > { %v2930_v54 = vmul.f32 %v6937_v17, %v9238_v10  ;;  %v9495_v24 = vpop.eup %6938 }
 0x5d4   : > { %v2767_v3 = vpop.xlane.xlu1 %2766  ;;  %v9500_v36 = vpop.eup %6940 }
 0x5d5   : > { %6954 = vrcp.f32 %v2767_v3  ;;  %6394 = vmatprep.mubr.f32.mxu1 %v2930_v54  ;;  %v2716_v54 = vmul.f32 1.442695, %v2590_v6 }
 0x5d6   : > { %6956 = vpow2.f32 %v2682_v4  ;;  %2834 = vadd.xlane.f32.xlu1 %v9495_v24  ;;  %6395 = vmatmul.mubr.f32.gmra.mxu1 %v2931_v50  ;;  %v2769_v10 = vpop.xlane.xlu0 %2768  ;;  %v6943_v16 = vpop.eup %6942 }
 0x5d7   : > { %6958 = vrcp.f32 %v2769_v10  ;;  %v2933_v1 = vmul.f32 %v6943_v16, %v9244_v15  ;;  %v2718_v15 = vmul.f32 1.442695, %v2591_v29 }
 0x5d8   : > { %6960 = vpow2.f32 %v2708_v23  ;;  %v2771_v39 = vpop.xlane.xlu1 %2770 }
 0x5d9   : > { %6962 = vrcp.f32 %v2771_v39 }
 0x5da   : > { %v6945_v61 = vpop.eup %6944  ;;  %2804 = vadd.xlane.f32.xlu1 %v9500_v36  ;;  %6964 = vpow2.f32 %v2714_v57 }
 0x5db   : > { %v2932_v22 = vmul.f32 %v6945_v61, %v9253_v9  ;;  %6966 = vpow2.f32 %v2680_v53 }
 0x5dc   : > { %v6947_v32 = vpop.eup %6946  ;;  %v2775_v41 = vpop.xlane.xlu1 %2774 }
 0x5dd   : > { %v9511_v52 = vpop.eup %6948  ;;  %6397 = vmatprep.mubr.f32.mxu1 %v2932_v22  ;;  %v2934_v26 = vmul.f32 %v6947_v32, %v9257_v63  ;;  %6968 = vrcp.f32 %v2775_v41  ;;  %v10447_v32 = vld [vmem:[#allocation54_spill] sm:$0xff] }
 0x5de   : > { %2806 = vadd.xlane.f32.xlu1 %v9511_v52  ;;  %6398 = vmatmul.mubr.f32.gmra.mxu1 %v2933_v1  ;;  %v2773_v9 = vpop.xlane.xlu0 %2772  ;;  %v9517_v44 = vpop.eup %6950 }
 0x5df   : > { %6970 = vrcp.f32 %v2773_v9  ;;  %6400 = vmatprep.mubr.f32.mxu1 %v2934_v26  ;;  %v9519_v45 = vpop.eup %6952 }
 0x5e0   : > { %6972 = vpow2.f32 %v2686_v49 }
 0x5e1   : > { %6974 = vpow2.f32 %v2712_v14 }
 0x5e2   : > { %v6955_v33 = vpop.eup %6954  ;;  %2838 = vadd.xlane.f32.xlu1 %v9519_v45  ;;  %6976 = vpow2.f32 %v2718_v15 }
 0x5e3   : > { %v9524_v63 = vpop.eup %6956  ;;  %2800 = vadd.xlane.f32.xlu0 %v9517_v44  ;;  %v2935_v38 = vmul.f32 %v6955_v33, %v9268_v34  ;;  %6978 = vpow2.f32 %v2684_v13  ;;  %v3559_v13 = vld [vmem:[#allocation8 + $0x18] sm:$0xff] }
 0x5e4   : > { %v6959_v25 = vpop.eup %6958  ;;  %v2779_v17 = vpop.xlane.xlu1 %2778 }
 0x5e5   : > { %v9528_v4 = vpop.eup %6960  ;;  %6401 = vmatmul.mubr.f32.gmra.mxu1 %v2935_v38  ;;  %v2936_v23 = vmul.f32 %v6959_v25, %v9272_v40  ;;  %6980 = vrcp.f32 %v2779_v17  ;;  %v3558_v38 = vld [vmem:[#allocation8 + $0x10] sm:$0xff]  ;;  %v3557_v25 = vld [vmem:[#allocation8 + $0x8] sm:$0xff] }
 0x5e6   : > { %v6963_v31 = vpop.eup %6962  ;;  %2810 = vadd.xlane.f32.xlu1 %v9524_v63  ;;  %v2777_v12 = vpop.xlane.xlu0 %2776 }
 0x5e7   : > { %6982 = vrcp.f32 %v2777_v12  ;;  %2836 = vadd.xlane.f32.xlu0 %v9528_v4  ;;  %6403 = vmatprep.mubr.f32.mxu1 %v2936_v23  ;;  %v2937_v34 = vmul.f32 %v6963_v31, %v9277_v43  ;;  %v9534_v51 = vpop.eup %6964  ;;  %v10451_v12 = vld [vmem:[#allocation57_spill] sm:$0xff] }
 0x5e8   : > { %6984 = vpow2.f32 %v2716_v54  ;;  %v9536_v3 = vpop.eup %6966  ;;  %v10450_v54 = vld [vmem:[#allocation67_spill] sm:$0xff] }
 0x5e9   : > { %6404 = vmatmul.mubr.f32.gmra.mxu1 %v2937_v34  ;;  %6986 = vrcp.f32 %v9436_v19 }
 0x5ea   : > { %2842 = vadd.xlane.f32.xlu1 %v9534_v51  ;;  %v1390_v40 = vpop.permute.xlu0 %1389  ;;  %v6969_v50 = vpop.eup %6968  ;;  %6988 = vrcp.f32 %v9463_v58  ;;  %v10448_v58 = vld [vmem:[#allocation66_spill] sm:$0xff] }
 0x5eb   : > { %2808 = vadd.xlane.f32.xlu0 %v9536_v3  ;;  %6443 = vmatprep.subr.mxu0 %v1390_v40  ;;  %v2939_v57 = vmul.f32 %v6969_v50, %v10445_v5  ;;  %6990 = vrcp.f32 %v9450_v59  ;;  %v10449_v59 = vld [vmem:[#allocation68_spill] sm:$0xff] }
 0x5ec   : > { %v6971_v60 = vpop.eup %6970  ;;  %6444 = vmatpush3.msra.mxu0 %v1390_v40  ;;  %v2783_v29 = vpop.xlane.xlu1 %2782  ;;  %6992 = vrcp.f32 %v9488_v55  ;;  %v3556_v40 = vld [vmem:[#allocation8] sm:$0xff] }
 0x5ed   : > { %v9540_v18 = vpop.eup %6972  ;;  %v2938_v10 = vmul.f32 %v6971_v60, %v9290_v8  ;;  %6994 = vrcp.f32 %v9472_v46 }
 0x5ee   : > { %v9543_v43 = vpop.eup %6974  ;;  %2814 = vadd.xlane.f32.xlu1 %v9540_v18  ;;  %v1440_v56 = vpop.permute.xlu0 %1439 }
 0x5ef   : > { %2840 = vadd.xlane.f32.xlu0 %v9543_v43  ;;  %6406 = vmatprep.mubr.f32.mxu1 %v2938_v10  ;;  %v9548_v39 = vpop.eup %6976  ;;  %v10452_v10 = vld [vmem:[#allocation69_spill] sm:$0xff] }
 0x5f0   : > { %6497 = vmatprep.subr.mxu1 %v1440_v56  ;;  %6407 = vmatmul.mubr.f32.gmra.mxu1 %v2939_v57  ;;  %v9550_v16 = vpop.eup %6978  ;;  %v2797_v41 = vpop.xlane.xlu1 %2796  ;;  %v10453_v57 = vld [vmem:[#allocation72_spill] sm:$0xff] }
 0x5f1   : > { %6498 = vmatpush3.msra.mxu1 %v1440_v56  ;;  %6996 = vrcp.f32 %v2797_v41 }
 0x5f2   : > { %2846 = vadd.xlane.f32.xlu1 %v9548_v39  ;;  %v6981_v8 = vpop.eup %6980  ;;  %6998 = vrcp.f32 %v2783_v29 }
 0x5f3   : > { %2812 = vadd.xlane.f32.xlu0 %v9550_v16  ;;  %v2941_v49 = vmul.f32 %v6981_v8, %v10447_v32  ;;  %v10454_v32 = vld [vmem:[#allocation71_spill] sm:$0xff] }
 0x5f4   : > { %v6983_v53 = vpop.eup %6982 }
 0x5f5   : > { %v2940_v61 = vmul.f32 %v6983_v53, %v10446_v47  ;;  %v9555_v22 = vpop.eup %6984 }
 0x5f6   : > { %v6987_v26 = vpop.eup %6986 }
 0x5f7   : > { %2844 = vadd.xlane.f32.xlu0 %v9555_v22  ;;  %6409 = vmatprep.mubr.f32.mxu1 %v2940_v61  ;;  %v6989_v9 = vpop.eup %6988  ;;  %v2945_v6 = vmul.f32 %v6987_v26, %v10448_v58  ;;  %v3562_v58 = vld [vmem:[#allocation8 + $0x30] sm:$0xff] }
 0x5f8   : > { %6410 = vmatmul.mubr.f32.gmra.mxu1 %v2941_v49  ;;  %v6991_v33 = vpop.eup %6990  ;;  %v2946_v55 = vmul.f32 %v6989_v9, %v10449_v59 }
 0x5f9   : > { %v6993_v46 = vpop.eup %6992  ;;  %v2947_v23 = vmul.f32 %v6991_v33, %v10450_v54 }
 0x5fa   : > { %v6995_v31 = vpop.eup %6994  ;;  %v2948_v34 = vmul.f32 %v6993_v46, %v10451_v12 }
 0x5fb   : > { %v2949_v56 = vmul.f32 %v6995_v31, %v10452_v10 }
 0x5fe   : > { %v6997_v50 = vpop.eup %6996 }
 0x5ff   : > { %v6999_v5 = vpop.eup %6998  ;;  %v2950_v8 = vmul.f32 %v6997_v50, %v10453_v57 }
 0x600   : > { %v2943_v49 = vmul.f32 %v6999_v5, %v10454_v32 }
 0x610   : > { %v2819_v1 = vpop.xlane.xlu1 %2818 }
 0x61a   : > { %v2825_v27 = vpop.xlane.xlu1 %2824 }
 0x61e   : > { %v2829_v2 = vpop.xlane.xlu1 %2828 }
 0x61f   : > { %v2781_v14 = vpop.xlane.xlu0 %2780 }
 0x620   : > { %7000 = vrcp.f32 %v2781_v14 }
 0x622   : > { %v1388_v15 = vpop.permute.xlu1 %1387 }
 0x623   : > { %6445 = vmatprep.subr.mxu0 %v1388_v15  ;;  %v2817_v19 = vpop.xlane.xlu0 %2816 }
 0x624   : > { %7002 = vrcp.f32 %v2817_v19  ;;  %6446 = vmatpush3.msra.mxu0 %v1388_v15  ;;  %v3563_v15 = vld [vmem:[#allocation8 + $0x38] sm:$0xff] }
 0x625   : > { %6448 = vmatmul.mubr.f32.vlgmr.msra.gmra.mxu0 %v2945_v6  ;;  %6527 = vmatprep.subr.mxu0 %v3559_v13  ;;  %7004 = vrcp.f32 %v2819_v1  ;;  %v9574_v19 = vld [vmem:[#allocation8 + $0x58] sm:$0xff]  ;;  %v3561_v6 = vld [vmem:[#allocation8 + $0x28] sm:$0xff] }
 0x626   : > { %6450 = vmatprep.mubr.f32.mxu0 %v2946_v55  ;;  %6528 = vmatpush3.msra.mxu0 %v3559_v13 }
 0x627   : > { %v2823_v17 = vpop.xlane.xlu0 %2822  ;;  %6529 = vmatprep.subr.mxu0 %v3558_v38 }
 0x628   : > { %6530 = vmatpush3.msra.mxu0 %v3558_v38  ;;  %v3560_v38 = vld [vmem:[#allocation8 + $0x20] sm:$0xff] }
 0x629   : > { %6451 = vmatmul.mubr.f32.gmra.mxu0 %v2947_v23  ;;  %6531 = vmatprep.subr.mxu0 %v3557_v25 }
 0x62a   : > { %6453 = vmatprep.mubr.f32.mxu0 %v2948_v34  ;;  %6532 = vmatpush3.msra.mxu0 %v3557_v25 }
 0x62b   : > { %v2821_v60 = vpop.xlane.xlu0 %2820  ;;  %6533 = vmatprep.subr.mxu0 %v3556_v40 }
 0x62c   : > { %6534 = vmatpush3.msra.mxu0 %v3556_v40  ;;  %7006 = vrcp.f32 %v2821_v60 }
 0x62d   : > { %v7001_v53 = vpop.eup %7000  ;;  %6454 = vmatmul.mubr.f32.gmra.mxu0 %v2949_v56  ;;  %7008 = vrcp.f32 %v2823_v17  ;;  %6591 = vmatprep.subr.mxu0 %v9574_v19 }
 0x62e   : > { %6456 = vmatprep.mubr.f32.mxu0 %v2950_v8  ;;  %v2942_v47 = vmul.f32 %v7001_v53, %v9397_v35  ;;  %7010 = vrcp.f32 %v2825_v27  ;;  %v9586_v5 = vpop.f32.mrf.mxu0  ;;  %v9588_v8 = vld [vmem:[#allocation8 + $0x78] sm:$0xff] }
 0x62f   : > { %v2827_v61 = vpop.xlane.xlu0 %2826 }
 0x630   : > { %6412 = vmatprep.mubr.f32.mxu1 %v2942_v47  ;;  %7012 = vrcp.f32 %v2827_v61  ;;  %v3042_v53 = vpop.f32.mrf.mxu0 }
 0x631   : > { %v7003_v29 = vpop.eup %7002  ;;  %6413 = vmatmul.mubr.f32.gmra.mxu1 %v2943_v49 }
 0x632   : > { %v2960_v41 = vmul.f32 %v7003_v29, %v9403_v20  ;;  %v7005_v26 = vpop.eup %7004  ;;  %v9591_v29 = vpop.f32.mrf.mxu0 }
 0x633   : > { %v2799_v1 = vpop.xlane.xlu0 %2798  ;;  %v2961_v13 = vmul.f32 %v7005_v26, %v9360_v7 }
 0x634   : > { %7014 = vrcp.f32 %v2799_v1  ;;  %6503 = vmatprep.mubr.f32.mxu1 %v2960_v41 }
 0x635   : > { %7016 = vrcp.f32 %v2829_v2 }
 0x637   : > { %v1438_v14 = vpop.permute.xlu0 %1437 }
 0x638   : > { %6499 = vmatprep.subr.mxu1 %v1438_v14 }
 0x639   : > { %6500 = vmatpush3.msra.mxu1 %v1438_v14  ;;  %v7007_v35 = vpop.eup %7006 }
 0x63a   : > { %v7009_v27 = vpop.eup %7008  ;;  %v2962_v20 = vmul.f32 %v7007_v35, %v9409_v48 }
 0x63b   : > { %v1436_v9 = vpop.permute.xlu0 %1435  ;;  %v7011_v2 = vpop.eup %7010  ;;  %v2963_v59 = vmul.f32 %v7009_v27, %v9406_v37 }
 0x63c   : > { %6501 = vmatprep.subr.mxu1 %v1436_v9  ;;  %v2964_v55 = vmul.f32 %v7011_v2, %v9383_v11  ;;  %v3052_v27 = vpop.f32.mrf.mxu0 }
 0x63d   : > { %6502 = vmatpush3.msra.mxu1 %v1436_v9  ;;  %v7013_v33 = vpop.eup %7012 }
 0x63e   : > { %6504 = vmatmul.mubr.f32.vlgmr.msra.gmra.mxu1 %v2961_v13  ;;  %6559 = vmatprep.subr.mxu1 %v3563_v15  ;;  %v2965_v25 = vmul.f32 %v7013_v33, %v9412_v0  ;;  %v6343_v33 = vpop.f32.mrf.mxu0 }
 0x63f   : > { %6506 = vmatprep.mubr.f32.mxu1 %v2962_v20  ;;  %6560 = vmatpush3.msra.mxu1 %v3563_v15 }
 0x640   : > { %6561 = vmatprep.subr.mxu1 %v3562_v58 }
 0x641   : > { %v7015_v7 = vpop.eup %7014  ;;  %6562 = vmatpush3.msra.mxu1 %v3562_v58 }
 0x642   : > { %v7017_v46 = vpop.eup %7016  ;;  %6507 = vmatmul.mubr.f32.gmra.mxu1 %v2963_v59  ;;  %v2951_v48 = vmul.f32 %v7015_v7, %v9418_v28  ;;  %6563 = vmatprep.subr.mxu1 %v3561_v6 }
 0x643   : > { %6509 = vmatprep.mubr.f32.mxu1 %v2964_v55  ;;  %6564 = vmatpush3.msra.mxu1 %v3561_v6  ;;  %v2966_v17 = vmul.f32 %v7017_v46, %v9391_v30  ;;  %v3062_v55 = vpop.f32.mrf.mxu0 }
 0x644   : > { %6457 = vmatmul.mubr.f32.gmra.mxu0 %v2951_v48  ;;  %6565 = vmatprep.subr.mxu1 %v3560_v38 }
 0x645   : > { %6566 = vmatpush3.msra.mxu1 %v3560_v38  ;;  %v6346_v48 = vpop.f32.mrf.mxu0 }
 0x646   : > { %6510 = vmatmul.mubr.f32.gmra.mxu1 %v2965_v25  ;;  %6623 = vmatprep.subr.mxu1 %v9588_v8 }
 0x647   : > { %6512 = vmatprep.mubr.f32.mxu1 %v2966_v17 }
 0x653   : > { %v2831_v37 = vpop.xlane.xlu1 %2830 }
 0x654   : > { %7018 = vrcp.f32 %v2831_v37  ;;  %v3072_v37 = vpop.f32.mrf.mxu0 }
 0x657   : > { %v2803_v11 = vpop.xlane.xlu1 %2802 }
 0x65b   : > { %v2833_v54 = vpop.xlane.xlu1 %2832 }
 0x65c   : > { %7020 = vrcp.f32 %v2833_v54  ;;  %v6349_v54 = vpop.f32.mrf.mxu0 }
 0x65f   : > { %v2835_v23 = vpop.xlane.xlu1 %2834 }
 0x660   : > { %7022 = vrcp.f32 %v2835_v23 }
 0x661   : > { %v7019_v28 = vpop.eup %7018  ;;  %7024 = vrcp.f32 %v2803_v11 }
 0x662   : > { %v2967_v31 = vmul.f32 %v7019_v28, %v9469_v42  ;;  %v3082_v28 = vpop.f32.mrf.mxu0 }
 0x663   : > { %v2805_v12 = vpop.xlane.xlu1 %2804 }
 0x664   : > { %6513 = vmatmul.mubr.f32.gmra.mxu1 %v2967_v31  ;;  %7026 = vrcp.f32 %v2805_v12  ;;  %v3564_v31 = vld [vmem:[#allocation8 + $0x40] sm:$0xff]  ;;  %v6352_v12 = vpop.f32.mrf.mxu0 }
 0x667   : > { %v2807_v34 = vpop.xlane.xlu1 %2806 }
 0x669   : > { %v7021_v0 = vpop.eup %7020 }
 0x66a   : > { %v2968_v40 = vmul.f32 %v7021_v0, %v9484_v21  ;;  %v3568_v0 = vld [vmem:[#allocation8 + $0x60] sm:$0xff] }
 0x66b   : > { %v2839_v30 = vpop.xlane.xlu1 %2838 }
 0x66c   : > { %6515 = vmatprep.mubr.f32.mxu1 %v2968_v40  ;;  %v2801_v50 = vpop.xlane.xlu0 %2800  ;;  %v3092_v40 = vpop.f32.mrf.mxu0 }
 0x66d   : > { %v7023_v60 = vpop.eup %7022  ;;  %7028 = vrcp.f32 %v2801_v50  ;;  %v6393_v11 = vpop.f32.mrf.mxu1 }
 0x66e   : > { %v2969_v10 = vmul.f32 %v7023_v60, %v9495_v24  ;;  %7030 = vrcp.f32 %v2807_v34  ;;  %v7025_v61 = vpop.eup %7024  ;;  %v3569_v34 = vld [vmem:[#allocation8 + $0x68] sm:$0xff]  ;;  %v6355_v50 = vpop.f32.mrf.mxu0 }
 0x66f   : > { %v2811_v56 = vpop.xlane.xlu1 %2810  ;;  %7032 = vrcp.f32 %v2839_v30  ;;  %v2953_v26 = vmul.f32 %v7025_v61, %v9479_v62  ;;  %v3187_v23 = vpop.f32.mrf.mxu1 }
 0x670   : > { %6516 = vmatmul.mubr.f32.gmra.mxu1 %v2969_v10  ;;  %v2837_v42 = vpop.xlane.xlu0 %2836  ;;  %v3102_v10 = vpop.f32.mrf.mxu0 }
 0x671   : > { %7034 = vrcp.f32 %v2837_v42  ;;  %v7027_v32 = vpop.eup %7026 }
 0x672   : > { %7036 = vrcp.f32 %v2811_v56  ;;  %v2954_v15 = vmul.f32 %v7027_v32, %v9500_v36  ;;  %v6358_v42 = vpop.f32.mrf.mxu0 }
 0x673   : > { %v2843_v57 = vpop.xlane.xlu1 %2842 }
 0x674   : > { %v2809_v21 = vpop.xlane.xlu0 %2808 }
 0x675   : > { %7038 = vrcp.f32 %v2809_v21  ;;  %v3112_v21 = vpop.f32.mrf.mxu0 }
 0x676   : > { %7040 = vrcp.f32 %v2843_v57 }
 0x677   : > { %v2815_v47 = vpop.xlane.xlu1 %2814 }
 0x678   : > { %v2841_v24 = vpop.xlane.xlu0 %2840 }
 0x679   : > { %7042 = vrcp.f32 %v2841_v24 }
 0x67a   : > { %v7029_v49 = vpop.eup %7028  ;;  %7044 = vrcp.f32 %v2815_v47 }
 0x67b   : > { %v2952_v41 = vmul.f32 %v7029_v49, %v9517_v44  ;;  %v7031_v1 = vpop.eup %7030  ;;  %v2847_v9 = vpop.xlane.xlu1 %2846 }
 0x67c   : > { %v2813_v14 = vpop.xlane.xlu0 %2812  ;;  %v7033_v35 = vpop.eup %7032  ;;  %v2955_v44 = vmul.f32 %v7031_v1, %v9511_v52 }
 0x67d   : > { %7046 = vrcp.f32 %v2813_v14  ;;  %6459 = vmatprep.mubr.f32.mxu0 %v2952_v41  ;;  %v2971_v2 = vmul.f32 %v7033_v35, %v9519_v45 }
 0x67e   : > { %v7035_v13 = vpop.eup %7034  ;;  %6460 = vmatmul.mubr.f32.gmra.mxu0 %v2953_v26  ;;  %7048 = vrcp.f32 %v2847_v9 }
 0x67f   : > { %6462 = vmatprep.mubr.f32.mxu0 %v2954_v15  ;;  %v2970_v20 = vmul.f32 %v7035_v13, %v9528_v4  ;;  %v7037_v6 = vpop.eup %7036 }
 0x680   : > { %v2845_v58 = vpop.xlane.xlu0 %2844  ;;  %v2957_v59 = vmul.f32 %v7037_v6, %v9524_v63 }
 0x681   : > { %7050 = vrcp.f32 %v2845_v58  ;;  %6518 = vmatprep.mubr.f32.mxu1 %v2970_v20 }
 0x682   : > { %v7039_v62 = vpop.eup %7038  ;;  %6463 = vmatmul.mubr.f32.gmra.mxu0 %v2955_v44  ;;  %6519 = vmatmul.mubr.f32.gmra.mxu1 %v2971_v2 }
 0x683   : > { %v2956_v36 = vmul.f32 %v7039_v62, %v9536_v3  ;;  %v7041_v7 = vpop.eup %7040 }
 0x684   : > { %v2973_v45 = vmul.f32 %v7041_v7, %v9534_v51 }
 0x685   : > { %6465 = vmatprep.mubr.f32.mxu0 %v2956_v36 }
 0x686   : > { %v7043_v4 = vpop.eup %7042  ;;  %6466 = vmatmul.mubr.f32.gmra.mxu0 %v2957_v59 }
 0x687   : > { %v2972_v52 = vmul.f32 %v7043_v4, %v9543_v43  ;;  %v7045_v38 = vpop.eup %7044 }
 0x688   : > { %v2959_v3 = vmul.f32 %v7045_v38, %v9540_v18  ;;  %v3566_v18 = vld [vmem:[#allocation8 + $0x50] sm:$0xff] }
 0x689   : > { %6521 = vmatprep.mubr.f32.mxu1 %v2972_v52 }
 0x68a   : > { %v7047_v46 = vpop.eup %7046  ;;  %6522 = vmatmul.mubr.f32.gmra.mxu1 %v2973_v45 }
 0x68b   : > { %v2958_v25 = vmul.f32 %v7047_v46, %v9550_v16  ;;  %v7049_v17 = vpop.eup %7048  ;;  %v3565_v16 = vld [vmem:[#allocation8 + $0x48] sm:$0xff] }
 0x68c   : > { %v2975_v51 = vmul.f32 %v7049_v17, %v9548_v39 }
 0x68d   : > { %6468 = vmatprep.mubr.f32.mxu0 %v2958_v25 }
 0x68e   : > { %v7051_v63 = vpop.eup %7050  ;;  %6469 = vmatmul.mubr.f32.gmra.mxu0 %v2959_v3 }
 0x68f   : > { %6535 = vmatprep.mubr.msk.f32.mxu0 %vm1499_vm0, %v3042_v53  ;;  %v2974_v43 = vmul.f32 %v7051_v63, %v9555_v22 }
 0x691   : > { %6524 = vmatprep.mubr.f32.mxu1 %v2974_v43 }
 0x692   : > { %6525 = vmatmul.mubr.f32.gmra.mxu1 %v2975_v51  ;;  %6536 = vmatmul.mubr.msk.f32.vlgmr.msra.gmra.mxu0 %vm1499_vm0, %v9586_v5 }
 0x693   : > { %6538 = vmatprep.mubr.msk.f32.mxu0 %vm1499_vm0, %v3052_v27  ;;  %6567 = vmatprep.mubr.msk.f32.mxu1 %vm1499_vm0, %v3187_v23 }
 0x694   : > { %6592 = vmatpush3.msra.mxu0 %v9574_v19  ;;  %v3570_v19 = vld [vmem:[#allocation8 + $0x70] sm:$0xff] }
 0x695   : > { %6593 = vmatprep.subr.mxu0 %v3566_v18 }
 0x696   : > { %v6396_v22 = vpop.f32.mrf.mxu1  ;;  %6539 = vmatmul.mubr.msk.f32.gmra.mxu0 %vm1499_vm0, %v9591_v29  ;;  %6568 = vmatmul.mubr.msk.f32.vlgmr.msra.gmra.mxu1 %vm1499_vm0, %v6393_v11  ;;  %v10455_v11 = vmov 0.0  }
 0x697   : > { %6541 = vmatprep.mubr.msk.f32.mxu0 %vm1499_vm0, %v3062_v55  ;;  %6594 = vmatpush3.msra.mxu0 %v3566_v18 }
 0x698   : > { %v3197_v39 = vpop.f32.mrf.mxu1  ;;  %6595 = vmatprep.subr.mxu0 %v3565_v16  ;;  %6624 = vmatpush3.msra.mxu1 %v9588_v8 }
 0x699   : > { %6570 = vmatprep.mubr.msk.f32.mxu1 %vm1499_vm0, %v3197_v39  ;;  %6596 = vmatpush3.msra.mxu0 %v3565_v16 }
 0x69a   : > { %6542 = vmatmul.mubr.msk.f32.gmra.mxu0 %vm1499_vm0, %v6343_v33  ;;  %6571 = vmatmul.mubr.msk.f32.gmra.mxu1 %vm1499_vm0, %v6396_v22 }
 0x69b   : > { %6544 = vmatprep.mubr.msk.f32.mxu0 %vm1499_vm0, %v3072_v37  ;;  %6597 = vmatprep.subr.mxu0 %v3564_v31 }
 0x69c   : > { %6598 = vmatpush3.msra.mxu0 %v3564_v31  ;;  %6625 = vmatprep.subr.mxu1 %v3570_v19 }
 0x69d   : > { %6626 = vmatpush3.msra.mxu1 %v3570_v19 }
 0x69e   : > { %v6399_v30 = vpop.f32.mrf.mxu1  ;;  %6545 = vmatmul.mubr.msk.f32.gmra.mxu0 %vm1499_vm0, %v6346_v48  ;;  %6627 = vmatprep.subr.mxu1 %v3569_v34 }
 0x69f   : > { %6547 = vmatprep.mubr.msk.f32.mxu0 %vm1499_vm0, %v3082_v28  ;;  %6628 = vmatpush3.msra.mxu1 %v3569_v34 }
 0x6a0   : > { %v3207_v60 = vpop.f32.mrf.mxu1  ;;  %6629 = vmatprep.subr.mxu1 %v3568_v0 }
 0x6a1   : > { %6573 = vmatprep.mubr.msk.f32.mxu1 %vm1499_vm0, %v3207_v60  ;;  %6630 = vmatpush3.msra.mxu1 %v3568_v0 }
 0x6a2   : > { %6548 = vmatmul.mubr.msk.f32.gmra.mxu0 %vm1499_vm0, %v6349_v54  ;;  %6574 = vmatmul.mubr.msk.f32.gmra.mxu1 %vm1499_vm0, %v6399_v30 }
 0x6a3   : > { %6550 = vmatprep.mubr.msk.f32.mxu0 %vm1499_vm0, %v3092_v40 }
 0x6a5   : > { %v6402_v56 = vpop.f32.mrf.mxu1 }
 0x6a6   : > { %6551 = vmatmul.mubr.msk.f32.gmra.mxu0 %vm1499_vm0, %v6352_v12 }
 0x6a7   : > { %v3217_v5 = vpop.f32.mrf.mxu1  ;;  %6553 = vmatprep.mubr.msk.f32.mxu0 %vm1499_vm0, %v3102_v10 }
 0x6a8   : > { %6576 = vmatprep.mubr.msk.f32.mxu1 %vm1499_vm0, %v3217_v5 }
 0x6a9   : > { %v6405_v57 = vpop.f32.mrf.mxu1  ;;  %6577 = vmatmul.mubr.msk.f32.gmra.mxu1 %vm1499_vm0, %v6402_v56 }
 0x6aa   : > { %6554 = vmatmul.mubr.msk.f32.gmra.mxu0 %vm1499_vm0, %v6355_v50 }
 0x6ab   : > { %v3227_v8 = vpop.f32.mrf.mxu1  ;;  %6556 = vmatprep.mubr.msk.f32.mxu0 %vm1499_vm0, %v3112_v21 }
 0x6ac   : > { %6579 = vmatprep.mubr.msk.f32.mxu1 %vm1499_vm0, %v3227_v8 }
 0x6ad   : > { %6580 = vmatmul.mubr.msk.f32.gmra.mxu1 %vm1499_vm0, %v6405_v57 }
 0x6ae   : > { %6557 = vmatmul.mubr.msk.f32.gmra.mxu0 %vm1499_vm0, %v6358_v42 }
 0x6b0   : > { %v6408_v53 = vpop.f32.mrf.mxu1 }
 0x6b2   : > { %v3237_v47 = vpop.f32.mrf.mxu1 }
 0x6b3   : > { %6582 = vmatprep.mubr.msk.f32.mxu1 %vm1499_vm0, %v3237_v47 }
 0x6b4   : > { %6583 = vmatmul.mubr.msk.f32.gmra.mxu1 %vm1499_vm0, %v6408_v53 }
 0x6b8   : > { %v6411_v61 = vpop.f32.mrf.mxu1 }
 0x6ba   : > { %v3247_v24 = vpop.f32.mrf.mxu1 }
 0x6bb   : > { %6585 = vmatprep.mubr.msk.f32.mxu1 %vm1499_vm0, %v3247_v24 }
 0x6bc   : > { %6586 = vmatmul.mubr.msk.f32.gmra.mxu1 %vm1499_vm0, %v6411_v61 }
 0x6e5   : > { %v6449_v32 = vpop.f32.mrf.mxu0 }
 0x6e7   : > { %v3332_v49 = vpop.f32.mrf.mxu0 }
 0x6e8   : > { %6599 = vmatprep.mubr.msk.f32.mxu0 %vm1499_vm0, %v3332_v49 }
 0x6e9   : > { %v6452_v29 = vpop.f32.mrf.mxu0  ;;  %6600 = vmatmul.mubr.msk.f32.vlgmr.msra.gmra.mxu0 %vm1499_vm0, %v6449_v32 }
 0x6eb   : > { %v3342_v41 = vpop.f32.mrf.mxu0 }
 0x6ec   : > { %6602 = vmatprep.mubr.msk.f32.mxu0 %vm1499_vm0, %v3342_v41 }
 0x6ed   : > { %v6455_v1 = vpop.f32.mrf.mxu0  ;;  %6603 = vmatmul.mubr.msk.f32.gmra.mxu0 %vm1499_vm0, %v6452_v29 }
 0x6ef   : > { %v3352_v14 = vpop.f32.mrf.mxu0 }
 0x6f0   : > { %6605 = vmatprep.mubr.msk.f32.mxu0 %vm1499_vm0, %v3352_v14 }
 0x6f1   : > { %v6414_v26 = vpop.f32.mrf.mxu1  ;;  %6606 = vmatmul.mubr.msk.f32.gmra.mxu0 %vm1499_vm0, %v6455_v1 }
 0x6f3   : > { %v3257_v35 = vpop.f32.mrf.mxu1 }
 0x6f4   : > { %6588 = vmatprep.mubr.msk.f32.mxu1 %vm1499_vm0, %v3257_v35 }
 0x6f5   : > { %6589 = vmatmul.mubr.msk.f32.gmra.mxu1 %vm1499_vm0, %v6414_v26 }
 0x6fe   : > { %v6505_v9 = vpop.f32.mrf.mxu1 }
 0x700   : > { %v3477_v15 = vpop.f32.mrf.mxu1 }
 0x701   : > { %6631 = vmatprep.mubr.msk.f32.mxu1 %vm1499_vm0, %v3477_v15 }
 0x702   : > { %v6508_v13 = vpop.f32.mrf.mxu1  ;;  %6632 = vmatmul.mubr.msk.f32.vlgmr.msra.gmra.mxu1 %vm1499_vm0, %v6505_v9 }
 0x704   : > { %v6458_v27 = vpop.f32.mrf.mxu0  ;;  %v3487_v20 = vpop.f32.mrf.mxu1 }
 0x705   : > { %6634 = vmatprep.mubr.msk.f32.mxu1 %vm1499_vm0, %v3487_v20 }
 0x706   : > { %v3362_v58 = vpop.f32.mrf.mxu0  ;;  %v6511_v44 = vpop.f32.mrf.mxu1  ;;  %6635 = vmatmul.mubr.msk.f32.gmra.mxu1 %vm1499_vm0, %v6508_v13 }
 0x707   : > { %6608 = vmatprep.mubr.msk.f32.mxu0 %vm1499_vm0, %v3362_v58  ;;  %v10456_v58 = vld [vmem:[#allocation19_spill] sm:$0xff] }
 0x708   : > { %v3497_v2 = vpop.f32.mrf.mxu1  ;;  %6609 = vmatmul.mubr.msk.f32.gmra.mxu0 %vm1499_vm0, %v6458_v27 }
 0x709   : > { %6637 = vmatprep.mubr.msk.f32.mxu1 %vm1499_vm0, %v3497_v2 }
 0x70a   : > { %6638 = vmatmul.mubr.msk.f32.gmra.mxu1 %vm1499_vm0, %v6511_v44  ;;  %v4394_v44 = vsub.s32 4, %v10456_v58 }
 0x724   : > { %v6514_v6 = vpop.f32.mrf.mxu1 }
 0x726   : > { %v3507_v62 = vpop.f32.mrf.mxu1 }
 0x727   : > { %6640 = vmatprep.mubr.msk.f32.mxu1 %vm1499_vm0, %v3507_v62 }
 0x728   : > { %6641 = vmatmul.mubr.msk.f32.gmra.mxu1 %vm1499_vm0, %v6514_v6 }
 0x730   : > { %v6517_v33 = vpop.f32.mrf.mxu1 }
 0x732   : > { %v3517_v36 = vpop.f32.mrf.mxu1 }
 0x733   : > { %6643 = vmatprep.mubr.msk.f32.mxu1 %vm1499_vm0, %v3517_v36  ;;  %v9706_v36 = vld [vmem:[%s10192_s6] sm:$0x3f] }
 0x734   : > { %6644 = vmatmul.mubr.msk.f32.gmra.mxu1 %vm1499_vm0, %v6517_v33 }
 0x73e   : > { %v6461_v59 = vpop.f32.mrf.mxu0 }
 0x740   : > { %v3372_v7 = vpop.f32.mrf.mxu0 }
 0x741   : > { %6611 = vmatprep.mubr.msk.f32.mxu0 %vm1499_vm0, %v3372_v7 }
 0x742   : > { %v6464_v4 = vpop.f32.mrf.mxu0  ;;  %v6520_v55 = vpop.f32.mrf.mxu1  ;;  %6612 = vmatmul.mubr.msk.f32.gmra.mxu0 %vm1499_vm0, %v6461_v59  ;;  %v9709_v59 = vrot.slane %v9706_v36, %v4394_v44 }
 0x744   : > { %v3382_v52 = vpop.f32.mrf.mxu0  ;;  %v3527_v45 = vpop.f32.mrf.mxu1 }
 0x745   : > { %6614 = vmatprep.mubr.msk.f32.mxu0 %vm1499_vm0, %v3382_v52  ;;  %6646 = vmatprep.mubr.msk.f32.mxu1 %vm1499_vm0, %v3527_v45 }
 0x746   : > { %v6467_v38 = vpop.f32.mrf.mxu0  ;;  %6615 = vmatmul.mubr.msk.f32.gmra.mxu0 %vm1499_vm0, %v6464_v4  ;;  %6647 = vmatmul.mubr.msk.f32.gmra.mxu1 %vm1499_vm0, %v6520_v55 }
 0x748   : > { %v3392_v46 = vpop.f32.mrf.mxu0 }
 0x749   : > { %6617 = vmatprep.mubr.msk.f32.mxu0 %vm1499_vm0, %v3392_v46 }
 0x74a   : > { %v6523_v48 = vpop.f32.mrf.mxu1  ;;  %6618 = vmatmul.mubr.msk.f32.gmra.mxu0 %vm1499_vm0, %v6467_v38 }
 0x74c   : > { %v3537_v25 = vpop.f32.mrf.mxu1 }
 0x74d   : > { %6649 = vmatprep.mubr.msk.f32.mxu1 %vm1499_vm0, %v3537_v25 }
 0x74e   : > { %v6470_v3 = vpop.f32.mrf.mxu0  ;;  %6650 = vmatmul.mubr.msk.f32.gmra.mxu1 %vm1499_vm0, %v6523_v48 }
 0x750   : > { %v3402_v17 = vpop.f32.mrf.mxu0 }
 0x751   : > { %6620 = vmatprep.mubr.msk.f32.mxu0 %vm1499_vm0, %v3402_v17 }
 0x752   : > { %v6526_v63 = vpop.f32.mrf.mxu1  ;;  %v6537_v37 = vpop.f32.mrf.mxu0  ;;  %6621 = vmatmul.mubr.msk.f32.gmra.mxu0 %vm1499_vm0, %v6470_v3 }
 0x753   : > { %4752 = vmatprep.mubr.f32.mxu0 %v10455_v11 }
 0x754   : > { %v3547_v43 = vpop.f32.mrf.mxu1  ;;  %v3686_v51 = vpop.f32.mrf.mxu0 }
 0x755   : > { %6652 = vmatprep.mubr.msk.f32.mxu1 %vm1499_vm0, %v3547_v43 }
 0x756   : > { %v6540_v54 = vpop.f32.mrf.mxu0  ;;  %v6569_v23 = vpop.f32.mrf.mxu1  ;;  %6653 = vmatmul.mubr.msk.f32.gmra.mxu1 %vm1499_vm0, %v6526_v63 }
 0x757   : > { %v4347_v2 = vadd.f32 %v6569_v23, %v6537_v37  ;;  %v7149_v23 = vld [vmem:[%s7646_s15 + $0x8] sm:$0xff] }
 0x758   : > { %v3696_v18 = vpop.f32.mrf.mxu0  ;;  %v3879_v16 = vpop.f32.mrf.mxu1 }
 0x759   : > { %v4344_v62 = vadd.f32 %v3879_v16, %v3686_v51 }
 0x75a   : > { %v6543_v28 = vpop.f32.mrf.mxu0  ;;  %v6572_v22 = vpop.f32.mrf.mxu1 }
 0x75b   : > { %v4353_v4 = vadd.f32 %v6572_v22, %v6540_v54 }
 0x75c   : > { %v3706_v39 = vpop.f32.mrf.mxu0  ;;  %v3889_v31 = vpop.f32.mrf.mxu1 }
 0x75d   : > { %v4350_v46 = vadd.f32 %v3889_v31, %v3696_v18 }
 0x75e   : > { %v9676_v19 = vpop.f32.mrf.mxu0 }
 0x760   : > { %v9678_v34 = vpop.f32.mrf.mxu0 }
 0x762   : > { %v6575_v12 = vpop.f32.mrf.mxu1  ;;  %v6549_v30 = vpop.f32.mrf.mxu0 }
 0x763   : > { %v4359_v17 = vadd.f32 %v6575_v12, %v6543_v28  ;;  %v7150_v28 = vld [vmem:[%s7646_s15] sm:$0xff] }
 0x764   : > { %v3899_v0 = vpop.f32.mrf.mxu1  ;;  %v3726_v10 = vpop.f32.mrf.mxu0 }
 0x765   : > { %v4356_v54 = vadd.f32 %v3899_v0, %v3706_v39  ;;  %v7151_v39 = vld [vmem:[%s7646_s15 + $0x18] sm:$0xff] }
 0x766   : > { %v6552_v57 = vpop.f32.mrf.mxu0 }
 0x768   : > { %v3736_v53 = vpop.f32.mrf.mxu0 }
 0x769   : > { %v9680_v40 = vpop.f32.mrf.mxu1 }
 0x76a   : > { %v6555_v24 = vpop.f32.mrf.mxu0  ;;  %v4365_v44 = vadd.f32 %v9680_v40, %v9676_v19  ;;  %v7156_v19 = vld [vmem:[%s7646_s15 + $0x30] sm:$0xff] }
 0x76b   : > { %v9682_v50 = vpop.f32.mrf.mxu1 }
 0x76c   : > { %v3746_v29 = vpop.f32.mrf.mxu0 }
 0x76d   : > { %v6581_v60 = vpop.f32.mrf.mxu1 }
 0x76e   : > { %v9684_v56 = vadd.f32 %v6581_v60, %v6549_v30  ;;  %v9696_v14 = vpop.f32.mrf.mxu0 }
 0x76f   : > { %v3919_v42 = vpop.f32.mrf.mxu1 }
 0x770   : > { %v9686_v5 = vadd.f32 %v3919_v42, %v3726_v10  ;;  %v3756_v26 = vpop.f32.mrf.mxu0 }
 0x774   : > { %v6584_v21 = vpop.f32.mrf.mxu1 }
 0x775   : > { %v9688_v8 = vadd.f32 %v6584_v21, %v6552_v57 }
 0x776   : > { %v3929_v47 = vpop.f32.mrf.mxu1 }
 0x777   : > { %v9690_v61 = vadd.f32 %v3929_v47, %v3736_v53 }
 0x77c   : > { %v6587_v32 = vpop.f32.mrf.mxu1 }
 0x77d   : > { %v9692_v49 = vadd.f32 %v6587_v32, %v6555_v24  ;;  %v7152_v32 = vld [vmem:[%s7646_s15 + $0x10] sm:$0xff] }
 0x77e   : > { %v3939_v41 = vpop.f32.mrf.mxu1 }
 0x77f   : > { %v9694_v1 = vadd.f32 %v3939_v41, %v3746_v29 }
 0x7a9   : > { %v6601_v35 = vpop.f32.mrf.mxu0 }
 0x7aa   : > { %v4348_v33 = vadd.f32 %v6601_v35, %v4347_v2 }
 0x7ab   : > { %v4072_v13 = vpop.f32.mrf.mxu0 }
 0x7ac   : > { %v4345_v55 = vadd.f32 %v4344_v62, %v4072_v13 }
 0x7ad   : > { %v6604_v20 = vpop.f32.mrf.mxu0 }
 0x7ae   : > { %v4354_v48 = vadd.f32 %v6604_v20, %v4353_v4 }
 0x7af   : > { %v4082_v6 = vpop.f32.mrf.mxu0 }
 0x7b0   : > { %v4351_v37 = vadd.f32 %v4350_v46, %v4082_v6  ;;  %v4362_v6 = vadd.f32 %v9682_v50, %v9678_v34  ;;  %v7155_v46 = vld [vmem:[%s7646_s15 + $0x38] sm:$0xff] }
 0x7b1   : > { %v6607_v45 = vpop.f32.mrf.mxu0 }
 0x7b2   : > { %v4360_v60 = vadd.f32 %v6607_v45, %v4359_v17 }
 0x7b3   : > { %v4092_v22 = vpop.f32.mrf.mxu0 }
 0x7b4   : > { %v4357_v42 = vadd.f32 %v4356_v54, %v4092_v22 }
 0x7b5   : > { %v9698_v9 = vpop.f32.mrf.mxu1 }
 0x7b7   : > { %v3949_v15 = vpop.f32.mrf.mxu1 }
 0x7b8   : > { %v9700_v27 = vadd.f32 %v3949_v15, %v3756_v26  ;;  %v7153_v26 = vld [vmem:[%s7646_s15 + $0x28] sm:$0xff]  ;;  %v7154_v15 = vld [vmem:[%s7646_s15 + $0x20] sm:$0xff] }
 0x7c2   : > { %v6633_v7 = vpop.f32.mrf.mxu1 }
 0x7c3   : > { %v4349_v52 = vadd.f32 %v6633_v7, %v4348_v33 }
 0x7c4   : > { %v4265_v38 = vpop.f32.mrf.mxu1 }
 0x7c5   : > { %v4397_v25 = vadd.f32 %v9709_v59, %v4349_v52  ;;  %v4346_v3 = vadd.f32 %v4345_v55, %v4265_v38 }
 0x7c6   : > { %v6636_v63 = vpop.f32.mrf.mxu1 }
 0x7c7   : > { %v4396_v43 = vadd.f32 %v9709_v59, %v4346_v3  ;;  %v4355_v51 = vadd.f32 %v6636_v63, %v4354_v48  ;;  %v9714_v16 = vadd.f32 %v7149_v23, %v4397_v25 }
 0x7c8   : > { %v4275_v30 = vpop.f32.mrf.mxu1  ;;  %v6610_v20 = vpop.f32.mrf.mxu0 }
 0x7c9   : > { %v4399_v18 = vadd.f32 %v9709_v59, %v4355_v51  ;;  %v4352_v31 = vadd.f32 %v4351_v37, %v4275_v30  ;;  %4430 = vadd.xlane.f32.xlu1 %v9714_v16  ;;  %v9719_v12 = vadd.f32 %v7150_v28, %v4396_v43  ;;  %v4366_v62 = vadd.f32 %v6610_v20, %v4365_v44 }
 0x7ca   : > { %v6639_v10 = vpop.f32.mrf.mxu1  ;;  %v4102_v2 = vpop.f32.mrf.mxu0 }
 0x7cb   : > { %v4398_v57 = vadd.f32 %v9709_v59, %v4352_v31  ;;  %v4361_v21 = vadd.f32 %v6639_v10, %v4360_v60  ;;  %4428 = vadd.xlane.f32.xlu0 %v9719_v12  ;;  %v9724_v0 = vadd.f32 %v7151_v39, %v4399_v18  ;;  %v4363_v7 = vadd.f32 %v4362_v6, %v4102_v2  ;;  %v7157_v31 = vld [vmem:[%s7646_s15 + $0x48] sm:$0xff] }
 0x7cc   : > { %v4285_v53 = vpop.f32.mrf.mxu1 }
 0x7cd   : > { %v4401_v47 = vadd.f32 %v9709_v59, %v4361_v21  ;;  %v4358_v24 = vadd.f32 %v4357_v42, %v4285_v53  ;;  %4434 = vadd.xlane.f32.xlu1 %v9724_v0  ;;  %v9729_v29 = vadd.f32 %v7152_v32, %v4398_v57  ;;  %v7158_v21 = vld [vmem:[%s7646_s15 + $0x40] sm:$0xff] }
 0x7cf   : > { %v4400_v41 = vadd.f32 %v9709_v59, %v4358_v24  ;;  %4432 = vadd.xlane.f32.xlu0 %v9729_v29  ;;  %v9734_v35 = vadd.f32 %v7153_v26, %v4401_v47 }
 0x7d1   : > { %4438 = vadd.xlane.f32.xlu1 %v9734_v35  ;;  %v9738_v13 = vadd.f32 %v7154_v15, %v4400_v41  ;;  %v7160_v15 = vld [vmem:[%s7646_s15 + $0x50] sm:$0xff] }
 0x7d3   : > { %4436 = vadd.xlane.f32.xlu0 %v9738_v13 }
 0x7e8   : > { %v6642_v33 = vpop.f32.mrf.mxu1 }
 0x7e9   : > { %v4367_v4 = vadd.f32 %v6642_v33, %v4366_v62  ;;  %v4389_v62 = vadd.f32 %v9698_v9, %v9696_v14 }
 0x7ea   : > { %v4295_v55 = vpop.f32.mrf.mxu1 }
 0x7eb   : > { %v4403_v52 = vadd.f32 %v9709_v59, %v4367_v4  ;;  %v4364_v45 = vadd.f32 %v4363_v7, %v4295_v55 }
 0x7ed   : > { %v4402_v38 = vadd.f32 %v9709_v59, %v4364_v45  ;;  %v9748_v48 = vadd.f32 %v7155_v46, %v4403_v52  ;;  %v7162_v52 = vld [vmem:[%s7646_s15 + $0x60] sm:$0xff] }
 0x7ef   : > { %4442 = vadd.xlane.f32.xlu1 %v9748_v48  ;;  %v9752_v40 = vadd.f32 %v7156_v19, %v4402_v38 }
 0x7f1   : > { %4440 = vadd.xlane.f32.xlu0 %v9752_v40 }
 0x7f4   : > { %v6645_v34 = vpop.f32.mrf.mxu1 }
 0x7f6   : > { %v4305_v3 = vpop.f32.mrf.mxu1 }
 0x802   : > { %v6613_v50 = vpop.f32.mrf.mxu0 }
 0x803   : > { %v4372_v25 = vadd.f32 %v6613_v50, %v9684_v56 }
 0x804   : > { %v4112_v17 = vpop.f32.mrf.mxu0 }
 0x805   : > { %v4373_v63 = vadd.f32 %v6645_v34, %v4372_v25  ;;  %v4369_v37 = vadd.f32 %v9686_v5, %v4112_v17  ;;  %v7163_v25 = vld [vmem:[%s7646_s15 + $0x78] sm:$0xff]  ;;  %v7164_v17 = vld [vmem:[%s7646_s15 + $0x70] sm:$0xff] }
 0x806   : > { %v6616_v43 = vpop.f32.mrf.mxu0  ;;  %v6648_v51 = vpop.f32.mrf.mxu1 }
 0x807   : > { %v4405_v23 = vadd.f32 %v9709_v59, %v4373_v63  ;;  %v4370_v54 = vadd.f32 %v4369_v37, %v4305_v3  ;;  %v4378_v22 = vadd.f32 %v6616_v43, %v9688_v8  ;;  %v4674_v37 = vld [vmem:[#allocation10 + $0xf0] sm:$0xff]  ;;  %v4673_v43 = vld [vmem:[#allocation10 + $0xe8] sm:$0xff] }
 0x808   : > { %v4122_v30 = vpop.f32.mrf.mxu0  ;;  %v4315_v10 = vpop.f32.mrf.mxu1 }
 0x809   : > { %v4404_v60 = vadd.f32 %v9709_v59, %v4370_v54  ;;  %v4379_v18 = vadd.f32 %v6648_v51, %v4378_v22  ;;  %v4375_v56 = vadd.f32 %v9690_v61, %v4122_v30  ;;  %v9762_v28 = vadd.f32 %v7157_v31, %v4405_v23  ;;  %v7159_v61 = vld [vmem:[%s7646_s15 + $0x58] sm:$0xff]  ;;  %v4672_v51 = vld [vmem:[#allocation10 + $0xe0] sm:$0xff]  ;;  %v4670_v54 = vld [vmem:[#allocation10 + $0xd0] sm:$0xff] }
 0x80a   : > { %v6619_v5 = vpop.f32.mrf.mxu0  ;;  %v4671_v23 = vld [vmem:[#allocation10 + $0xd8] sm:$0xff] }
 0x80b   : > { %v4407_v42 = vadd.f32 %v9709_v59, %v4379_v18  ;;  %v4376_v57 = vadd.f32 %v4375_v56, %v4315_v10  ;;  %4446 = vadd.xlane.f32.xlu1 %v9762_v28  ;;  %v9767_v8 = vadd.f32 %v7158_v21, %v4404_v60  ;;  %v4384_v47 = vadd.f32 %v6619_v5, %v9692_v49 }
 0x80c   : > { %v4132_v39 = vpop.f32.mrf.mxu0 }
 0x80d   : > { %v4406_v53 = vadd.f32 %v9709_v59, %v4376_v57  ;;  %4444 = vadd.xlane.f32.xlu0 %v9767_v8  ;;  %v9773_v24 = vadd.f32 %v7159_v61, %v4407_v42  ;;  %v4381_v41 = vadd.f32 %v9694_v1, %v4132_v39  ;;  %v7161_v1 = vld [vmem:[%s7646_s15 + $0x68] sm:$0xff]  ;;  %s5236_s15 = sshll.u32 %s10088_s9, 4  ;;  %s10141_s15 = int_to_ptr.vmem [resolvable:$true] %s5236_s15 }
 0x80e   : > { %v6651_v32 = vpop.f32.mrf.mxu1  ;;  %s7324_s22 = scalar_lea.vmem %s10141_s15, 2048  ;;  %p7331_p5 = scmp.lt.s32.totalorder %s10141_s15, %s7329_s16 }
 0x80f   : > { %v4385_v26 = vadd.f32 %v6651_v32, %v4384_v47  ;;  %4450 = vadd.xlane.f32.xlu1 %v9773_v24  ;;  %v9778_v20 = vadd.f32 %v7160_v15, %v4406_v53  ;;  %p7325_p10 = scmp.ne.s32.totalorder %s10141_s15, %s7324_s22  ;;  %p7332_p9 = scmp.lt.s32.totalorder %s7330_s14, %s7324_s22 }
 0x810   : > { %v4325_v44 = vpop.f32.mrf.mxu1 }
 0x811   : > { %v4409_v2 = vadd.f32 %v9709_v59, %v4385_v26  ;;  %v4382_v49 = vadd.f32 %v4381_v41, %v4325_v44  ;;  %4448 = vadd.xlane.f32.xlu0 %v9778_v20  ;;  %v4669_v44 = vld [vmem:[#allocation10 + $0xc8] sm:$0xff]  ;;  %p7326_p13 = pnand %p7325_p10, %p10459_p11  ;;  %p7333_p1 = por %p7332_p9, %p7331_p5 }
 0x812   : > { %v6622_v6 = vpop.f32.mrf.mxu0 }
 0x813   : > { %v4408_v33 = vadd.f32 %v9709_v59, %v4382_v49  ;;  %v9786_v7 = vadd.f32 %v7161_v1, %v4409_v2  ;;  %v4390_v55 = vadd.f32 %v6622_v6, %v4389_v62  ;;  %v4667_v2 = vld [vmem:[#allocation10 + $0xb8] sm:$0xff]  ;;  %v4666_v49 = vld [vmem:[#allocation10 + $0xb0] sm:$0xff]  ;;  %v4665_v6 = vld [vmem:[#allocation10 + $0xa8] sm:$0xff]  ;;  %p7327_p0 = pneg %p7326_p13 }
 0x814   : > { %v4142_v4 = vpop.f32.mrf.mxu0  ;;  %v4664_v62 = vld [vmem:[#allocation10 + $0xa0] sm:$0xff]  ;;  %v4663_v1 = vld [vmem:[#allocation10 + $0x98] sm:$0xff] }
 0x815   : > { %4454 = vadd.xlane.f32.xlu1 %v9786_v7  ;;  %v9790_v45 = vadd.f32 %v7162_v52, %v4408_v33  ;;  %v4387_v46 = vadd.f32 %v9700_v27, %v4142_v4  ;;  %v4675_v27 = vld [vmem:[#allocation10 + $0xf8] sm:$0xff]  ;;  %v4662_v4 = vld [vmem:[#allocation10 + $0x90] sm:$0xff]  ;;  %p7334_p3 = pnand %p7333_p1, %p7327_p0 }
 0x816   : > { %v6654_v38 = vpop.f32.mrf.mxu1  ;;  %4688 = vmatprep.subr.mxu0 %v4675_v27  ;;  %v4655_v27 = vld [vmem:[#allocation10 + $0x58] sm:$0xff] }
 0x817   : > { %v4391_v19 = vadd.f32 %v6654_v38, %v4390_v55  ;;  %4452 = vadd.xlane.f32.xlu0 %v9790_v45  ;;  %4689 = vmatpush1.msra.mxu0 %v4674_v37  ;;  %v4661_v55 = vld [vmem:[#allocation10 + $0x88] sm:$0xff]  ;;  %v4660_v38 = vld [vmem:[#allocation10 + $0x80] sm:$0xff]  ;;  %v4654_v37 = vld [vmem:[#allocation10 + $0x50] sm:$0xff] }
 0x818   : > { %v4335_v14 = vpop.f32.mrf.mxu1  ;;  %4690 = vmatprep.subr.mxu0 %v4673_v43  ;;  %v4653_v43 = vld [vmem:[#allocation10 + $0x48] sm:$0xff] }
 0x819   : > { %v4411_v9 = vadd.f32 %v9709_v59, %v4391_v19  ;;  %v4388_v34 = vadd.f32 %v4387_v46, %v4335_v14  ;;  %4691 = vmatpush1.msra.mxu0 %v4672_v51  ;;  %v4659_v14 = vld [vmem:[#allocation10 + $0x78] sm:$0xff] }
 0x81a   : > { %4692 = vmatprep.subr.mxu0 %v4671_v23  ;;  %v4651_v51 = vld [vmem:[#allocation10 + $0x38] sm:$0xff]  ;;  %v4650_v23 = vld [vmem:[#allocation10 + $0x30] sm:$0xff] }
 0x81b   : > { %v4410_v50 = vadd.f32 %v9709_v59, %v4388_v34  ;;  %v9797_v3 = vadd.f32 %v7163_v25, %v4411_v9  ;;  %4693 = vmatpush1.msra.mxu0 %v4670_v54  ;;  %v4658_v9 = vld [vmem:[#allocation10 + $0x70] sm:$0xff]  ;;  %v4657_v25 = vld [vmem:[#allocation10 + $0x68] sm:$0xff] }
 0x81c   : > { %4694 = vmatprep.subr.mxu0 %v4669_v44  ;;  %v4649_v54 = vld [vmem:[#allocation10 + $0x28] sm:$0xff] }
 0x81d   : > { %4458 = vadd.xlane.f32.xlu1 %v9797_v3  ;;  %v9801_v63 = vadd.f32 %v7164_v17, %v4410_v50  ;;  %v4656_v17 = vld [vmem:[#allocation10 + $0x60] sm:$0xff] }
 0x81f   : > { %4456 = vadd.xlane.f32.xlu0 %v9801_v63 }
 0x852   : > { %v4431_v59 = vpop.xlane.xlu1 %4430 }
 0x853   : > { %v4461_v22 = vmul.f32 0.0078125, %v4431_v59  ;;  %v4648_v59 = vld [vmem:[#allocation10 + $0x20] sm:$0xff] }
 0x854   : > { %v4429_v30 = vpop.xlane.xlu0 %4428 }
 0x855   : > { %v9805_v60 = vsub.f32 %v9714_v16, %v4461_v22  ;;  %v4460_v18 = vmul.f32 0.0078125, %v4429_v30  ;;  %v4647_v22 = vld [vmem:[#allocation10 + $0x18] sm:$0xff]  ;;  %v4646_v30 = vld [vmem:[#allocation10 + $0x10] sm:$0xff] }
 0x856   : > { %v4435_v56 = vpop.xlane.xlu1 %4434 }
 0x857   : > { %v9808_v31 = vsub.f32 %v9719_v12, %v4460_v18  ;;  %v4463_v10 = vmul.f32 0.0078125, %v4435_v56  ;;  %v4493_v5 = vmul.f32 %v9805_v60, %v9805_v60  ;;  %v4645_v18 = vld [vmem:[#allocation10 + $0x8] sm:$0xff]  ;;  %v4644_v56 = vld [vmem:[#allocation10] sm:$0xff] }
 0x858   : > { %v4433_v42 = vpop.xlane.xlu0 %4432 }
 0x859   : > { %v9813_v57 = vsub.f32 %v9724_v0, %v4463_v10  ;;  %v4462_v21 = vmul.f32 0.0078125, %v4433_v42  ;;  %4510 = vadd.xlane.f32.xlu1 %v4493_v5  ;;  %v4492_v39 = vmul.f32 %v9808_v31, %v9808_v31 }
 0x85a   : > { %v4439_v16 = vpop.xlane.xlu1 %4438 }
 0x85b   : > { %v9818_v53 = vsub.f32 %v9729_v29, %v4462_v21  ;;  %v4465_v47 = vmul.f32 0.0078125, %v4439_v16  ;;  %4508 = vadd.xlane.f32.xlu0 %v4492_v39  ;;  %v4495_v12 = vmul.f32 %v9813_v57, %v9813_v57 }
 0x85c   : > { %v4437_v61 = vpop.xlane.xlu0 %4436 }
 0x85d   : > { %v9823_v32 = vsub.f32 %v9734_v35, %v4465_v47  ;;  %v4464_v0 = vmul.f32 0.0078125, %v4437_v61  ;;  %4514 = vadd.xlane.f32.xlu1 %v4495_v12  ;;  %v4494_v41 = vmul.f32 %v9818_v53, %v9818_v53  ;;  %v4668_v35 = vld [vmem:[#allocation10 + $0xc0] sm:$0xff] }
 0x85e   : > { %4695 = vmatpush1.msra.mxu0 %v4668_v35 }
 0x85f   : > { %v9828_v26 = vsub.f32 %v9738_v13, %v4464_v0  ;;  %4512 = vadd.xlane.f32.xlu0 %v4494_v41  ;;  %v4497_v29 = vmul.f32 %v9823_v32, %v9823_v32  ;;  %4696 = vmatprep.subr.mxu0 %v4667_v2 }
 0x860   : > { %4697 = vmatpush1.msra.mxu0 %v4666_v49 }
 0x861   : > { %4518 = vadd.xlane.f32.xlu1 %v4497_v29  ;;  %v4496_v15 = vmul.f32 %v9828_v26, %v9828_v26  ;;  %4698 = vmatprep.subr.mxu0 %v4665_v6 }
 0x862   : > { %4699 = vmatpush1.msra.mxu0 %v4664_v62 }
 0x863   : > { %4516 = vadd.xlane.f32.xlu0 %v4496_v15  ;;  %4700 = vmatprep.subr.mxu0 %v4663_v1 }
 0x864   : > { %4701 = vmatpush1.msra.mxu0 %v4662_v4 }
 0x865   : > { %4702 = vmatprep.subr.mxu0 %v4661_v55 }
 0x866   : > { %4703 = vmatpush1.msra.mxu0 %v4660_v38 }
 0x867   : > { %4704 = vmatprep.subr.mxu0 %v4659_v14  ;;  %v5024_v14 = vld [vmem:[#allocation11 + $0x78] sm:$0xff] }
 0x868   : > { %4705 = vmatpush1.msra.mxu0 %v4658_v9  ;;  %v5039_v9 = vld [vmem:[#allocation11 + $0xf0] sm:$0xff] }
 0x869   : > { %4706 = vmatprep.subr.mxu0 %v4657_v25  ;;  %v5022_v25 = vld [vmem:[#allocation11 + $0x68] sm:$0xff] }
 0x86a   : > { %4707 = vmatpush1.msra.mxu0 %v4656_v17 }
 0x86b   : > { %4708 = vmatprep.subr.mxu0 %v4655_v27 }
 0x86c   : > { %4709 = vmatpush1.msra.mxu0 %v4654_v37 }
 0x86d   : > { %4710 = vmatprep.subr.mxu0 %v4653_v43 }
 0x878   : > { %v4443_v13 = vpop.xlane.xlu1 %4442 }
 0x879   : > { %v4467_v33 = vmul.f32 0.0078125, %v4443_v13 }
 0x87a   : > { %v4441_v52 = vpop.xlane.xlu0 %4440 }
 0x87b   : > { %v9835_v46 = vsub.f32 %v9748_v48, %v4467_v33  ;;  %v4466_v19 = vmul.f32 0.0078125, %v4441_v52 }
 0x87d   : > { %v9838_v34 = vsub.f32 %v9752_v40, %v4466_v19  ;;  %v4499_v50 = vmul.f32 %v9835_v46, %v9835_v46  ;;  %v4652_v40 = vld [vmem:[#allocation10 + $0x40] sm:$0xff]  ;;  %v5040_v19 = vld [vmem:[#allocation11 + $0xf8] sm:$0xff] }
 0x87e   : > { %4711 = vmatpush1.msra.mxu0 %v4652_v40  ;;  %5943 = vmatprep.subr.mxu1 %v5040_v19 }
 0x87f   : > { %4522 = vadd.xlane.f32.xlu1 %v4499_v50  ;;  %v4498_v48 = vmul.f32 %v9838_v34, %v9838_v34  ;;  %4712 = vmatprep.subr.mxu0 %v4651_v51  ;;  %v5023_v50 = vld [vmem:[#allocation11 + $0x70] sm:$0xff] }
 0x880   : > { %4713 = vmatpush1.msra.mxu0 %v4650_v23  ;;  %5944 = vmatpush3.msra.mxu1 %v5024_v14 }
 0x881   : > { %4520 = vadd.xlane.f32.xlu0 %v4498_v48  ;;  %4714 = vmatprep.subr.mxu0 %v4649_v54 }
 0x882   : > { %4715 = vmatpush1.msra.mxu0 %v4648_v59  ;;  %5945 = vmatprep.subr.mxu1 %v5039_v9 }
 0x883   : > { %4716 = vmatprep.subr.mxu0 %v4647_v22  ;;  %5946 = vmatpush3.msra.mxu1 %v5023_v50 }
 0x884   : > { %4717 = vmatpush1.msra.mxu0 %v4646_v30 }
 0x885   : > { %4718 = vmatprep.subr.mxu0 %v4645_v18 }
 0x886   : > { %4719 = vmatpush1.msra.mxu0 %v4644_v56 }
 0x894   : > { %v4447_v10 = vpop.xlane.xlu1 %4446 }
 0x895   : > { %v4469_v5 = vmul.f32 0.0078125, %v4447_v10 }
 0x896   : > { %v4445_v42 = vpop.xlane.xlu0 %4444 }
 0x897   : > { %v9845_v21 = vsub.f32 %v9762_v28, %v4469_v5  ;;  %v4468_v39 = vmul.f32 0.0078125, %v4445_v42  ;;  %v4606_v42 = vsub.s32 2, %v10456_v58 }
 0x898   : > { %v4451_v16 = vpop.xlane.xlu1 %4450 }
 0x899   : > { %v9848_v47 = vsub.f32 %v9767_v8, %v4468_v39  ;;  %v4471_v12 = vmul.f32 0.0078125, %v4451_v16  ;;  %v4501_v61 = vmul.f32 %v9845_v21, %v9845_v21 }
 0x89a   : > { %v4449_v0 = vpop.xlane.xlu0 %4448 }
 0x89b   : > { %v9853_v41 = vsub.f32 %v9773_v24, %v4471_v12  ;;  %v4470_v29 = vmul.f32 0.0078125, %v4449_v0  ;;  %4526 = vadd.xlane.f32.xlu1 %v4501_v61  ;;  %v4500_v15 = vmul.f32 %v9848_v47, %v9848_v47  ;;  %v4626_v12 = vsub.s32 3, %v10456_v58 }
 0x89c   : > { %v9887_v0 = vrot.slane %v9706_v36, %v4606_v42 }
 0x89d   : > { %v9858_v28 = vsub.f32 %v9778_v20, %v4470_v29  ;;  %4524 = vadd.xlane.f32.xlu0 %v4500_v15  ;;  %v4503_v8 = vmul.f32 %v9853_v41, %v9853_v41 }
 0x89e   : > { %v4455_v44 = vpop.xlane.xlu1 %4454 }
 0x89f   : > { %v4473_v35 = vmul.f32 0.0078125, %v4455_v44  ;;  %4530 = vadd.xlane.f32.xlu1 %v4503_v8  ;;  %v4502_v2 = vmul.f32 %v9858_v28, %v9858_v28  ;;  %v9893_v44 = vrot.slane %v9706_v36, %v4626_v12 }
 0x8a0   : > { %v4453_v24 = vpop.xlane.xlu0 %4452 }
 0x8a1   : > { %v9865_v49 = vsub.f32 %v9786_v7, %v4473_v35  ;;  %v4472_v6 = vmul.f32 0.0078125, %v4453_v24  ;;  %4528 = vadd.xlane.f32.xlu0 %v4502_v2 }
 0x8a3   : > { %v9868_v13 = vsub.f32 %v9790_v45, %v4472_v6  ;;  %v4505_v20 = vmul.f32 %v9865_v49, %v9865_v49 }
 0x8a5   : > { %4534 = vadd.xlane.f32.xlu1 %v4505_v20  ;;  %v4504_v62 = vmul.f32 %v9868_v13, %v9868_v13 }
 0x8a6   : > { %v4459_v33 = vpop.xlane.xlu1 %4458 }
 0x8a7   : > { %v4475_v1 = vmul.f32 0.0078125, %v4459_v33  ;;  %4532 = vadd.xlane.f32.xlu0 %v4504_v62 }
 0x8a8   : > { %v4457_v4 = vpop.xlane.xlu0 %4456 }
 0x8a9   : > { %v9875_v55 = vsub.f32 %v9797_v3, %v4475_v1  ;;  %v4474_v7 = vmul.f32 0.0078125, %v4457_v4  ;;  %v5038_v3 = vld [vmem:[#allocation11 + $0xe8] sm:$0xff] }
 0x8aa   : > { %5947 = vmatprep.subr.mxu1 %v5038_v3 }
 0x8ab   : > { %v9878_v52 = vsub.f32 %v9801_v63, %v4474_v7  ;;  %v4507_v45 = vmul.f32 %v9875_v55, %v9875_v55  ;;  %5948 = vmatpush3.msra.mxu1 %v5022_v25 }
 0x8ad   : > { %4538 = vadd.xlane.f32.xlu1 %v4507_v45  ;;  %v4506_v38 = vmul.f32 %v9878_v52, %v9878_v52 }
 0x8af   : > { %4536 = vadd.xlane.f32.xlu0 %v4506_v38 }
 0x8e2   : > { %v4511_v63 = vpop.xlane.xlu1 %4510 }
 0x8e3   : > { %v4541_v17 = vmul.f32 0.0078125, %v4511_v63 }
 0x8e4   : > { %v4509_v48 = vpop.xlane.xlu0 %4508 }
 0x8e5   : > { %v4557_v27 = vadd.f32 1e-05, %v4541_v17  ;;  %v4540_v37 = vmul.f32 0.0078125, %v4509_v48 }
 0x8e6   : > { %v4515_v43 = vpop.xlane.xlu1 %4514 }
 0x8e7   : > { %7052 = vrsqrt.f32 %v4557_v27  ;;  %v4556_v40 = vadd.f32 1e-05, %v4540_v37  ;;  %v4543_v51 = vmul.f32 0.0078125, %v4515_v43 }
 0x8e8   : > { %v4513_v23 = vpop.xlane.xlu0 %4512 }
 0x8e9   : > { %7054 = vrsqrt.f32 %v4556_v40  ;;  %v4542_v54 = vmul.f32 0.0078125, %v4513_v23  ;;  %v4559_v59 = vadd.f32 1e-05, %v4543_v51 }
 0x8ea   : > { %v4519_v30 = vpop.xlane.xlu1 %4518 }
 0x8eb   : > { %v4558_v22 = vadd.f32 1e-05, %v4542_v54  ;;  %v4545_v10 = vmul.f32 0.0078125, %v4519_v30 }
 0x8ec   : > { %v4517_v18 = vpop.xlane.xlu0 %4516 }
 0x8ed   : > { %7056 = vrsqrt.f32 %v4558_v22  ;;  %v4544_v56 = vmul.f32 0.0078125, %v4517_v18  ;;  %v4561_v39 = vadd.f32 1e-05, %v4545_v10 }
 0x8ee   : > { %7058 = vrsqrt.f32 %v4559_v59 }
 0x8ef   : > { %v4560_v5 = vadd.f32 1e-05, %v4544_v56 }
 0x8f1   : > { %7060 = vrsqrt.f32 %v4560_v5 }
 0x8f2   : > { %7062 = vrsqrt.f32 %v4561_v39 }
 0x8f4   : > { %v7053_v16 = vpop.eup %7052 }
 0x8f5   : > { %v4589_v15 = vmul.f32 %v7053_v16, %v9805_v60 }
 0x8f6   : > { %v7055_v61 = vpop.eup %7054 }
 0x8f7   : > { %v4588_v29 = vmul.f32 %v7055_v61, %v9808_v31  ;;  %v4609_v24 = vmul.f32 %v9887_v0, %v4589_v15 }
 0x8f9   : > { %v4608_v8 = vmul.f32 %v9887_v0, %v4588_v29  ;;  %v9903_v60 = vadd.f32 %v9893_v44, %v4609_v24 }
 0x8fa   : > { %v7057_v35 = vpop.eup %7056 }
 0x8fb   : > { %v9896_v2 = vadd.f32 %v9893_v44, %v4608_v8  ;;  %v4590_v6 = vmul.f32 %v7057_v35, %v9818_v53  ;;  %v7059_v20 = vpop.eup %7058 }
 0x8fc   : > { %v4591_v36 = vmul.f32 %v7059_v20, %v9813_v57 }
 0x8fd   : > { %4753 = vmatmul.mubr.f32.vlgmr.msra.gmra.mxu0 %v9896_v2  ;;  %v4610_v31 = vmul.f32 %v9887_v0, %v4590_v6 }
 0x8fe   : > { %4758 = vmatprep.mubr.f32.mxu0 %v10455_v11  ;;  %v7061_v62 = vpop.eup %7060  ;;  %v4611_v53 = vmul.f32 %v9887_v0, %v4591_v36 }
 0x8ff   : > { %v9910_v33 = vadd.f32 %v9893_v44, %v4610_v31  ;;  %v4592_v1 = vmul.f32 %v7061_v62, %v9828_v26  ;;  %v7063_v4 = vpop.eup %7062 }
 0x900   : > { %v9917_v7 = vadd.f32 %v9893_v44, %v4611_v53  ;;  %v4593_v45 = vmul.f32 %v7063_v4, %v9823_v32 }
 0x901   : > { %4759 = vmatmul.mubr.f32.gmra.mxu0 %v9903_v60  ;;  %v4612_v57 = vmul.f32 %v9887_v0, %v4592_v1 }
 0x902   : > { %4764 = vmatprep.mubr.f32.mxu0 %v10455_v11  ;;  %v4613_v3 = vmul.f32 %v9887_v0, %v4593_v45 }
 0x903   : > { %v9924_v50 = vadd.f32 %v9893_v44, %v4612_v57 }
 0x904   : > { %v9930_v32 = vadd.f32 %v9893_v44, %v4613_v3 }
 0x905   : > { %4765 = vmatmul.mubr.f32.gmra.mxu0 %v9910_v33 }
 0x906   : > { %4770 = vmatprep.mubr.f32.mxu0 %v10455_v11 }
 0x908   : > { %v4523_v38 = vpop.xlane.xlu1 %4522 }
 0x909   : > { %v4547_v19 = vmul.f32 0.0078125, %v4523_v38  ;;  %4771 = vmatmul.mubr.f32.gmra.mxu0 %v9917_v7 }
 0x90a   : > { %v4521_v14 = vpop.xlane.xlu0 %4520  ;;  %4776 = vmatprep.mubr.f32.mxu0 %v10455_v11 }
 0x90b   : > { %v4563_v26 = vadd.f32 1e-05, %v4547_v19  ;;  %v4546_v9 = vmul.f32 0.0078125, %v4521_v14 }
 0x90d   : > { %7064 = vrsqrt.f32 %v4563_v26  ;;  %v4562_v25 = vadd.f32 1e-05, %v4546_v9  ;;  %4777 = vmatmul.mubr.f32.gmra.mxu0 %v9924_v50 }
 0x90e   : > { %4782 = vmatprep.mubr.f32.mxu0 %v10455_v11 }
 0x90f   : > { %7066 = vrsqrt.f32 %v4562_v25 }
 0x911   : > { %4783 = vmatmul.mubr.f32.gmra.mxu0 %v9930_v32 }
 0x912   : > { %4788 = vmatprep.mubr.f32.mxu0 %v10455_v11 }
 0x91a   : > { %v7065_v63 = vpop.eup %7064 }
 0x91b   : > { %v4595_v27 = vmul.f32 %v7065_v63, %v9835_v46 }
 0x91c   : > { %v7067_v17 = vpop.eup %7066 }
 0x91d   : > { %v4594_v48 = vmul.f32 %v7067_v17, %v9838_v34  ;;  %v4615_v40 = vmul.f32 %v9887_v0, %v4595_v27 }
 0x91f   : > { %v4614_v37 = vmul.f32 %v9887_v0, %v4594_v48  ;;  %v9944_v54 = vadd.f32 %v9893_v44, %v4615_v40 }
 0x921   : > { %v9938_v43 = vadd.f32 %v9893_v44, %v4614_v37 }
 0x923   : > { %4789 = vmatmul.mubr.f32.gmra.mxu0 %v9938_v43 }
 0x924   : > { %v4527_v51 = vpop.xlane.xlu1 %4526  ;;  %4794 = vmatprep.mubr.f32.mxu0 %v10455_v11 }
 0x925   : > { %v4549_v23 = vmul.f32 0.0078125, %v4527_v51  ;;  %v5037_v51 = vld [vmem:[#allocation11 + $0xe0] sm:$0xff] }
 0x926   : > { %v4525_v59 = vpop.xlane.xlu0 %4524  ;;  %5949 = vmatprep.subr.mxu1 %v5037_v51 }
 0x927   : > { %v4565_v34 = vadd.f32 1e-05, %v4549_v23  ;;  %v4548_v22 = vmul.f32 0.0078125, %v4525_v59  ;;  %4795 = vmatmul.mubr.f32.gmra.mxu0 %v9944_v54  ;;  %v5021_v59 = vld [vmem:[#allocation11 + $0x60] sm:$0xff] }
 0x928   : > { %v4531_v46 = vpop.xlane.xlu1 %4530  ;;  %4800 = vmatprep.mubr.f32.mxu0 %v10455_v11  ;;  %5950 = vmatpush3.msra.mxu1 %v5021_v59 }
 0x929   : > { %7068 = vrsqrt.f32 %v4565_v34  ;;  %v4564_v30 = vadd.f32 1e-05, %v4548_v22  ;;  %v4551_v18 = vmul.f32 0.0078125, %v4531_v46  ;;  %v5020_v34 = vld [vmem:[#allocation11 + $0x58] sm:$0xff] }
 0x92a   : > { %v4529_v56 = vpop.xlane.xlu0 %4528 }
 0x92b   : > { %7070 = vrsqrt.f32 %v4564_v30  ;;  %v4550_v10 = vmul.f32 0.0078125, %v4529_v56  ;;  %v4567_v5 = vadd.f32 1e-05, %v4551_v18  ;;  %v5019_v18 = vld [vmem:[#allocation11 + $0x50] sm:$0xff]  ;;  %v5034_v56 = vld [vmem:[#allocation11 + $0xc8] sm:$0xff] }
 0x92d   : > { %v4566_v42 = vadd.f32 1e-05, %v4550_v10  ;;  %v5018_v10 = vld [vmem:[#allocation11 + $0x48] sm:$0xff] }
 0x92e   : > { %v4535_v39 = vpop.xlane.xlu1 %4534 }
 0x92f   : > { %7072 = vrsqrt.f32 %v4566_v42  ;;  %v4553_v12 = vmul.f32 0.0078125, %v4535_v39  ;;  %v5033_v39 = vld [vmem:[#allocation11 + $0xc0] sm:$0xff] }
 0x930   : > { %v4533_v16 = vpop.xlane.xlu0 %4532  ;;  %7074 = vrsqrt.f32 %v4567_v5 }
 0x931   : > { %v4552_v61 = vmul.f32 0.0078125, %v4533_v16  ;;  %v4569_v15 = vadd.f32 1e-05, %v4553_v12  ;;  %v5032_v16 = vld [vmem:[#allocation11 + $0xb8] sm:$0xff] }
 0x932   : > { %v5016_v12 = vld [vmem:[#allocation11 + $0x38] sm:$0xff] }
 0x933   : > { %v4568_v29 = vadd.f32 1e-05, %v4552_v61 }
 0x935   : > { %7076 = vrsqrt.f32 %v4568_v29  ;;  %v5031_v29 = vld [vmem:[#allocation11 + $0xb0] sm:$0xff] }
 0x936   : > { %v7069_v8 = vpop.eup %7068  ;;  %v4539_v35 = vpop.xlane.xlu1 %4538  ;;  %7078 = vrsqrt.f32 %v4569_v15  ;;  %v5015_v15 = vld [vmem:[#allocation11 + $0x30] sm:$0xff] }
 0x937   : > { %v4555_v6 = vmul.f32 0.0078125, %v4539_v35  ;;  %v4597_v62 = vmul.f32 %v7069_v8, %v9845_v21  ;;  %v5014_v8 = vld [vmem:[#allocation11 + $0x28] sm:$0xff]  ;;  %v5029_v35 = vld [vmem:[#allocation11 + $0xa0] sm:$0xff] }
 0x938   : > { %v7071_v24 = vpop.eup %7070  ;;  %v4537_v20 = vpop.xlane.xlu0 %4536 }
 0x939   : > { %v4554_v31 = vmul.f32 0.0078125, %v4537_v20  ;;  %v4596_v36 = vmul.f32 %v7071_v24, %v9848_v47  ;;  %v4571_v57 = vadd.f32 1e-05, %v4555_v6  ;;  %v4617_v38 = vmul.f32 %v9887_v0, %v4597_v62  ;;  %v5013_v24 = vld [vmem:[#allocation11 + $0x20] sm:$0xff]  ;;  %v5012_v6 = vld [vmem:[#allocation11 + $0x18] sm:$0xff]  ;;  %v5011_v20 = vld [vmem:[#allocation11 + $0x10] sm:$0xff] }
 0x93a   : > { %v5025_v62 = vld [vmem:[#allocation11 + $0x80] sm:$0xff] }
 0x93b   : > { %v4570_v53 = vadd.f32 1e-05, %v4554_v31  ;;  %v4616_v1 = vmul.f32 %v9887_v0, %v4596_v36  ;;  %v9959_v21 = vadd.f32 %v9893_v44, %v4617_v38  ;;  %v5026_v31 = vld [vmem:[#allocation11 + $0x88] sm:$0xff]  ;;  %v10458_v38 = vsub.s32 1, %v10456_v58 }
 0x93c   : > { %v7073_v4 = vpop.eup %7072  ;;  %v5010_v36 = vld [vmem:[#allocation11 + $0x8] sm:$0xff] }
 0x93d   : > { %7080 = vrsqrt.f32 %v4570_v53  ;;  %v9952_v45 = vadd.f32 %v9893_v44, %v4616_v1  ;;  %v4598_v19 = vmul.f32 %v7073_v4, %v9858_v28  ;;  %v7075_v14 = vpop.eup %7074  ;;  %v5009_v53 = vld [vmem:[#allocation11] sm:$0xff]  ;;  %v10457_v4 = vsub.s32 0, %v10456_v58 }
 0x93e   : > { %7082 = vrsqrt.f32 %v4571_v57  ;;  %v4599_v26 = vmul.f32 %v7075_v14, %v9853_v41  ;;  %v4676_v1 = vld [vmem:[%s10193_s7] sm:$0x3] }
 0x93f   : > { %4801 = vmatmul.mubr.f32.gmra.mxu0 %v9952_v45  ;;  %v4618_v47 = vmul.f32 %v9887_v0, %v4598_v19  ;;  %v10008_v57 = vrot.slane %v4676_v1, %v10457_v4  ;;  %v10012_v19 = vrot.slane %v4676_v1, %v10458_v38 }
 0x940   : > { %4806 = vmatprep.mubr.f32.mxu0 %v10455_v11  ;;  %v4619_v3 = vmul.f32 %v9887_v0, %v4599_v26 }
 0x941   : > { %v9966_v28 = vadd.f32 %v9893_v44, %v4618_v47 }
 0x942   : > { %v7077_v9 = vpop.eup %7076  ;;  %v9973_v17 = vadd.f32 %v9893_v44, %v4619_v3 }
 0x943   : > { %4807 = vmatmul.mubr.f32.gmra.mxu0 %v9959_v21  ;;  %v4600_v25 = vmul.f32 %v7077_v9, %v9868_v13  ;;  %v7079_v63 = vpop.eup %7078 }
 0x944   : > { %4812 = vmatprep.mubr.f32.mxu0 %v10455_v11  ;;  %v4601_v48 = vmul.f32 %v7079_v63, %v9865_v49  ;;  %v5036_v49 = vld [vmem:[#allocation11 + $0xd8] sm:$0xff] }
 0x945   : > { %v4620_v41 = vmul.f32 %v9887_v0, %v4600_v25  ;;  %5951 = vmatprep.subr.mxu1 %v5036_v49 }
 0x946   : > { %v4621_v13 = vmul.f32 %v9887_v0, %v4601_v48  ;;  %5952 = vmatpush3.msra.mxu1 %v5020_v34 }
 0x947   : > { %4813 = vmatmul.mubr.f32.gmra.mxu0 %v9966_v28  ;;  %v9980_v37 = vadd.f32 %v9893_v44, %v4620_v41 }
 0x948   : > { %4818 = vmatprep.mubr.f32.mxu0 %v10455_v11  ;;  %v9987_v22 = vadd.f32 %v9893_v44, %v4621_v13 }
 0x94a   : > { %v7081_v27 = vpop.eup %7080 }
 0x94b   : > { %4819 = vmatmul.mubr.f32.gmra.mxu0 %v9973_v17  ;;  %v4602_v40 = vmul.f32 %v7081_v27, %v9878_v52  ;;  %v7083_v23 = vpop.eup %7082  ;;  %v5035_v52 = vld [vmem:[#allocation11 + $0xd0] sm:$0xff] }
 0x94c   : > { %4824 = vmatprep.mubr.f32.mxu0 %v10455_v11  ;;  %v4603_v30 = vmul.f32 %v7083_v23, %v9875_v55  ;;  %5953 = vmatprep.subr.mxu1 %v5035_v52  ;;  %v5017_v55 = vld [vmem:[#allocation11 + $0x40] sm:$0xff] }
 0x94d   : > { %v4622_v46 = vmul.f32 %v9887_v0, %v4602_v40  ;;  %5954 = vmatpush3.msra.mxu1 %v5019_v18 }
 0x94e   : > { %5955 = vmatprep.subr.mxu1 %v5034_v56  ;;  %v4623_v42 = vmul.f32 %v9887_v0, %v4603_v30  ;;  %v5030_v0 = vld [vmem:[#allocation11 + $0xa8] sm:$0xff] }
 0x94f   : > { %4825 = vmatmul.mubr.f32.gmra.mxu0 %v9980_v37  ;;  %v9994_v5 = vadd.f32 %v9893_v44, %v4622_v46  ;;  %5956 = vmatpush3.msra.mxu1 %v5018_v10 }
 0x950   : > { %4830 = vmatprep.mubr.f32.mxu0 %v10455_v11  ;;  %5957 = vmatprep.subr.mxu1 %v5033_v39  ;;  %v10000_v61 = vadd.f32 %v9893_v44, %v4623_v42  ;;  %v5027_v44 = vld [vmem:[#allocation11 + $0x90] sm:$0xff] }
 0x951   : > { %5958 = vmatpush3.msra.mxu1 %v5017_v55 }
 0x952   : > { %5959 = vmatprep.subr.mxu1 %v5032_v16 }
 0x953   : > { %4831 = vmatmul.mubr.f32.gmra.mxu0 %v9987_v22  ;;  %5960 = vmatpush3.msra.mxu1 %v5016_v12 }
 0x954   : > { %4836 = vmatprep.mubr.f32.mxu0 %v10455_v11  ;;  %5961 = vmatprep.subr.mxu1 %v5031_v29 }
 0x955   : > { %5962 = vmatpush3.msra.mxu1 %v5015_v15 }
 0x956   : > { %5963 = vmatprep.subr.mxu1 %v5030_v0 }
 0x957   : > { %4837 = vmatmul.mubr.f32.gmra.mxu0 %v9994_v5  ;;  %5964 = vmatpush3.msra.mxu1 %v5014_v8 }
 0x958   : > { %4842 = vmatprep.mubr.f32.mxu0 %v10455_v11  ;;  %5965 = vmatprep.subr.mxu1 %v5029_v35  ;;  %v5028_v11 = vld [vmem:[#allocation11 + $0x98] sm:$0xff] }
 0x959   : > { %5966 = vmatpush3.msra.mxu1 %v5013_v24 }
 0x95a   : > { %5967 = vmatprep.subr.mxu1 %v5028_v11 }
 0x95b   : > { %4843 = vmatmul.mubr.f32.gmra.mxu0 %v10000_v61  ;;  %5968 = vmatpush3.msra.mxu1 %v5012_v6 }
 0x95c   : > { %5969 = vmatprep.subr.mxu1 %v5027_v44 }
 0x95d   : > { %5970 = vmatpush3.msra.mxu1 %v5011_v20 }
 0x95e   : > { %5971 = vmatprep.subr.mxu1 %v5026_v31 }
 0x95f   : > { %5972 = vmatpush3.msra.mxu1 %v5010_v36 }
 0x960   : > { %5973 = vmatprep.subr.mxu1 %v5025_v62 }
 0x961   : > { %5974 = vmatpush3.msra.mxu1 %v5009_v53 }
 0x9bd   : > { %v4754_v14 = vpop.f32.mrf.mxu0 }
 0x9be   : > { %v4755_v47 = vadd.f32 %v4754_v14, %v10008_v57 }
 0x9bf   : > { %v4756_v26 = vpop.f32.mrf.mxu0 }
 0x9c0   : > { %v4881_v9 = vmul.f32 0.70710677, %v4755_v47  ;;  %v4757_v3 = vadd.f32 %v4756_v26, %v10012_v19  ;;  %v4849_v36 = vmul.f32 0.5, %v4755_v47 }
 0x9c1   : > { %v4760_v25 = vpop.f32.mrf.mxu0 }
 0x9c2   : > { %7084 = verf.f32 %v4881_v9  ;;  %v4882_v63 = vmul.f32 0.70710677, %v4757_v3  ;;  %v4761_v41 = vadd.f32 %v4760_v25, %v10008_v57  ;;  %v4850_v44 = vmul.f32 0.5, %v4757_v3 }
 0x9c3   : > { %v4762_v48 = vpop.f32.mrf.mxu0 }
 0x9c4   : > { %7086 = verf.f32 %v4882_v63  ;;  %v4883_v27 = vmul.f32 0.70710677, %v4761_v41  ;;  %v4763_v13 = vadd.f32 %v4762_v48, %v10012_v19  ;;  %v4851_v48 = vmul.f32 0.5, %v4761_v41 }
 0x9c5   : > { %v4766_v40 = vpop.f32.mrf.mxu0 }
 0x9c6   : > { %7088 = verf.f32 %v4883_v27  ;;  %v4884_v51 = vmul.f32 0.70710677, %v4763_v13  ;;  %v4767_v23 = vadd.f32 %v4766_v40, %v10008_v57  ;;  %v4852_v25 = vmul.f32 0.5, %v4763_v13 }
 0x9c7   : > { %v4768_v59 = vpop.f32.mrf.mxu0 }
 0x9c8   : > { %7090 = verf.f32 %v4884_v51  ;;  %v4885_v49 = vmul.f32 0.70710677, %v4767_v23  ;;  %v4769_v34 = vadd.f32 %v4768_v59, %v10012_v19 }
 0x9c9   : > { %v4772_v46 = vpop.f32.mrf.mxu0 }
 0x9ca   : > { %7092 = verf.f32 %v4885_v49  ;;  %v4886_v30 = vmul.f32 0.70710677, %v4769_v34  ;;  %v4773_v52 = vadd.f32 %v4772_v46, %v10008_v57  ;;  %v4854_v51 = vmul.f32 0.5, %v4769_v34 }
 0x9cb   : > { %v4774_v18 = vpop.f32.mrf.mxu0  ;;  %v4853_v46 = vmul.f32 0.5, %v4767_v23 }
 0x9cc   : > { %7094 = verf.f32 %v4886_v30  ;;  %v4887_v56 = vmul.f32 0.70710677, %v4773_v52  ;;  %v4775_v10 = vadd.f32 %v4774_v18, %v10012_v19 }
 0x9cd   : > { %v4778_v42 = vpop.f32.mrf.mxu0 }
 0x9ce   : > { %7096 = verf.f32 %v4887_v56  ;;  %v4888_v39 = vmul.f32 0.70710677, %v4775_v10  ;;  %v4779_v55 = vadd.f32 %v4778_v42, %v10008_v57  ;;  %v4856_v13 = vmul.f32 0.5, %v4775_v10 }
 0x9cf   : > { %v7085_v16 = vpop.eup %7084  ;;  %v4780_v12 = vpop.f32.mrf.mxu0 }
 0x9d0   : > { %7098 = verf.f32 %v4888_v39  ;;  %v4889_v29 = vmul.f32 0.70710677, %v4779_v55  ;;  %v4781_v0 = vadd.f32 %v4780_v12, %v10012_v19  ;;  %v4945_v35 = vadd.f32 1.0, %v7085_v16 }
 0x9d1   : > { %v7087_v15 = vpop.eup %7086  ;;  %v4784_v8 = vpop.f32.mrf.mxu0  ;;  %v4855_v16 = vmul.f32 0.5, %v4773_v52 }
 0x9d2   : > { %7100 = verf.f32 %v4889_v29  ;;  %v10025_v24 = vadd.f32 %v4784_v8, %v10008_v57  ;;  %v4946_v11 = vadd.f32 1.0, %v7087_v15  ;;  %v4890_v20 = vmul.f32 0.70710677, %v4781_v0 }
 0x9d3   : > { %v7089_v6 = vpop.eup %7088  ;;  %v4786_v31 = vpop.f32.mrf.mxu0  ;;  %v4977_v38 = vmul.f32 %v4945_v35, %v4849_v36  ;;  %v4858_v35 = vmul.f32 0.5, %v4781_v0 }
 0x9d4   : > { %v4891_v62 = vmul.f32 0.70710677, %v10025_v24  ;;  %v4787_v53 = vadd.f32 %v4786_v31, %v10012_v19  ;;  %7102 = verf.f32 %v4890_v20  ;;  %v4978_v4 = vmul.f32 %v4946_v11, %v4850_v44 }
 0x9d5   : > { %v7091_v1 = vpop.eup %7090  ;;  %v4947_v14 = vadd.f32 1.0, %v7089_v6  ;;  %v4857_v6 = vmul.f32 0.5, %v4779_v55  ;;  %v4859_v0 = vmul.f32 0.5, %v10025_v24 }
 0x9d6   : > { %7104 = verf.f32 %v4891_v62  ;;  %v4892_v26 = vmul.f32 0.70710677, %v4787_v53  ;;  %5109 = vmatprep.mubr.f32.mxu1 %v4978_v4  ;;  %v4948_v63 = vadd.f32 1.0, %v7091_v1  ;;  %v4860_v4 = vmul.f32 0.5, %v4787_v53 }
 0x9d7   : > { %v7093_v9 = vpop.eup %7092  ;;  %5110 = vmatmul.mubr.f32.vlgmr.msra.gmra.mxu1 %v4977_v38  ;;  %v4979_v27 = vmul.f32 %v4947_v14, %v4851_v48 }
 0x9d8   : > { %7106 = verf.f32 %v4892_v26  ;;  %v4980_v47 = vmul.f32 %v4948_v63, %v4852_v25  ;;  %v4949_v40 = vadd.f32 1.0, %v7093_v9 }
 0x9d9   : > { %v7095_v3 = vpop.eup %7094 }
 0x9da   : > { %v4950_v59 = vadd.f32 1.0, %v7095_v3  ;;  %5114 = vmatprep.mubr.f32.mxu1 %v4980_v47  ;;  %v4981_v56 = vmul.f32 %v4949_v40, %v4853_v46 }
 0x9db   : > { %v7097_v49 = vpop.eup %7096  ;;  %5115 = vmatmul.mubr.f32.gmra.mxu1 %v4979_v27 }
 0x9dc   : > { %v4982_v30 = vmul.f32 %v4950_v59, %v4854_v51  ;;  %v4951_v42 = vadd.f32 1.0, %v7097_v49 }
 0x9dd   : > { %v7099_v18 = vpop.eup %7098 }
 0x9de   : > { %5119 = vmatprep.mubr.f32.mxu1 %v4982_v30  ;;  %v4952_v39 = vadd.f32 1.0, %v7099_v18  ;;  %v4983_v15 = vmul.f32 %v4951_v42, %v4855_v16 }
 0x9df   : > { %v7101_v41 = vpop.eup %7100  ;;  %5120 = vmatmul.mubr.f32.gmra.mxu1 %v4981_v56 }
 0x9e0   : > { %v4984_v12 = vmul.f32 %v4952_v39, %v4856_v13  ;;  %v4953_v8 = vadd.f32 1.0, %v7101_v41 }
 0x9e1   : > { %v7103_v29 = vpop.eup %7102 }
 0x9e2   : > { %5124 = vmatprep.mubr.f32.mxu1 %v4984_v12  ;;  %v4954_v23 = vadd.f32 1.0, %v7103_v29  ;;  %v4985_v36 = vmul.f32 %v4953_v8, %v4857_v6 }
 0x9e3   : > { %v7105_v34 = vpop.eup %7104  ;;  %v4790_v11 = vpop.f32.mrf.mxu0  ;;  %5125 = vmatmul.mubr.f32.gmra.mxu1 %v4983_v15 }
 0x9e4   : > { %v4791_v44 = vadd.f32 %v4790_v11, %v10008_v57  ;;  %v4986_v31 = vmul.f32 %v4954_v23, %v4858_v35  ;;  %v4955_v62 = vadd.f32 1.0, %v7105_v34 }
 0x9e5   : > { %v7107_v20 = vpop.eup %7106  ;;  %v4792_v10 = vpop.f32.mrf.mxu0 }
 0x9e6   : > { %v4893_v52 = vmul.f32 0.70710677, %v4791_v44  ;;  %v4793_v1 = vadd.f32 %v4792_v10, %v10012_v19  ;;  %5129 = vmatprep.mubr.f32.mxu1 %v4986_v31  ;;  %v4956_v14 = vadd.f32 1.0, %v7107_v20  ;;  %v4987_v63 = vmul.f32 %v4955_v62, %v4859_v0 }
 0x9e7   : > { %v4796_v38 = vpop.f32.mrf.mxu0  ;;  %5130 = vmatmul.mubr.f32.gmra.mxu1 %v4985_v36  ;;  %v4861_v49 = vmul.f32 0.5, %v4791_v44 }
 0x9e8   : > { %7108 = verf.f32 %v4893_v52  ;;  %v4894_v26 = vmul.f32 0.70710677, %v4793_v1  ;;  %v4797_v55 = vadd.f32 %v4796_v38, %v10008_v57  ;;  %v4988_v25 = vmul.f32 %v4956_v14, %v4860_v4 }
 0x9e9   : > { %v4798_v9 = vpop.f32.mrf.mxu0  ;;  %v4862_v40 = vmul.f32 0.5, %v4793_v1 }
 0x9ea   : > { %7110 = verf.f32 %v4894_v26  ;;  %v4895_v48 = vmul.f32 0.70710677, %v4797_v55  ;;  %v4799_v3 = vadd.f32 %v4798_v9, %v10012_v19  ;;  %5134 = vmatprep.mubr.f32.mxu1 %v4988_v25  ;;  %v4863_v39 = vmul.f32 0.5, %v4797_v55 }
 0x9eb   : > { %5135 = vmatmul.mubr.f32.gmra.mxu1 %v4987_v63 }
 0x9ec   : > { %7112 = verf.f32 %v4895_v48  ;;  %v4896_v53 = vmul.f32 0.70710677, %v4799_v3  ;;  %v4864_v42 = vmul.f32 0.5, %v4799_v3 }
 0x9ee   : > { %7114 = verf.f32 %v4896_v53 }
 0x9f5   : > { %v7109_v47 = vpop.eup %7108 }
 0x9f6   : > { %v4957_v24 = vadd.f32 1.0, %v7109_v47 }
 0x9f7   : > { %v7111_v27 = vpop.eup %7110 }
 0x9f8   : > { %v4958_v51 = vadd.f32 1.0, %v7111_v27  ;;  %v4989_v18 = vmul.f32 %v4957_v24, %v4861_v49 }
 0x9f9   : > { %v7113_v59 = vpop.eup %7112 }
 0x9fa   : > { %v4990_v46 = vmul.f32 %v4958_v51, %v4862_v40  ;;  %v4959_v56 = vadd.f32 1.0, %v7113_v59 }
 0x9fb   : > { %v7115_v30 = vpop.eup %7114 }
 0x9fc   : > { %5139 = vmatprep.mubr.f32.mxu1 %v4990_v46  ;;  %v4960_v13 = vadd.f32 1.0, %v7115_v30  ;;  %v4991_v16 = vmul.f32 %v4959_v56, %v4863_v39 }
 0x9fd   : > { %5140 = vmatmul.mubr.f32.gmra.mxu1 %v4989_v18 }
 0x9fe   : > { %v4992_v41 = vmul.f32 %v4960_v13, %v4864_v42 }
 0x9ff   : > { %v4802_v12 = vpop.f32.mrf.mxu0 }
 0xa00   : > { %v4803_v29 = vadd.f32 %v4802_v12, %v10008_v57  ;;  %5144 = vmatprep.mubr.f32.mxu1 %v4992_v41 }
 0xa01   : > { %v4804_v15 = vpop.f32.mrf.mxu0  ;;  %5145 = vmatmul.mubr.f32.gmra.mxu1 %v4991_v16 }
 0xa02   : > { %v4897_v8 = vmul.f32 0.70710677, %v4803_v29  ;;  %v4805_v34 = vadd.f32 %v4804_v15, %v10012_v19  ;;  %v4865_v56 = vmul.f32 0.5, %v4803_v29 }
 0xa03   : > { %v4808_v35 = vpop.f32.mrf.mxu0 }
 0xa04   : > { %7116 = verf.f32 %v4897_v8  ;;  %v4898_v11 = vmul.f32 0.70710677, %v4805_v34  ;;  %v4809_v23 = vadd.f32 %v4808_v35, %v10008_v57  ;;  %v4866_v46 = vmul.f32 0.5, %v4805_v34 }
 0xa05   : > { %v4810_v6 = vpop.f32.mrf.mxu0 }
 0xa06   : > { %7118 = verf.f32 %v4898_v11  ;;  %v4899_v44 = vmul.f32 0.70710677, %v4809_v23  ;;  %v4811_v20 = vadd.f32 %v4810_v6, %v10012_v19 }
 0xa07   : > { %v4814_v10 = vpop.f32.mrf.mxu0 }
 0xa08   : > { %7120 = verf.f32 %v4899_v44  ;;  %v4900_v31 = vmul.f32 0.70710677, %v4811_v20  ;;  %v10039_v36 = vadd.f32 %v4814_v10, %v10008_v57  ;;  %v4868_v34 = vmul.f32 0.5, %v4811_v20 }
 0xa09   : > { %v4816_v62 = vpop.f32.mrf.mxu0  ;;  %v4867_v44 = vmul.f32 0.5, %v4809_v23 }
 0xa0a   : > { %7122 = verf.f32 %v4900_v31  ;;  %v4901_v52 = vmul.f32 0.70710677, %v10039_v36  ;;  %v4817_v1 = vadd.f32 %v4816_v62, %v10012_v19 }
 0xa0b   : > { %v4820_v4 = vpop.f32.mrf.mxu0 }
 0xa0c   : > { %7124 = verf.f32 %v4901_v52  ;;  %v4902_v38 = vmul.f32 0.70710677, %v4817_v1  ;;  %v10044_v14 = vadd.f32 %v4820_v4, %v10008_v57 }
 0xa0d   : > { %v4822_v0 = vpop.f32.mrf.mxu0 }
 0xa0e   : > { %7126 = verf.f32 %v4902_v38  ;;  %v4903_v26 = vmul.f32 0.70710677, %v10044_v14  ;;  %v4823_v55 = vadd.f32 %v4822_v0, %v10012_v19 }
 0xa0f   : > { %v4826_v9 = vpop.f32.mrf.mxu0 }
 0xa10   : > { %7128 = verf.f32 %v4903_v26  ;;  %v4904_v25 = vmul.f32 0.70710677, %v4823_v55  ;;  %v10049_v63 = vadd.f32 %v4826_v9, %v10008_v57 }
 0xa11   : > { %v7117_v48 = vpop.eup %7116  ;;  %v4828_v3 = vpop.f32.mrf.mxu0 }
 0xa12   : > { %7130 = verf.f32 %v4904_v25  ;;  %v4905_v53 = vmul.f32 0.70710677, %v10049_v63  ;;  %v10053_v27 = vadd.f32 %v4828_v3, %v10012_v19  ;;  %v4961_v40 = vadd.f32 1.0, %v7117_v48 }
 0xa13   : > { %v7119_v47 = vpop.eup %7118  ;;  %v4832_v24 = vpop.f32.mrf.mxu0  ;;  %v4870_v25 = vmul.f32 0.5, %v4817_v1  ;;  %v4869_v3 = vmul.f32 0.5, %v10039_v36 }
 0xa14   : > { %7132 = verf.f32 %v4905_v53  ;;  %v10056_v51 = vadd.f32 %v4832_v24, %v10008_v57  ;;  %v4962_v59 = vadd.f32 1.0, %v7119_v47  ;;  %v4906_v30 = vmul.f32 0.70710677, %v10053_v27 }
 0xa15   : > { %v7121_v49 = vpop.eup %7120  ;;  %v4834_v18 = vpop.f32.mrf.mxu0  ;;  %v4993_v12 = vmul.f32 %v4961_v40, %v4865_v56  ;;  %v4872_v24 = vmul.f32 0.5, %v4823_v55 }
 0xa16   : > { %v4907_v42 = vmul.f32 0.70710677, %v10056_v51  ;;  %v10061_v13 = vadd.f32 %v4834_v18, %v10012_v19  ;;  %7134 = verf.f32 %v4906_v30  ;;  %v4994_v16 = vmul.f32 %v4962_v59, %v4866_v46 }
 0xa17   : > { %v7123_v39 = vpop.eup %7122  ;;  %v4838_v41 = vpop.f32.mrf.mxu0  ;;  %v4963_v15 = vadd.f32 1.0, %v7121_v49  ;;  %v4871_v18 = vmul.f32 0.5, %v10044_v14 }
 0xa18   : > { %7136 = verf.f32 %v4907_v42  ;;  %v4908_v8 = vmul.f32 0.70710677, %v10061_v13  ;;  %v10065_v11 = vadd.f32 %v4838_v41, %v10008_v57  ;;  %5149 = vmatprep.mubr.f32.mxu1 %v4994_v16  ;;  %v4964_v6 = vadd.f32 1.0, %v7123_v39 }
 0xa19   : > { %v7125_v35 = vpop.eup %7124  ;;  %v4840_v29 = vpop.f32.mrf.mxu0  ;;  %5150 = vmatmul.mubr.f32.gmra.mxu1 %v4993_v12  ;;  %v4995_v38 = vmul.f32 %v4963_v15, %v4867_v44  ;;  %v4873_v16 = vmul.f32 0.5, %v10049_v63  ;;  %v4876_v14 = vmul.f32 0.5, %v10061_v13 }
 0xa1a   : > { %7138 = verf.f32 %v4908_v8  ;;  %v4841_v10 = vadd.f32 %v4840_v29, %v10012_v19  ;;  %v4909_v62 = vmul.f32 0.70710677, %v10065_v11  ;;  %v4996_v4 = vmul.f32 %v4964_v6, %v4868_v34 }
 0xa1b   : > { %v7127_v31 = vpop.eup %7126  ;;  %v4844_v52 = vpop.f32.mrf.mxu0  ;;  %v4965_v0 = vadd.f32 1.0, %v7125_v35  ;;  %v4875_v6 = vmul.f32 0.5, %v10056_v51 }
 0xa1c   : > { %v4910_v26 = vmul.f32 0.70710677, %v4841_v10  ;;  %v4845_v20 = vadd.f32 %v4844_v52, %v10008_v57  ;;  %7140 = verf.f32 %v4909_v62  ;;  %5154 = vmatprep.mubr.f32.mxu1 %v4996_v4  ;;  %v4966_v23 = vadd.f32 1.0, %v7127_v31 }
 0xa1d   : > { %v7129_v9 = vpop.eup %7128  ;;  %v4846_v48 = vpop.f32.mrf.mxu0  ;;  %5155 = vmatmul.mubr.f32.gmra.mxu1 %v4995_v38  ;;  %v4997_v49 = vmul.f32 %v4965_v0, %v4869_v3  ;;  %v4878_v52 = vmul.f32 0.5, %v4841_v10  ;;  %v4877_v38 = vmul.f32 0.5, %v10065_v11  ;;  %v5043_v10 = vsub.s32 5, %v10456_v58  ;;  %v7165_v11 = vld [vmem:[%s10192_s6] sm:$0x3f] }
 0xa1e   : > { %7142 = verf.f32 %v4910_v26  ;;  %v4911_v53 = vmul.f32 0.70710677, %v4845_v20  ;;  %v4847_v40 = vadd.f32 %v4846_v48, %v10012_v19  ;;  %v4998_v59 = vmul.f32 %v4966_v23, %v4870_v25 }
 0xa1f   : > { %v7131_v47 = vpop.eup %7130  ;;  %v4967_v46 = vadd.f32 1.0, %v7129_v9  ;;  %v4874_v19 = vmul.f32 0.5, %v10053_v27  ;;  %v4879_v51 = vmul.f32 0.5, %v4845_v20 }
 0xa20   : > { %7144 = verf.f32 %v4911_v53  ;;  %v4968_v57 = vadd.f32 1.0, %v7131_v47  ;;  %v4912_v1 = vmul.f32 0.70710677, %v4847_v40  ;;  %5159 = vmatprep.mubr.f32.mxu1 %v4998_v59  ;;  %v4880_v25 = vmul.f32 0.5, %v4847_v40 }
 0xa21   : > { %v7133_v30 = vpop.eup %7132  ;;  %5160 = vmatmul.mubr.f32.gmra.mxu1 %v4997_v49  ;;  %v4999_v42 = vmul.f32 %v4967_v46, %v4871_v18  ;;  %v10082_v47 = vrot.slane %v7165_v11, %v5043_v10 }
 0xa22   : > { %v5000_v56 = vmul.f32 %v4968_v57, %v4872_v24  ;;  %7146 = verf.f32 %v4912_v1  ;;  %v4969_v39 = vadd.f32 1.0, %v7133_v30 }
 0xa23   : > { %v7135_v36 = vpop.eup %7134 }
 0xa24   : > { %5164 = vmatprep.mubr.f32.mxu1 %v5000_v56  ;;  %v4970_v41 = vadd.f32 1.0, %v7135_v36  ;;  %v5001_v8 = vmul.f32 %v4969_v39, %v4873_v16 }
 0xa25   : > { %v7137_v55 = vpop.eup %7136  ;;  %5165 = vmatmul.mubr.f32.gmra.mxu1 %v4999_v42 }
 0xa26   : > { %v5002_v15 = vmul.f32 %v4970_v41, %v4874_v19  ;;  %v4971_v35 = vadd.f32 1.0, %v7137_v55 }
 0xa27   : > { %v7139_v12 = vpop.eup %7138 }
 0xa28   : > { %v4972_v34 = vadd.f32 1.0, %v7139_v12  ;;  %5169 = vmatprep.mubr.f32.mxu1 %v5002_v15  ;;  %v5003_v62 = vmul.f32 %v4971_v35, %v4875_v6 }
 0xa29   : > { %v7141_v29 = vpop.eup %7140  ;;  %5170 = vmatmul.mubr.f32.gmra.mxu1 %v5001_v8 }
 0xa2a   : > { %v5004_v44 = vmul.f32 %v4972_v34, %v4876_v14  ;;  %v4973_v27 = vadd.f32 1.0, %v7141_v29 }
 0xa2b   : > { %v7143_v31 = vpop.eup %7142 }
 0xa2c   : > { %5174 = vmatprep.mubr.f32.mxu1 %v5004_v44  ;;  %v4974_v63 = vadd.f32 1.0, %v7143_v31  ;;  %v5005_v13 = vmul.f32 %v4973_v27, %v4877_v38 }
 0xa2d   : > { %v7145_v4 = vpop.eup %7144  ;;  %5175 = vmatmul.mubr.f32.gmra.mxu1 %v5003_v62 }
 0xa2e   : > { %v5006_v0 = vmul.f32 %v4974_v63, %v4878_v52  ;;  %v4975_v9 = vadd.f32 1.0, %v7145_v4 }
 0xa2f   : > { %v7147_v26 = vpop.eup %7146 }
 0xa30   : > { %5179 = vmatprep.mubr.f32.mxu1 %v5006_v0  ;;  %v4976_v48 = vadd.f32 1.0, %v7147_v26  ;;  %v5007_v3 = vmul.f32 %v4975_v9, %v4879_v51 }
 0xa31   : > { %5180 = vmatmul.mubr.f32.gmra.mxu1 %v5005_v13 }
 0xa32   : > { %v5008_v23 = vmul.f32 %v4976_v48, %v4880_v25 }
 0xa34   : > { %5184 = vmatprep.mubr.f32.mxu1 %v5008_v23 }
 0xa35   : > { %5185 = vmatmul.mubr.f32.gmra.mxu1 %v5007_v3 }
 0xa97   : > { %v5975_v53 = vpop.f32.mrf.mxu1 }
 0xa99   : > { %v5976_v24 = vpop.f32.mrf.mxu1 }
 0xa9a   : > { %v5977_v59 = vadd.f32 %v5976_v24, %v5975_v53 }
 0xa9b   : > { %v5978_v40 = vpop.f32.mrf.mxu1 }
 0xa9c   : > { %v5112_v20 = vadd.f32 %v5977_v59, %v10082_v47 }
 0xa9d   : > { %v5979_v49 = vpop.f32.mrf.mxu1 }
 0xa9e   : > { %v5190_v46 = vadd.f32 %v5112_v20, %v9896_v2  ;;  %v5980_v57 = vadd.f32 %v5979_v49, %v5978_v40 }
 0xa9f   : > { %v5981_v30 = vpop.f32.mrf.mxu1 }
 0xaa0   : > { %5206 = vst [vmem:[%s10088_s9] sm:$0xff] %v5190_v46  ;;  %v5117_v58 = vadd.f32 %v5980_v57, %v10082_v47 }
 0xaa1   : > { %v5982_v1 = vpop.f32.mrf.mxu1 }
 0xaa2   : > { %v5191_v18 = vadd.f32 %v5117_v58, %v9903_v60  ;;  %v5983_v56 = vadd.f32 %v5982_v1, %v5981_v30 }
 0xaa3   : > { %v5984_v36 = vpop.f32.mrf.mxu1 }
 0xaa4   : > { %5207 = vst [vmem:[%s10088_s9 + $0x8] sm:$0xff] %v5191_v18  ;;  %v5122_v2 = vadd.f32 %v5983_v56, %v10082_v47 }
 0xaa5   : > { %v5985_v42 = vpop.f32.mrf.mxu1 }
 0xaa6   : > { %v5192_v39 = vadd.f32 %v5122_v2, %v9910_v33  ;;  %v5986_v55 = vadd.f32 %v5985_v42, %v5984_v36 }
 0xaa7   : > { %v5987_v19 = vpop.f32.mrf.mxu1 }
 0xaa8   : > { %5208 = vst [vmem:[%s10088_s9 + $0x10] sm:$0xff] %v5192_v39  ;;  %v5127_v41 = vadd.f32 %v5986_v55, %v10082_v47 }
 0xaa9   : > { %v5988_v16 = vpop.f32.mrf.mxu1 }
 0xaaa   : > { %v5193_v12 = vadd.f32 %v5127_v41, %v9917_v7  ;;  %v5989_v15 = vadd.f32 %v5988_v16, %v5987_v19 }
 0xaab   : > { %v5990_v60 = vpop.f32.mrf.mxu1 }
 0xaac   : > { %5209 = vst [vmem:[%s10088_s9 + $0x18] sm:$0xff] %v5193_v12  ;;  %v5132_v8 = vadd.f32 %v5989_v15, %v10082_v47 }
 0xaad   : > { %v5991_v35 = vpop.f32.mrf.mxu1 }
 0xaae   : > { %v5194_v14 = vadd.f32 %v5132_v8, %v9924_v50  ;;  %v5992_v34 = vadd.f32 %v5991_v35, %v5990_v60 }
 0xab0   : > { %5210 = vst [vmem:[%s10088_s9 + $0x20] sm:$0xff] %v5194_v14  ;;  %v5137_v33 = vadd.f32 %v5992_v34, %v10082_v47 }
 0xab2   : > { %v5195_v29 = vadd.f32 %v5137_v33, %v9930_v32 }
 0xab4   : > { %5211 = vst [vmem:[%s10088_s9 + $0x28] sm:$0xff] %v5195_v29 }
 0xabd   : > { %v5993_v6 = vpop.f32.mrf.mxu1 }
 0xabf   : > { %v5994_v44 = vpop.f32.mrf.mxu1 }
 0xac0   : > { %v5995_v7 = vadd.f32 %v5994_v44, %v5993_v6 }
 0xac1   : > { %v5996_v31 = vpop.f32.mrf.mxu1 }
 0xac2   : > { %v5142_v62 = vadd.f32 %v5995_v7, %v10082_v47 }
 0xac3   : > { %v5997_v27 = vpop.f32.mrf.mxu1 }
 0xac4   : > { %v5196_v52 = vadd.f32 %v5142_v62, %v9938_v43  ;;  %v5998_v63 = vadd.f32 %v5997_v27, %v5996_v31 }
 0xac6   : > { %5212 = vst [vmem:[%s10088_s9 + $0x30] sm:$0xff] %v5196_v52  ;;  %v5147_v50 = vadd.f32 %v5998_v63, %v10082_v47 }
 0xac8   : > { %v5197_v4 = vadd.f32 %v5147_v50, %v9944_v54 }
 0xaca   : > { %5213 = vst [vmem:[%s10088_s9 + $0x38] sm:$0xff] %v5197_v4 }
 0xad9   : > { %v5999_v32 = vpop.f32.mrf.mxu1 }
 0xadb   : > { %v6000_v38 = vpop.f32.mrf.mxu1 }
 0xadc   : > { %v6001_v0 = vadd.f32 %v6000_v38, %v5999_v32 }
 0xadd   : > { %v6002_v26 = vpop.f32.mrf.mxu1 }
 0xade   : > { %v5152_v13 = vadd.f32 %v6001_v0, %v10082_v47 }
 0xadf   : > { %v6003_v9 = vpop.f32.mrf.mxu1 }
 0xae0   : > { %v5198_v25 = vadd.f32 %v5152_v13, %v9952_v45  ;;  %v6004_v48 = vadd.f32 %v6003_v9, %v6002_v26 }
 0xae1   : > { %v6005_v43 = vpop.f32.mrf.mxu1 }
 0xae2   : > { %5214 = vst [vmem:[%s10088_s9 + $0x40] sm:$0xff] %v5198_v25  ;;  %v5157_v51 = vadd.f32 %v6004_v48, %v10082_v47 }
 0xae3   : > { %v6006_v23 = vpop.f32.mrf.mxu1 }
 0xae4   : > { %v5199_v54 = vadd.f32 %v5157_v51, %v9959_v21  ;;  %v6007_v3 = vadd.f32 %v6006_v23, %v6005_v43 }
 0xae5   : > { %v6008_v10 = vpop.f32.mrf.mxu1 }
 0xae6   : > { %5215 = vst [vmem:[%s10088_s9 + $0x48] sm:$0xff] %v5199_v54  ;;  %v5162_v53 = vadd.f32 %v6007_v3, %v10082_v47 }
 0xae7   : > { %v6009_v11 = vpop.f32.mrf.mxu1 }
 0xae8   : > { %v5200_v24 = vadd.f32 %v5162_v53, %v9966_v28  ;;  %v6010_v59 = vadd.f32 %v6009_v11, %v6008_v10 }
 0xae9   : > { %v6011_v45 = vpop.f32.mrf.mxu1 }
 0xaea   : > { %5216 = vst [vmem:[%s10088_s9 + $0x50] sm:$0xff] %v5200_v24  ;;  %v5167_v40 = vadd.f32 %v6010_v59, %v10082_v47 }
 0xaeb   : > { %v6012_v20 = vpop.f32.mrf.mxu1 }
 0xaec   : > { %v5201_v49 = vadd.f32 %v5167_v40, %v9973_v17  ;;  %v6013_v46 = vadd.f32 %v6012_v20, %v6011_v45 }
 0xaed   : > { %v6014_v21 = vpop.f32.mrf.mxu1 }
 0xaee   : > { %5217 = vst [vmem:[%s10088_s9 + $0x58] sm:$0xff] %v5201_v49  ;;  %v5172_v57 = vadd.f32 %v6013_v46, %v10082_v47 }
 0xaef   : > { %v6015_v30 = vpop.f32.mrf.mxu1 }
 0xaf0   : > { %v5202_v58 = vadd.f32 %v5172_v57, %v9980_v37  ;;  %v6016_v28 = vadd.f32 %v6015_v30, %v6014_v21 }
 0xaf1   : > { %v6017_v1 = vpop.f32.mrf.mxu1 }
 0xaf2   : > { %5218 = vst [vmem:[%s10088_s9 + $0x60] sm:$0xff] %v5202_v58  ;;  %v5177_v18 = vadd.f32 %v6016_v28, %v10082_v47 }
 0xaf3   : > { %v6018_v56 = vpop.f32.mrf.mxu1 }
 0xaf4   : > { %v5203_v17 = vadd.f32 %v5177_v18, %v9987_v22  ;;  %v6019_v36 = vadd.f32 %v6018_v56, %v6017_v1 }
 0xaf5   : > { %v6020_v2 = vpop.f32.mrf.mxu1 }
 0xaf6   : > { %5219 = vst [vmem:[%s10088_s9 + $0x68] sm:$0xff] %v5203_v17  ;;  %v5182_v42 = vadd.f32 %v6019_v36, %v10082_v47 }
 0xaf7   : > { %v6021_v39 = vpop.f32.mrf.mxu1 }
 0xaf8   : > { %v5204_v37 = vadd.f32 %v5182_v42, %v9994_v5  ;;  %v6022_v55 = vadd.f32 %v6021_v39, %v6020_v2 }
 0xafa   : > { %5220 = vst [vmem:[%s10088_s9 + $0x70] sm:$0xff] %v5204_v37  ;;  %v5187_v19 = vadd.f32 %v6022_v55, %v10082_v47 }
 0xafc   : > { %v5205_v22 = vadd.f32 %v5187_v19, %v10000_v61 }
 0xafe   : > { %5221 = vst [vmem:[%s10088_s9 + $0x78] sm:$0xff] %v5205_v22 }
 0xaff   : > { %7337 = shalt.err (!%p7334_p3)
}
 0xb00   : > { %s7338_s26 = scalar_lea.hbm %s10139_s24, 2048  ;;  %s7342_s13 = scalar_lea.hbm %s10194_s8, 4096 }
 0xb01   : > { %p7339_p4 = scmp.ne.s32.totalorder %s10139_s24, %s7338_s26  ;;  %p7343_p2 = scmp.lt.s32.totalorder %s10139_s24, %s10194_s8 }
 0xb02   : > { %p7344_p7 = scmp.lt.s32.totalorder %s7342_s13, %s7338_s26 }
 0xb03   : > { %p7340_p12 = pnand %p7339_p4, %p10459_p11 }
 0xb04   : > { %p7345_p8 = por %p7344_p7, %p7343_p2 }
 0xb05   : > { %p7341_p6 = pneg %p7340_p12 }
 0xb07   : > { %p7346_p10 = pnand %p7345_p8, %p7341_p6 }
 0xb09   : > { %7349 = shalt.err (!%p7346_p10)
}
 0xb0a   : > { %s7419_s12 = smov 128   ;;  %s7420_s20 = smov 8  }
 0xb0b   : > { %6677 = dma.vmem_to_hbm [thread:$0]  (%p10459_p11), %s10141_s15, 2048, %s10139_s24, %s5223_s19, %s7419_s12, %s7419_s12, %s7420_s20  }
 0xb0c PF: > { %s5251_s22 = sand.u32 1, %s7388_s27   ;;  %p10460_p13 = scmp.ne.s32.totalorder %s10296_s17, 0 }
 0xb0d   : > { %p10461_p0 = scmp.ge.s32.totalorder %s7400_s30, 2  ;;  %s5252_s11 = scalar_lea.sflag [#allocation4], %s5251_s22 }
 0xb0f   : > { %p6700_p5 = pnand %p10461_p0, %p10460_p13 }
 0xb11   : > { %p6701_p9 = pneg %p6700_p5 }
 0xb13   : > { %7383 = dma.done.wait (%p6701_p9), %s5252_s11, 2048  }
 0xb14   : > { %7385 = vsyncadd (%p6701_p9), %s5252_s11, 4294965248  ;;  %p24_p1 = scmp.ge.s32.totalorder %s7571_s18, 4   ;;  %s10462_s27 = smov %s7392_s28 }
 0xb15   : > { %s10463_s28 = smov %s7396_s29  ;;  %s10464_s29 = smov %s7583_s23 }
 0xb16   : > { %s10465_s30 = smov %s7571_s18  ;;  %26 = sbr.rel (!%p24_p1) target bundleno = 11 (0xb), region = 117 }
 0xb1b   :  { %5257 = vsyncpa [#allocation3], 1 }
 0xb1c   :  { %5259 = vsyncpa [#allocation3 + $0x1], 1 }
 0xb1d   :  { %5260 = vsyncpa [#allocation6], 1 }
 0xb1e   :  { %5261 = vsyncpa [#allocation9], 1 }
 0xb1f   :  { %5262 = vsyncpa [#allocation12], 1 }
 0xb20   :  { %5263 = vsyncpa [#allocation4], 1 }
 0xb21   :  { %5265 = vsyncpa [#allocation4 + $0x1], 1 }

</bundles_post_ra>
